<compile_context>
chip_gen: v7x
topology: tpu7x:2x2x1
jax: 0.10.0
libtpu: 0.0.40
codegen_flags: <defaults>
</compile_context>

<pallas_src>
import functools
import math

import numpy as np
import jax
import jax.numpy as jnp
from jax import lax
from jax.experimental import pallas as pl
from jax.experimental.pallas import tpu as pltpu


# ---------------------------------------------------------------------------
# Fused kernel: conv1 -> conv2 -> conv3 -> fc1(+relu) -> fc2 for Bt images
# ---------------------------------------------------------------------------

def _qnet_kernel(x_ref, s1_ref, w1_ref, b1_ref, s2_ref, w2_ref, b2_ref,
                 s3_ref, w3_ref, b3_ref, t_ref, wf1_ref, bf1_ref,
                 wf2_ref, bf2_ref, o_ref):
  """Whole QNetwork forward for one tile of Bt images (stacked along M)."""
  f32, bf16 = jnp.float32, jnp.bfloat16

  def stage(a, s_ref, w_ref, b_ref, act):
    # a: (R_in, N_in) bf16 activation slab (per-image rows stacked along M).
    # s_ref[k] is a 0/1 gather matrix picking the rows of H-tap k for every
    # image; the gathered values are exact bf16 copies.  The taps are
    # lane-concatenated and hit the MXU as a single wide banded matmul.
    n_taps = s_ref.shape[0]
    taps = [
        jnp.dot(s_ref[k], a, preferred_element_type=f32).astype(bf16)
        for k in range(n_taps)
    ]
    xt = taps[0] if n_taps == 1 else jnp.concatenate(taps, axis=-1)
    z = jnp.dot(xt, w_ref[...], preferred_element_type=f32) + b_ref[...]
    return act(z).astype(bf16)

  # uint8 -> f32 -> bf16 (0..255 exact in bf16); the /255 is folded into w1.
  a = x_ref[...].astype(f32).astype(bf16)                  # (Bt*H, W*C)

  a = stage(a, s1_ref, w1_ref, b1_ref, jnp.tanh)           # (Bt*Ho1, Wo1p*32)
  a = stage(a, s2_ref, w2_ref, b2_ref, jnp.tanh)           # (Bt*Ho2, Wo2p*64)
  a = stage(a, s3_ref, w3_ref, b3_ref, jnp.tanh)           # (Bt*Ho3, Wo3p*128)

  # Flatten (NCHW permutation folded into wf1) + fc1 + ReLU, hidden stays in
  # vregs, then fc2 (+bias) into the lane-padded logits block.
  h = stage(a, t_ref, wf1_ref, bf1_ref,
            lambda v: jnp.maximum(v, 0.0))                 # (Bt, 512) bf16
  z = jnp.dot(h, wf2_ref[...], preferred_element_type=f32) + bf2_ref[...]
  o_ref[0] = z                                             # (Bt, A_pad) f32


# ---------------------------------------------------------------------------
# Static geometry / host-side constant construction
# ---------------------------------------------------------------------------

def _conv_out(n):
  return (n - 4) // 2 + 1


def _geometry(h, w, c_in, channels=(32, 64, 128)):
  """Per-layer geometry of the three 4x4 stride-2 VALID convs."""
  layers = []
  hv, wv, w_lane, cin = h, w, w, c_in
  for cout in channels:
    ho, wo = _conv_out(hv), _conv_out(wv)
    assert ho >= 1 and wo >= 1, "observation too small for three 4x4/s2 convs"
    step = 128 // math.gcd(cout, 128)          # pad Wo so Wo*Cout is lane-dense
    wo_pad = -(-wo // step) * step
    layers.append(dict(cin=cin, cout=cout, hv=hv, wv=wv, ho=ho, wo=wo,
                       wo_pad=wo_pad, w_lane_in=w_lane,
                       n_in=w_lane * cin, n_out=wo_pad * cout))
    hv, wv, w_lane, cin = ho, wo, wo_pad, cout
  return layers


def _pick_batch_tile(batch):
  """Largest divisor of batch <= 8 that still leaves >= 2 grid steps (v7x has
  two TensorCores and 'parallel' shards the batch axis across them)."""
  best = 1
  for d in range(1, min(batch, 8) + 1):
    if batch % d == 0 and batch // d >= 2:
      best = d
  return best


def _make_select(bt, g_out, g_in, n_taps, stride):
  """0/1 gather matrices: S[k] @ A picks slab row (b*g_in + stride*i + k) for
  every image b and output row i.  Used for the stride-2 H taps of each conv
  and for the final per-image row merge feeding fc1."""
  s = np.zeros((n_taps, bt * g_out, bt * g_in), np.float32)
  for k in range(n_taps):
    for b in range(bt):
      for i in range(g_out):
        j = stride * i + k
        if j < g_in:
          s[k, b * g_out + i, b * g_in + j] = 1.0
  return jnp.asarray(s, jnp.bfloat16)


def _prep_band(w_oihw, layer, scale=None):
  """torch conv weight (Cout,Cin,4,4) -> (4*N_in, N_out) bf16 banded weight.

  Row block k*N_in + w_in*Cin + ci holds tap (kh=k, kw=w_in-2*wo) for output
  column block wo*Cout + co, matching the kernel's lane-concatenated kh taps.
  Columns for padded wo >= Wo are zero.
  """
  cout, cin, kh, kw = (int(v) for v in w_oihw.shape)
  assert (kh, kw) == (4, 4) and cout == layer["cout"] and cin == layer["cin"]
  wt = np.asarray(w_oihw, np.float32)
  if scale is not None:
    wt = wt * scale
  n_in, n_out = layer["n_in"], layer["n_out"]
  band = np.zeros((4, n_in, n_out), np.float32)
  for k in range(4):
    for wo in range(layer["wo"]):
      for t in range(4):
        wi = 2 * wo + t
        assert wi < layer["w_lane_in"]
        band[k, wi * cin:(wi + 1) * cin,
             wo * cout:(wo + 1) * cout] = wt[:, :, k, t].T
  return jnp.asarray(band.reshape(4 * n_in, n_out), jnp.bfloat16)


def _prep_conv_bias(b, layer):
  """(Cout,) -> (1, Wo_pad*Cout) f32 row; padded wo columns get zero bias."""
  cout, wo, n_out = layer["cout"], layer["wo"], layer["n_out"]
  out = np.zeros((1, n_out), np.float32)
  out[0, :wo * cout] = np.tile(np.asarray(b, np.float32), wo)
  return jnp.asarray(out)


def _prep_fc1(w, h3, w3, w3_pad, c3):
  """torch fc1 (512, C*H*W NCHW-flatten) -> (h3 * w3_pad*C, 512) bf16.

  Folds the NHWC(lane)->NCHW(torch flatten) permutation into the weight rows
  so the kernel consumes the conv3 slab directly; rows for padded w3 are zero.
  """
  nout, k = (int(v) for v in w.shape)
  assert k == c3 * h3 * w3
  w4 = np.asarray(w, np.float32).reshape(nout, c3, h3, w3)
  out = np.zeros((h3, w3_pad * c3, nout), np.float32)
  for hh in range(h3):
    for ww in range(w3):
      out[hh, ww * c3:(ww + 1) * c3, :] = w4[:, :, hh, ww].T
  return jnp.asarray(out.reshape(h3 * w3_pad * c3, nout), jnp.bfloat16)


def _prep_fc2(w, a_pad):
  """torch fc2 (A, 512) -> (512, A_pad) bf16, zero-padded to 128 lanes."""
  a, k = (int(v) for v in w.shape)
  out = np.zeros((k, a_pad), np.float32)
  out[:, :a] = np.asarray(w, np.float32).T
  return jnp.asarray(out, jnp.bfloat16)


def prepare_params(tw, input_hw, n_actions):
  """torch-layout weights -> kernel-layout weights (bf16 bands, f32 biases)."""
  h, w = input_hw
  c_in = int(tw["conv1_w"].shape[1])
  L = _geometry(h, w, c_in)
  a_pad = max(128, -(-n_actions // 128) * 128)
  l3 = L[2]
  return {
      # /255 folded into the conv1 band -> the image stays uint8 in HBM.
      "w1": _prep_band(tw["conv1_w"], L[0], scale=1.0 / 255.0),
      "b1": _prep_conv_bias(tw["conv1_b"], L[0]),
      "w2": _prep_band(tw["conv2_w"], L[1]),
      "b2": _prep_conv_bias(tw["conv2_b"], L[1]),
      "w3": _prep_band(tw["conv3_w"], L[2]),
      "b3": _prep_conv_bias(tw["conv3_b"], L[2]),
      "wf1": _prep_fc1(tw["fc1_w"], l3["ho"], l3["wo"], l3["wo_pad"],
                       l3["cout"]),
      "bf1": jnp.asarray(np.asarray(tw["fc1_b"], np.float32)[None, :]),
      "wf2": _prep_fc2(tw["fc2_w"], a_pad),
      "bf2": jnp.asarray(np.pad(np.asarray(tw["fc2_b"], np.float32),
                                (0, a_pad - n_actions))[None, :]),
  }


# ---------------------------------------------------------------------------
# Forward pass (single pallas_call)
# ---------------------------------------------------------------------------

def qnetwork_forward(x_u8, params, *, n_actions):
  """x_u8 (B,H,W,C) uint8 -> (B, n_actions) f32 logits."""
  b, h, w, c = x_u8.shape
  L = _geometry(h, w, c)
  bt = _pick_batch_tile(b)
  nsteps = b // bt
  a_pad = int(params["wf2"].shape[1])

  # 0/1 row-selection matrices (trace-time constants, exact in bf16).
  s1 = _make_select(bt, L[0]["ho"], h, 4, 2)
  s2 = _make_select(bt, L[1]["ho"], L[0]["ho"], 4, 2)
  s3 = _make_select(bt, L[2]["ho"], L[1]["ho"], 4, 2)
  tm = _make_select(bt, 1, L[2]["ho"], L[2]["ho"], 1)

  # Contiguous 2-D view of the NHWC uint8 batch: rows = (image, image row),
  # lanes = (w, c).  Pure view, no relayout / extra XLA pass.
  x2d = x_u8.reshape(b * h, w * c)
  assert (bt * h) % 8 == 0, "batch-tile * H must be sublane aligned"

  def const_spec(arr):
    nd = arr.ndim
    return pl.BlockSpec(tuple(arr.shape), lambda i, _n=nd: (0,) * _n)

  args = (x2d, s1, params["w1"], params["b1"],
          s2, params["w2"], params["b2"],
          s3, params["w3"], params["b3"],
          tm, params["wf1"], params["bf1"], params["wf2"], params["bf2"])

  in_specs = [pl.BlockSpec((bt * h, w * c), lambda i: (i, 0))]
  in_specs += [const_spec(a) for a in args[1:]]

  out = pl.pallas_call(
      _qnet_kernel,
      out_shape=jax.ShapeDtypeStruct((nsteps, bt, a_pad), jnp.float32),
      grid=(nsteps,),
      in_specs=in_specs,
      out_specs=pl.BlockSpec((1, bt, a_pad), lambda i: (i, 0, 0)),
      compiler_params=pltpu.CompilerParams(
          dimension_semantics=("parallel",)),  # v7x: each TC takes >=1 step
  )(*args)

  return out.reshape(b, a_pad)[:, :n_actions]


# ---------------------------------------------------------------------------
# Pure-JAX reference (mirrors the torch forward with the same bf16 rounding
# the kernel uses, so the comparison isolates layout / weight-fold correctness)
# ---------------------------------------------------------------------------

def reference_forward(x_u8, tw):
  f32 = jnp.float32
  rnd = lambda v: v.astype(jnp.bfloat16).astype(f32)     # emulate bf16 storage

  def conv(hmap, w_oihw, bias):
    wk = jnp.transpose(rnd(w_oihw), (2, 3, 1, 0))        # HWIO
    y = lax.conv_general_dilated(
        hmap, wk, window_strides=(2, 2), padding="VALID",
        dimension_numbers=("NHWC", "HWIO", "NHWC"),
        precision=lax.Precision.HIGHEST)
    return rnd(jnp.tanh(y + bias.astype(f32)))

  x = x_u8.astype(f32)
  h1 = conv(x, tw["conv1_w"] / 255.0, tw["conv1_b"])      # /255 fold, as kernel
  h2 = conv(h1, tw["conv2_w"], tw["conv2_b"])
  h3 = conv(h2, tw["conv3_w"], tw["conv3_b"])
  flat = jnp.transpose(h3, (0, 3, 1, 2)).reshape(x.shape[0], -1)  # NCHW flatten
  hid = jnp.matmul(flat, rnd(tw["fc1_w"]).T,
                   precision=lax.Precision.HIGHEST) + tw["fc1_b"].astype(f32)
  hid = rnd(jnp.maximum(hid, 0.0))
  return jnp.matmul(hid, rnd(tw["fc2_w"]).T,
                    precision=lax.Precision.HIGHEST) + tw["fc2_b"].astype(f32)


# ---------------------------------------------------------------------------
# Demo / self-check
# ---------------------------------------------------------------------------

if __name__ == "__main__":
  key = jax.random.PRNGKey(0)
  B, H, W, C = 8, 32, 32, 4          # NHWC observation (e.g. 4 stacked frames)
  N_ACTIONS = 6

  ks = jax.random.split(key, 10)
  x = jax.random.randint(ks[0], (B, H, W, C), 0, 256,
                         dtype=jnp.int32).astype(jnp.uint8)

  L = _geometry(H, W, C)
  flatten_size = L[2]["cout"] * L[2]["ho"] * L[2]["wo"]   # 128*2*2 = 512

  def init(k, shape, scale):
    return jax.random.normal(k, shape, jnp.float32) * scale

  # Weights in the original torch layouts (conv4 exists in torch __init__ but
  # is never used in forward, so it has no counterpart here).
  tw = {
      "conv1_w": init(ks[1], (32, C, 4, 4), 0.10),
      "conv1_b": init(ks[2], (32,), 0.10),
      "conv2_w": init(ks[3], (64, 32, 4, 4), 0.05),
      "conv2_b": init(ks[4], (64,), 0.05),
      "conv3_w": init(ks[5], (128, 64, 4, 4), 0.04),
      "conv3_b": init(ks[6], (128,), 0.04),
      "fc1_w": init(ks[7], (512, flatten_size), 0.04),
      "fc1_b": init(ks[8], (512,), 0.04),
      "fc2_w": init(ks[9], (N_ACTIONS, 512), 0.04),
      "fc2_b": jnp.zeros((N_ACTIONS,), jnp.float32),
  }

  params = prepare_params(tw, (H, W), N_ACTIONS)
  fwd = jax.jit(functools.partial(qnetwork_forward, n_actions=N_ACTIONS))
  out = jax.block_until_ready(fwd(x, params))
  assert out.shape == (B, N_ACTIONS)

  # Numerical check of the fused kernel / weight relayouts against the
  # torch-equivalent reference (same bf16 rounding points).
  ref = reference_forward(x, tw)
  np.testing.assert_allclose(np.asarray(out), np.asarray(ref),
                             rtol=2e-2, atol=2e-2)

  print("KERNEL_OK")
</pallas_src>

<mosaic_0001>
module attributes {stable_mosaic.version = 11 : i64} {
  func.func @_qnet_kernel(%arg0: i32, %arg1: memref<128x128xi8, #tpu.memory_space<vmem>>, %arg2: memref<4x60x128xbf16, #tpu.memory_space<vmem>>, %arg3: memref<512x512xbf16, #tpu.memory_space<vmem>>, %arg4: memref<1x512xf32, #tpu.memory_space<vmem>>, %arg5: memref<4x24x60xbf16, #tpu.memory_space<vmem>>, %arg6: memref<2048x384xbf16, #tpu.memory_space<vmem>>, %arg7: memref<1x384xf32, #tpu.memory_space<vmem>>, %arg8: memref<4x8x24xbf16, #tpu.memory_space<vmem>>, %arg9: memref<1536x256xbf16, #tpu.memory_space<vmem>>, %arg10: memref<1x256xf32, #tpu.memory_space<vmem>>, %arg11: memref<2x4x8xbf16, #tpu.memory_space<vmem>>, %arg12: memref<512x512xbf16, #tpu.memory_space<vmem>>, %arg13: memref<1x512xf32, #tpu.memory_space<vmem>>, %arg14: memref<512x128xbf16, #tpu.memory_space<vmem>>, %arg15: memref<1x128xf32, #tpu.memory_space<vmem>>, %arg16: memref<1x4x128xf32, #tpu.memory_space<vmem>>) attributes {dimension_semantics = [#tpu.dimension_semantics<parallel>], iteration_bounds = array<i64: 2>, scalar_prefetch = 0 : i64, scratch_operands = 0 : i64, tpu.core_type = #tpu.core_type<tc>, window_params = [{transform_indices = @transform_0, window_bounds = array<i64: 128, 128>}, {pipeline_mode = #tpu.pipeline_mode<synchronous>, transform_indices = @transform_1, window_bounds = array<i64: 4, 60, 128>}, {pipeline_mode = #tpu.pipeline_mode<synchronous>, transform_indices = @transform_2, window_bounds = array<i64: 512, 512>}, {pipeline_mode = #tpu.pipeline_mode<synchronous>, transform_indices = @transform_3, window_bounds = array<i64: 1, 512>}, {pipeline_mode = #tpu.pipeline_mode<synchronous>, transform_indices = @transform_4, window_bounds = array<i64: 4, 24, 60>}, {pipeline_mode = #tpu.pipeline_mode<synchronous>, transform_indices = @transform_5, window_bounds = array<i64: 2048, 384>}, {pipeline_mode = #tpu.pipeline_mode<synchronous>, transform_indices = @transform_6, window_bounds = array<i64: 1, 384>}, {pipeline_mode = #tpu.pipeline_mode<synchronous>, transform_indices = @transform_7, window_bounds = array<i64: 4, 8, 24>}, {pipeline_mode = #tpu.pipeline_mode<synchronous>, transform_indices = @transform_8, window_bounds = array<i64: 1536, 256>}, {pipeline_mode = #tpu.pipeline_mode<synchronous>, transform_indices = @transform_9, window_bounds = array<i64: 1, 256>}, {pipeline_mode = #tpu.pipeline_mode<synchronous>, transform_indices = @transform_10, window_bounds = array<i64: 2, 4, 8>}, {pipeline_mode = #tpu.pipeline_mode<synchronous>, transform_indices = @transform_11, window_bounds = array<i64: 512, 512>}, {pipeline_mode = #tpu.pipeline_mode<synchronous>, transform_indices = @transform_12, window_bounds = array<i64: 1, 512>}, {pipeline_mode = #tpu.pipeline_mode<synchronous>, transform_indices = @transform_13, window_bounds = array<i64: 512, 128>}, {pipeline_mode = #tpu.pipeline_mode<synchronous>, transform_indices = @transform_14, window_bounds = array<i64: 1, 128>}, {transform_indices = @transform_15, window_bounds = array<i64: 1, 4, 128>}]} {
    %c0 = arith.constant 0 : index
    %c0_0 = arith.constant 0 : index
    %0 = vector.load %arg1[%c0, %c0_0] : memref<128x128xi8, #tpu.memory_space<vmem>>, vector<128x128xi8>
    %1 = arith.uitofp %0 : vector<128x128xi8> to vector<128x128xf32>
    %2 = arith.truncf %1 : vector<128x128xf32> to vector<128x128xbf16>
    %c0_1 = arith.constant 0 : index
    %c0_2 = arith.constant 0 : index
    %c0_3 = arith.constant 0 : index
    %3 = vector.load %arg2[%c0_1, %c0_2, %c0_3] : memref<4x60x128xbf16, #tpu.memory_space<vmem>>, vector<1x60x128xbf16>
    %4 = vector.shape_cast %3 : vector<1x60x128xbf16> to vector<60x128xbf16>
    %cst = arith.constant dense<0.000000e+00> : vector<60x128xf32>
    %5 = tpu.matmul %4, %2, %cst {dimension_numbers = #tpu.dot_dimension_numbers<[1], [0], [0], [1], [0, 0, 1, 1], [], []>} : vector<60x128xbf16>, vector<128x128xbf16>, vector<60x128xf32> -> vector<60x128xf32>
    %6 = arith.truncf %5 : vector<60x128xf32> to vector<60x128xbf16>
    %c1 = arith.constant 1 : index
    %c0_4 = arith.constant 0 : index
    %c0_5 = arith.constant 0 : index
    %7 = vector.load %arg2[%c1, %c0_4, %c0_5] : memref<4x60x128xbf16, #tpu.memory_space<vmem>>, vector<1x60x128xbf16>
    %8 = vector.shape_cast %7 : vector<1x60x128xbf16> to vector<60x128xbf16>
    %cst_6 = arith.constant dense<0.000000e+00> : vector<60x128xf32>
    %9 = tpu.matmul %8, %2, %cst_6 {dimension_numbers = #tpu.dot_dimension_numbers<[1], [0], [0], [1], [0, 0, 1, 1], [], []>} : vector<60x128xbf16>, vector<128x128xbf16>, vector<60x128xf32> -> vector<60x128xf32>
    %10 = arith.truncf %9 : vector<60x128xf32> to vector<60x128xbf16>
    %c2 = arith.constant 2 : index
    %c0_7 = arith.constant 0 : index
    %c0_8 = arith.constant 0 : index
    %11 = vector.load %arg2[%c2, %c0_7, %c0_8] : memref<4x60x128xbf16, #tpu.memory_space<vmem>>, vector<1x60x128xbf16>
    %12 = vector.shape_cast %11 : vector<1x60x128xbf16> to vector<60x128xbf16>
    %cst_9 = arith.constant dense<0.000000e+00> : vector<60x128xf32>
    %13 = tpu.matmul %12, %2, %cst_9 {dimension_numbers = #tpu.dot_dimension_numbers<[1], [0], [0], [1], [0, 0, 1, 1], [], []>} : vector<60x128xbf16>, vector<128x128xbf16>, vector<60x128xf32> -> vector<60x128xf32>
    %14 = arith.truncf %13 : vector<60x128xf32> to vector<60x128xbf16>
    %c3 = arith.constant 3 : index
    %c0_10 = arith.constant 0 : index
    %c0_11 = arith.constant 0 : index
    %15 = vector.load %arg2[%c3, %c0_10, %c0_11] : memref<4x60x128xbf16, #tpu.memory_space<vmem>>, vector<1x60x128xbf16>
    %16 = vector.shape_cast %15 : vector<1x60x128xbf16> to vector<60x128xbf16>
    %cst_12 = arith.constant dense<0.000000e+00> : vector<60x128xf32>
    %17 = tpu.matmul %16, %2, %cst_12 {dimension_numbers = #tpu.dot_dimension_numbers<[1], [0], [0], [1], [0, 0, 1, 1], [], []>} : vector<60x128xbf16>, vector<128x128xbf16>, vector<60x128xf32> -> vector<60x128xf32>
    %18 = arith.truncf %17 : vector<60x128xf32> to vector<60x128xbf16>
    %19 = tpu.concatenate %6, %10, %14, %18 in 1 : vector<60x128xbf16>, vector<60x128xbf16>, vector<60x128xbf16>, vector<60x128xbf16> -> vector<60x512xbf16>
    %c0_13 = arith.constant 0 : index
    %c0_14 = arith.constant 0 : index
    %20 = vector.load %arg3[%c0_13, %c0_14] : memref<512x512xbf16, #tpu.memory_space<vmem>>, vector<512x512xbf16>
    %cst_15 = arith.constant dense<0.000000e+00> : vector<60x512xf32>
    %21 = tpu.matmul %19, %20, %cst_15 {dimension_numbers = #tpu.dot_dimension_numbers<[1], [0], [0], [1], [0, 0, 1, 1], [], []>} : vector<60x512xbf16>, vector<512x512xbf16>, vector<60x512xf32> -> vector<60x512xf32>
    %c0_16 = arith.constant 0 : index
    %c0_17 = arith.constant 0 : index
    %22 = vector.load %arg4[%c0_16, %c0_17] : memref<1x512xf32, #tpu.memory_space<vmem>>, vector<1x512xf32>
    %23 = vector.broadcast %22 : vector<1x512xf32> to vector<60x512xf32>
    %24 = arith.addf %21, %23 : vector<60x512xf32>
    %25 = math.tanh %24 : vector<60x512xf32>
    %26 = arith.truncf %25 : vector<60x512xf32> to vector<60x512xbf16>
    %c0_18 = arith.constant 0 : index
    %c0_19 = arith.constant 0 : index
    %c0_20 = arith.constant 0 : index
    %27 = vector.load %arg5[%c0_18, %c0_19, %c0_20] : memref<4x24x60xbf16, #tpu.memory_space<vmem>>, vector<1x24x60xbf16>
    %28 = vector.shape_cast %27 : vector<1x24x60xbf16> to vector<24x60xbf16>
    %cst_21 = arith.constant dense<0.000000e+00> : vector<24x512xf32>
    %29 = tpu.matmul %28, %26, %cst_21 {dimension_numbers = #tpu.dot_dimension_numbers<[1], [0], [0], [1], [0, 0, 1, 1], [], []>} : vector<24x60xbf16>, vector<60x512xbf16>, vector<24x512xf32> -> vector<24x512xf32>
    %30 = arith.truncf %29 : vector<24x512xf32> to vector<24x512xbf16>
    %c1_22 = arith.constant 1 : index
    %c0_23 = arith.constant 0 : index
    %c0_24 = arith.constant 0 : index
    %31 = vector.load %arg5[%c1_22, %c0_23, %c0_24] : memref<4x24x60xbf16, #tpu.memory_space<vmem>>, vector<1x24x60xbf16>
    %32 = vector.shape_cast %31 : vector<1x24x60xbf16> to vector<24x60xbf16>
    %cst_25 = arith.constant dense<0.000000e+00> : vector<24x512xf32>
    %33 = tpu.matmul %32, %26, %cst_25 {dimension_numbers = #tpu.dot_dimension_numbers<[1], [0], [0], [1], [0, 0, 1, 1], [], []>} : vector<24x60xbf16>, vector<60x512xbf16>, vector<24x512xf32> -> vector<24x512xf32>
    %34 = arith.truncf %33 : vector<24x512xf32> to vector<24x512xbf16>
    %c2_26 = arith.constant 2 : index
    %c0_27 = arith.constant 0 : index
    %c0_28 = arith.constant 0 : index
    %35 = vector.load %arg5[%c2_26, %c0_27, %c0_28] : memref<4x24x60xbf16, #tpu.memory_space<vmem>>, vector<1x24x60xbf16>
    %36 = vector.shape_cast %35 : vector<1x24x60xbf16> to vector<24x60xbf16>
    %cst_29 = arith.constant dense<0.000000e+00> : vector<24x512xf32>
    %37 = tpu.matmul %36, %26, %cst_29 {dimension_numbers = #tpu.dot_dimension_numbers<[1], [0], [0], [1], [0, 0, 1, 1], [], []>} : vector<24x60xbf16>, vector<60x512xbf16>, vector<24x512xf32> -> vector<24x512xf32>
    %38 = arith.truncf %37 : vector<24x512xf32> to vector<24x512xbf16>
    %c3_30 = arith.constant 3 : index
    %c0_31 = arith.constant 0 : index
    %c0_32 = arith.constant 0 : index
    %39 = vector.load %arg5[%c3_30, %c0_31, %c0_32] : memref<4x24x60xbf16, #tpu.memory_space<vmem>>, vector<1x24x60xbf16>
    %40 = vector.shape_cast %39 : vector<1x24x60xbf16> to vector<24x60xbf16>
    %cst_33 = arith.constant dense<0.000000e+00> : vector<24x512xf32>
    %41 = tpu.matmul %40, %26, %cst_33 {dimension_numbers = #tpu.dot_dimension_numbers<[1], [0], [0], [1], [0, 0, 1, 1], [], []>} : vector<24x60xbf16>, vector<60x512xbf16>, vector<24x512xf32> -> vector<24x512xf32>
    %42 = arith.truncf %41 : vector<24x512xf32> to vector<24x512xbf16>
    %43 = tpu.concatenate %30, %34, %38, %42 in 1 : vector<24x512xbf16>, vector<24x512xbf16>, vector<24x512xbf16>, vector<24x512xbf16> -> vector<24x2048xbf16>
    %c0_34 = arith.constant 0 : index
    %c0_35 = arith.constant 0 : index
    %44 = vector.load %arg6[%c0_34, %c0_35] : memref<2048x384xbf16, #tpu.memory_space<vmem>>, vector<2048x384xbf16>
    %cst_36 = arith.constant dense<0.000000e+00> : vector<24x384xf32>
    %45 = tpu.matmul %43, %44, %cst_36 {dimension_numbers = #tpu.dot_dimension_numbers<[1], [0], [0], [1], [0, 0, 1, 1], [], []>} : vector<24x2048xbf16>, vector<2048x384xbf16>, vector<24x384xf32> -> vector<24x384xf32>
    %c0_37 = arith.constant 0 : index
    %c0_38 = arith.constant 0 : index
    %46 = vector.load %arg7[%c0_37, %c0_38] : memref<1x384xf32, #tpu.memory_space<vmem>>, vector<1x384xf32>
    %47 = vector.broadcast %46 : vector<1x384xf32> to vector<24x384xf32>
    %48 = arith.addf %45, %47 : vector<24x384xf32>
    %49 = math.tanh %48 : vector<24x384xf32>
    %50 = arith.truncf %49 : vector<24x384xf32> to vector<24x384xbf16>
    %c0_39 = arith.constant 0 : index
    %c0_40 = arith.constant 0 : index
    %c0_41 = arith.constant 0 : index
    %51 = vector.load %arg8[%c0_39, %c0_40, %c0_41] : memref<4x8x24xbf16, #tpu.memory_space<vmem>>, vector<1x8x24xbf16>
    %52 = vector.shape_cast %51 : vector<1x8x24xbf16> to vector<8x24xbf16>
    %cst_42 = arith.constant dense<0.000000e+00> : vector<8x384xf32>
    %53 = tpu.matmul %52, %50, %cst_42 {dimension_numbers = #tpu.dot_dimension_numbers<[1], [0], [0], [1], [0, 0, 1, 1], [], []>} : vector<8x24xbf16>, vector<24x384xbf16>, vector<8x384xf32> -> vector<8x384xf32>
    %54 = arith.truncf %53 : vector<8x384xf32> to vector<8x384xbf16>
    %c1_43 = arith.constant 1 : index
    %c0_44 = arith.constant 0 : index
    %c0_45 = arith.constant 0 : index
    %55 = vector.load %arg8[%c1_43, %c0_44, %c0_45] : memref<4x8x24xbf16, #tpu.memory_space<vmem>>, vector<1x8x24xbf16>
    %56 = vector.shape_cast %55 : vector<1x8x24xbf16> to vector<8x24xbf16>
    %cst_46 = arith.constant dense<0.000000e+00> : vector<8x384xf32>
    %57 = tpu.matmul %56, %50, %cst_46 {dimension_numbers = #tpu.dot_dimension_numbers<[1], [0], [0], [1], [0, 0, 1, 1], [], []>} : vector<8x24xbf16>, vector<24x384xbf16>, vector<8x384xf32> -> vector<8x384xf32>
    %58 = arith.truncf %57 : vector<8x384xf32> to vector<8x384xbf16>
    %c2_47 = arith.constant 2 : index
    %c0_48 = arith.constant 0 : index
    %c0_49 = arith.constant 0 : index
    %59 = vector.load %arg8[%c2_47, %c0_48, %c0_49] : memref<4x8x24xbf16, #tpu.memory_space<vmem>>, vector<1x8x24xbf16>
    %60 = vector.shape_cast %59 : vector<1x8x24xbf16> to vector<8x24xbf16>
    %cst_50 = arith.constant dense<0.000000e+00> : vector<8x384xf32>
    %61 = tpu.matmul %60, %50, %cst_50 {dimension_numbers = #tpu.dot_dimension_numbers<[1], [0], [0], [1], [0, 0, 1, 1], [], []>} : vector<8x24xbf16>, vector<24x384xbf16>, vector<8x384xf32> -> vector<8x384xf32>
    %62 = arith.truncf %61 : vector<8x384xf32> to vector<8x384xbf16>
    %c3_51 = arith.constant 3 : index
    %c0_52 = arith.constant 0 : index
    %c0_53 = arith.constant 0 : index
    %63 = vector.load %arg8[%c3_51, %c0_52, %c0_53] : memref<4x8x24xbf16, #tpu.memory_space<vmem>>, vector<1x8x24xbf16>
    %64 = vector.shape_cast %63 : vector<1x8x24xbf16> to vector<8x24xbf16>
    %cst_54 = arith.constant dense<0.000000e+00> : vector<8x384xf32>
    %65 = tpu.matmul %64, %50, %cst_54 {dimension_numbers = #tpu.dot_dimension_numbers<[1], [0], [0], [1], [0, 0, 1, 1], [], []>} : vector<8x24xbf16>, vector<24x384xbf16>, vector<8x384xf32> -> vector<8x384xf32>
    %66 = arith.truncf %65 : vector<8x384xf32> to vector<8x384xbf16>
    %67 = tpu.concatenate %54, %58, %62, %66 in 1 : vector<8x384xbf16>, vector<8x384xbf16>, vector<8x384xbf16>, vector<8x384xbf16> -> vector<8x1536xbf16>
    %c0_55 = arith.constant 0 : index
    %c0_56 = arith.constant 0 : index
    %68 = vector.load %arg9[%c0_55, %c0_56] : memref<1536x256xbf16, #tpu.memory_space<vmem>>, vector<1536x256xbf16>
    %cst_57 = arith.constant dense<0.000000e+00> : vector<8x256xf32>
    %69 = tpu.matmul %67, %68, %cst_57 {dimension_numbers = #tpu.dot_dimension_numbers<[1], [0], [0], [1], [0, 0, 1, 1], [], []>} : vector<8x1536xbf16>, vector<1536x256xbf16>, vector<8x256xf32> -> vector<8x256xf32>
    %c0_58 = arith.constant 0 : index
    %c0_59 = arith.constant 0 : index
    %70 = vector.load %arg10[%c0_58, %c0_59] : memref<1x256xf32, #tpu.memory_space<vmem>>, vector<1x256xf32>
    %71 = vector.broadcast %70 : vector<1x256xf32> to vector<8x256xf32>
    %72 = arith.addf %69, %71 : vector<8x256xf32>
    %73 = math.tanh %72 : vector<8x256xf32>
    %74 = arith.truncf %73 : vector<8x256xf32> to vector<8x256xbf16>
    %c0_60 = arith.constant 0 : index
    %c0_61 = arith.constant 0 : index
    %c0_62 = arith.constant 0 : index
    %75 = vector.load %arg11[%c0_60, %c0_61, %c0_62] : memref<2x4x8xbf16, #tpu.memory_space<vmem>>, vector<1x4x8xbf16>
    %76 = vector.shape_cast %75 : vector<1x4x8xbf16> to vector<4x8xbf16>
    %cst_63 = arith.constant dense<0.000000e+00> : vector<4x256xf32>
    %77 = tpu.matmul %76, %74, %cst_63 {dimension_numbers = #tpu.dot_dimension_numbers<[1], [0], [0], [1], [0, 0, 1, 1], [], []>} : vector<4x8xbf16>, vector<8x256xbf16>, vector<4x256xf32> -> vector<4x256xf32>
    %78 = arith.truncf %77 : vector<4x256xf32> to vector<4x256xbf16>
    %c1_64 = arith.constant 1 : index
    %c0_65 = arith.constant 0 : index
    %c0_66 = arith.constant 0 : index
    %79 = vector.load %arg11[%c1_64, %c0_65, %c0_66] : memref<2x4x8xbf16, #tpu.memory_space<vmem>>, vector<1x4x8xbf16>
    %80 = vector.shape_cast %79 : vector<1x4x8xbf16> to vector<4x8xbf16>
    %cst_67 = arith.constant dense<0.000000e+00> : vector<4x256xf32>
    %81 = tpu.matmul %80, %74, %cst_67 {dimension_numbers = #tpu.dot_dimension_numbers<[1], [0], [0], [1], [0, 0, 1, 1], [], []>} : vector<4x8xbf16>, vector<8x256xbf16>, vector<4x256xf32> -> vector<4x256xf32>
    %82 = arith.truncf %81 : vector<4x256xf32> to vector<4x256xbf16>
    %83 = tpu.concatenate %78, %82 in 1 : vector<4x256xbf16>, vector<4x256xbf16> -> vector<4x512xbf16>
    %c0_68 = arith.constant 0 : index
    %c0_69 = arith.constant 0 : index
    %84 = vector.load %arg12[%c0_68, %c0_69] : memref<512x512xbf16, #tpu.memory_space<vmem>>, vector<512x512xbf16>
    %cst_70 = arith.constant dense<0.000000e+00> : vector<4x512xf32>
    %85 = tpu.matmul %83, %84, %cst_70 {dimension_numbers = #tpu.dot_dimension_numbers<[1], [0], [0], [1], [0, 0, 1, 1], [], []>} : vector<4x512xbf16>, vector<512x512xbf16>, vector<4x512xf32> -> vector<4x512xf32>
    %c0_71 = arith.constant 0 : index
    %c0_72 = arith.constant 0 : index
    %86 = vector.load %arg13[%c0_71, %c0_72] : memref<1x512xf32, #tpu.memory_space<vmem>>, vector<1x512xf32>
    %87 = vector.broadcast %86 : vector<1x512xf32> to vector<4x512xf32>
    %88 = arith.addf %85, %87 : vector<4x512xf32>
    %cst_73 = arith.constant 0.000000e+00 : f32
    %89 = vector.broadcast %cst_73 : f32 to vector<4x512xf32>
    %90 = arith.maximumf %88, %89 : vector<4x512xf32>
    %91 = arith.truncf %90 : vector<4x512xf32> to vector<4x512xbf16>
    %c0_74 = arith.constant 0 : index
    %c0_75 = arith.constant 0 : index
    %92 = vector.load %arg14[%c0_74, %c0_75] : memref<512x128xbf16, #tpu.memory_space<vmem>>, vector<512x128xbf16>
    %cst_76 = arith.constant dense<0.000000e+00> : vector<4x128xf32>
    %93 = tpu.matmul %91, %92, %cst_76 {dimension_numbers = #tpu.dot_dimension_numbers<[1], [0], [0], [1], [0, 0, 1, 1], [], []>} : vector<4x512xbf16>, vector<512x128xbf16>, vector<4x128xf32> -> vector<4x128xf32>
    %c0_77 = arith.constant 0 : index
    %c0_78 = arith.constant 0 : index
    %94 = vector.load %arg15[%c0_77, %c0_78] : memref<1x128xf32, #tpu.memory_space<vmem>>, vector<1x128xf32>
    %95 = vector.broadcast %94 : vector<1x128xf32> to vector<4x128xf32>
    %96 = arith.addf %93, %95 : vector<4x128xf32>
    %c0_79 = arith.constant 0 : index
    %c0_80 = arith.constant 0 : index
    %c0_81 = arith.constant 0 : index
    %97 = vector.load %arg16[%c0_79, %c0_80, %c0_81] : memref<1x4x128xf32, #tpu.memory_space<vmem>>, vector<1x4x128xf32>
    %98 = vector.shape_cast %97 : vector<1x4x128xf32> to vector<4x128xf32>
    %99 = vector.shape_cast %96 : vector<4x128xf32> to vector<1x4x128xf32>
    tpu.vector_store %arg16[%c0_79, %c0_80, %c0_81], %99 {strides = array<i32>} : memref<1x4x128xf32, #tpu.memory_space<vmem>>, vector<1x4x128xf32>,
    return
  }
  func.func @transform_0(%arg0: i32) -> (i32, i32) {
    %c0_i32 = arith.constant 0 : i32
    %c0_i32_0 = arith.constant 0 : i32
    return %arg0, %c0_i32 : i32, i32
  }
  func.func @transform_1(%arg0: i32) -> (i32, i32, i32) {
    %c0_i32 = arith.constant 0 : i32
    %c0_i32_0 = arith.constant 0 : i32
    %c0_i32_1 = arith.constant 0 : i32
    %c0_i32_2 = arith.constant 0 : i32
    return %c0_i32, %c0_i32_0, %c0_i32_1 : i32, i32, i32
  }
  func.func @transform_2(%arg0: i32) -> (i32, i32) {
    %c0_i32 = arith.constant 0 : i32
    %c0_i32_0 = arith.constant 0 : i32
    %c0_i32_1 = arith.constant 0 : i32
    return %c0_i32, %c0_i32_0 : i32, i32
  }
  func.func @transform_3(%arg0: i32) -> (i32, i32) {
    %c0_i32 = arith.constant 0 : i32
    %c0_i32_0 = arith.constant 0 : i32
    %c0_i32_1 = arith.constant 0 : i32
    return %c0_i32, %c0_i32_0 : i32, i32
  }
  func.func @transform_4(%arg0: i32) -> (i32, i32, i32) {
    %c0_i32 = arith.constant 0 : i32
    %c0_i32_0 = arith.constant 0 : i32
    %c0_i32_1 = arith.constant 0 : i32
    %c0_i32_2 = arith.constant 0 : i32
    return %c0_i32, %c0_i32_0, %c0_i32_1 : i32, i32, i32
  }
  func.func @transform_5(%arg0: i32) -> (i32, i32) {
    %c0_i32 = arith.constant 0 : i32
    %c0_i32_0 = arith.constant 0 : i32
    %c0_i32_1 = arith.constant 0 : i32
    return %c0_i32, %c0_i32_0 : i32, i32
  }
  func.func @transform_6(%arg0: i32) -> (i32, i32) {
    %c0_i32 = arith.constant 0 : i32
    %c0_i32_0 = arith.constant 0 : i32
    %c0_i32_1 = arith.constant 0 : i32
    return %c0_i32, %c0_i32_0 : i32, i32
  }
  func.func @transform_7(%arg0: i32) -> (i32, i32, i32) {
    %c0_i32 = arith.constant 0 : i32
    %c0_i32_0 = arith.constant 0 : i32
    %c0_i32_1 = arith.constant 0 : i32
    %c0_i32_2 = arith.constant 0 : i32
    return %c0_i32, %c0_i32_0, %c0_i32_1 : i32, i32, i32
  }
  func.func @transform_8(%arg0: i32) -> (i32, i32) {
    %c0_i32 = arith.constant 0 : i32
    %c0_i32_0 = arith.constant 0 : i32
    %c0_i32_1 = arith.constant 0 : i32
    return %c0_i32, %c0_i32_0 : i32, i32
  }
  func.func @transform_9(%arg0: i32) -> (i32, i32) {
    %c0_i32 = arith.constant 0 : i32
    %c0_i32_0 = arith.constant 0 : i32
    %c0_i32_1 = arith.constant 0 : i32
    return %c0_i32, %c0_i32_0 : i32, i32
  }
  func.func @transform_10(%arg0: i32) -> (i32, i32, i32) {
    %c0_i32 = arith.constant 0 : i32
    %c0_i32_0 = arith.constant 0 : i32
    %c0_i32_1 = arith.constant 0 : i32
    %c0_i32_2 = arith.constant 0 : i32
    return %c0_i32, %c0_i32_0, %c0_i32_1 : i32, i32, i32
  }
  func.func @transform_11(%arg0: i32) -> (i32, i32) {
    %c0_i32 = arith.constant 0 : i32
    %c0_i32_0 = arith.constant 0 : i32
    %c0_i32_1 = arith.constant 0 : i32
    return %c0_i32, %c0_i32_0 : i32, i32
  }
  func.func @transform_12(%arg0: i32) -> (i32, i32) {
    %c0_i32 = arith.constant 0 : i32
    %c0_i32_0 = arith.constant 0 : i32
    %c0_i32_1 = arith.constant 0 : i32
    return %c0_i32, %c0_i32_0 : i32, i32
  }
  func.func @transform_13(%arg0: i32) -> (i32, i32) {
    %c0_i32 = arith.constant 0 : i32
    %c0_i32_0 = arith.constant 0 : i32
    %c0_i32_1 = arith.constant 0 : i32
    return %c0_i32, %c0_i32_0 : i32, i32
  }
  func.func @transform_14(%arg0: i32) -> (i32, i32) {
    %c0_i32 = arith.constant 0 : i32
    %c0_i32_0 = arith.constant 0 : i32
    %c0_i32_1 = arith.constant 0 : i32
    return %c0_i32, %c0_i32_0 : i32, i32
  }
  func.func @transform_15(%arg0: i32) -> (i32, i32, i32) {
    %c0_i32 = arith.constant 0 : i32
    %c0_i32_0 = arith.constant 0 : i32
    %c0_i32_1 = arith.constant 0 : i32
    return %arg0, %c0_i32, %c0_i32_0 : i32, i32, i32
  }
}

</mosaic_0001>

<bundles_post_ra>
// kernel: qnetwork_forward.1
= control target key start
LH: loop header
LB: loop body
LE: loop exit
PB: predicated region body
PF: predicated region fallthrough
CT: control target
= control target key end

     0   :  { %s14147_s0 = inlined_call_operand.vmem [shape: u8[256,128], index: 0, kind: input, shape index: {}]   ;;  %s14148_s1 = inlined_call_operand.hbm [shape: bf16[4,60,128], index: 1, kind: input, shape index: {}]   ;;  %s14149_s2 = inlined_call_operand.hbm [shape: bf16[512,512], index: 2, kind: input, shape index: {}]   ;;  %s14150_s3 = inlined_call_operand.hbm [shape: f32[1,512], index: 3, kind: input, shape index: {}]   ;;  %s14151_s4 = inlined_call_operand.hbm [shape: bf16[4,24,60], index: 4, kind: input, shape index: {}]   ;;  %s14152_s5 = inlined_call_operand.hbm [shape: bf16[2048,384], index: 5, kind: input, shape index: {}]   ;;  %s14153_s6 = inlined_call_operand.hbm [shape: f32[1,384], index: 6, kind: input, shape index: {}]   ;;  %s14154_s7 = inlined_call_operand.hbm [shape: bf16[4,8,24], index: 7, kind: input, shape index: {}]   ;;  %s14155_s8 = inlined_call_operand.hbm [shape: bf16[1536,256], index: 8, kind: input, shape index: {}]   ;;  %s14156_s9 = inlined_call_operand.hbm [shape: f32[1,256], index: 9, kind: input, shape index: {}]   ;;  %s14157_s10 = inlined_call_operand.hbm [shape: bf16[2,4,8], index: 10, kind: input, shape index: {}]   ;;  %s14158_s11 = inlined_call_operand.hbm [shape: bf16[512,512], index: 11, kind: input, shape index: {}]   ;;  %s14159_s12 = inlined_call_operand.hbm [shape: f32[1,512], index: 12, kind: input, shape index: {}]   ;;  %s14160_s13 = inlined_call_operand.hbm [shape: bf16[512,128], index: 13, kind: input, shape index: {}]   ;;  %s14161_s14 = inlined_call_operand.hbm [shape: f32[1,128], index: 14, kind: input, shape index: {}]   ;;  %s14162_s15 = inlined_call_operand.hbm [shape: f32[2,4,128], index: 15, kind: output, shape index: {}]  }
   0x1   :  { %14185 = sst [smem:[#allocation45_spill]] %s14147_s0 }
   0x2   :  { %14186 = sst [smem:[#allocation46_spill]] %s14148_s1 }
   0x3   :  { %14187 = sst [smem:[#allocation47_spill]] %s14149_s2 }
   0x4   :  { %14188 = sst [smem:[#allocation48_spill]] %s14150_s3 }
   0x5   :  { %14189 = sst [smem:[#allocation49_spill]] %s14162_s15 }
   0x6   :  { %20 = vsyncpa [#allocation3], 0 }
   0x7   :  { %21 = vsyncpa [#allocation6], 0 }
   0x8   :  { %22 = vsyncpa [#allocation9], 0 }
   0x9   :  { %23 = vsyncpa [#allocation12], 0 }
   0xa   :  { %24 = vsyncpa [#allocation15], 0 }
   0xb   :  { %25 = vsyncpa [#allocation18], 0 }
   0xc   :  { %26 = vsyncpa [#allocation21], 0 }
   0xd   :  { %27 = vsyncpa [#allocation24], 0 }
   0xe   :  { %28 = vsyncpa [#allocation4], 0 }
   0xf   :  { %30 = vsyncpa [#allocation4 + $0x1], 0  ;;  %s13244_s18 = smov 0   ;;  %s13246_s19 = smov 0  }
  0x10   :  { %s13248_s20 = smov 0   ;;  %s13250_s21 = smov 0  }
  0x11 LB: > { %14190 = sst [smem:[#allocation35_spill]] %s13122_s18  ;;  %s13265_s22 = sadd.s32 4294967295, %s13134_s21   ;;  %s13134_s21 = sphi %s13250_s21, %s14239_s21   ;;  %s13130_s20 = sphi %s13248_s20, %s14242_s20   ;;  %s13126_s19 = sphi %s13246_s19, %s14241_s19   ;;  %s13122_s18 = sphi %s13244_s18, %s14240_s18  }
  0x12   : > { %14191 = sst [smem:[#allocation36_spill]] %s13126_s19  ;;  %s9545_s23 = sadd.s32 4294967294, %s13134_s21  }
  0x13   : > { %14192 = sst [smem:[#allocation37_spill]] %s13130_s20  ;;  %s13269_s24 = sadd.s32 1, %s13134_s21  }
  0x14   : > { %14193 = sst [smem:[#allocation38_spill]] %s13134_s21  ;;  %s363_s25 = sadd.s32 1, %s13130_s20 }
  0x15   : > { %14194 = sst [smem:[#allocation39_spill]] %s13265_s22  ;;  %s360_s26 = ssub.s32 %s13134_s21, %s13269_s24 }
  0x16   : > { %14195 = sst [smem:[#allocation40_spill]] %s13269_s24  ;;  %p373_p0 = scmp.ne.s32.totalorder %s13130_s20, %s13126_s19 }
  0x17   : > { %p361_p1 = scmp.eq.s32.totalorder %s360_s26, 0  ;;  %p374_p2 = scmp.eq.s32.totalorder %s13265_s22, 1 }
  0x18   : > { %p379_p3 = scmp.ne.s32.totalorder %s13126_s19, %s13122_s18  ;;  %p380_p4 = scmp.eq.s32.totalorder %s9545_s23, 1 }
  0x19   : > { %s13280_s27 = scalar_select %p361_p1, %s13130_s20, %s363_s25  }
  0x1a   : > { %p13282_p5 = por %p374_p2, %p373_p0  ;;  %p13286_p6 = por %p380_p4, %p379_p3 }
  0x1b   : > { %14196 = sst [smem:[#allocation41_spill]] %s13280_s27  ;;  %p9546_p7 = scmp.ge.s32.totalorder %s13134_s21, 1 }
  0x1c   : > { %s14197_s28 = scalar_select %p13282_p5, 1, 0 }
  0x1d   : > { %s14199_s29 = scalar_select %p13286_p6, 1, 0 }
  0x1e   : > { %14198 = sst [smem:[#allocation42_spill]] %s14197_s28  ;;  %p387_p8 = scmp.lt.s32.totalorder %s13134_s21, 3 }
  0x1f   : > { %14200 = sst [smem:[#allocation43_spill]] %s14199_s29  ;;  %p14170_p9 = scmp.eq.s32.totalorder %s13265_s22, 0 }
  0x20   : > { %p13293_p10 = pnand %p9546_p7, %p387_p8  ;;  %s13136_s16 = smov [#allocation5]  }
  0x21   : > { %s412_s17 = sshll.u32 %s13136_s16, 4  ;;  %s13137_s25 = smov [#allocation8]   ;;  %s413_s17 = int_to_ptr.vmem [resolvable:$true] %s412_s17 }
  0x22   : > { %s14201_s30 = scalar_select %p13293_p10, 1, 0 }
  0x23   : > { %p11187_p11 = pneg %p13293_p10  ;;  %s436_s26 = sshll.u32 %s13137_s25, 4  ;;  %s437_s26 = int_to_ptr.vmem [resolvable:$true] %s436_s26 }
  0x24   : > { %14202 = sst [smem:[#allocation44_spill]] %s14201_s30  ;;  %s14204_s2 = sld [smem:[#allocation47_spill]] }
  0x25   : > { %p13301_p12 = pnand %p14170_p9, %p11187_p11 }
  0x27   : > { %p13313_p0 = pneg %p13301_p12 }
  0x2a   : > { %s12648_s24 = scalar_lea.hbm %s14204_s2, 16384 }
  0x2b   : > { %p12649_p13 = scmp.ne.s32.totalorder %s14204_s2, %s12648_s24  ;;  %p12655_p3 = scmp.lt.u32.totalorder %s12648_s24, %s14204_s2 }
  0x2d   : > { %p12651_p1 = pnand %p13313_p0, %p12649_p13 }
  0x2f   : > { %p12652_p2 = pneg %p12651_p1 }
  0x31   : > { %p12657_p4 = pnand %p12655_p3, %p12652_p2 }
  0x33   : > { %12660 = shalt.err (!%p12657_p4)
}
  0x34   : > { %s12661_s20 = scalar_lea.vmem %s413_s17, 16384  ;;  %p12669_p9 = scmp.lt.s32.totalorder %s413_s17, %s413_s17 }
  0x35   : > { %p12662_p7 = scmp.ne.s32.totalorder %s413_s17, %s12661_s20  ;;  %p12670_p6 = scmp.lt.s32.totalorder %s12661_s20, %s12661_s20 }
  0x37   : > { %p12664_p8 = pnand %p12662_p7, %p13313_p0  ;;  %p12671_p5 = por %p12670_p6, %p12669_p9 }
  0x39   : > { %p12665_p11 = pneg %p12664_p8 }
  0x3b   : > { %p12672_p10 = pnand %p12671_p5, %p12665_p11 }
  0x3d   : > { %12675 = shalt.err (!%p12672_p10)
}
  0x3e   : > { %s14179_s18 = smov 256   ;;  %s14180_s27 = smov 16  }
  0x3f   : > { %11193 = dma.hbm_to_vmem [thread:$0]  (!%p13301_p12), %s14204_s2, 16384, %s413_s17, [#allocation6], %s14179_s18, %s14179_s18, %s14180_s27  }
  0x40   : > { %s13140_s24 = smov [#allocation11]   ;;  %s12676_s28 = scalar_lea.hbm %s14151_s4, 768 }
  0x41   : > { %s463_s29 = sshll.u32 %s13140_s24, 4  ;;  %p12677_p5 = scmp.ne.s32.totalorder %s14151_s4, %s12676_s28  ;;  %s464_s29 = int_to_ptr.vmem [resolvable:$true] %s463_s29 }
  0x42   : > { %p12683_p10 = scmp.lt.u32.totalorder %s12676_s28, %s14151_s4 }
  0x43   : > { %p12679_p6 = pnand %p12677_p5, %p13313_p0 }
  0x45   : > { %p12680_p9 = pneg %p12679_p6 }
  0x47   : > { %p12685_p13 = pnand %p12683_p10, %p12680_p9 }
  0x49   : > { %12688 = shalt.err (!%p12685_p13)
}
  0x4a   : > { %s12689_s17 = scalar_lea.vmem %s437_s26, 768  ;;  %p12697_p4 = scmp.lt.s32.totalorder %s437_s26, %s437_s26 }
  0x4b   : > { %p12690_p1 = scmp.ne.s32.totalorder %s437_s26, %s12689_s17  ;;  %p12698_p7 = scmp.lt.s32.totalorder %s12689_s17, %s12689_s17 }
  0x4d   : > { %p12692_p2 = pnand %p12690_p1, %p13313_p0  ;;  %p12699_p8 = por %p12698_p7, %p12697_p4 }
  0x4f   : > { %p12693_p3 = pneg %p12692_p2 }
  0x51   : > { %p12700_p11 = pnand %p12699_p8, %p12693_p3 }
  0x53   : > { %12703 = shalt.err (!%p12700_p11)
}
  0x54   : > { %s14181_s0 = smov 64   ;;  %s14183_s19 = smov 4  }
  0x55   : > { %11199 = dma.hbm_to_vmem [thread:$0]  (!%p13301_p12), %s14151_s4, 768, %s437_s26, [#allocation9], %s14181_s0, %s14181_s0, %s14183_s19  }
  0x56   : > { %s12704_s21 = scalar_lea.hbm %s14153_s6, 48 }
  0x57   : > { %p12705_p5 = scmp.ne.s32.totalorder %s14153_s6, %s12704_s21  ;;  %p12711_p10 = scmp.lt.u32.totalorder %s12704_s21, %s14153_s6 }
  0x59   : > { %p12707_p6 = pnand %p12705_p5, %p13313_p0 }
  0x5b   : > { %p12708_p9 = pneg %p12707_p6 }
  0x5d   : > { %p12713_p13 = pnand %p12711_p10, %p12708_p9 }
  0x5f   : > { %12716 = shalt.err (!%p12713_p13)
}
  0x60   : > { %s12717_s22 = scalar_lea.vmem %s464_s29, 48  ;;  %s12724_s26 = scalar_lea.vmem %s464_s29, 64 }
  0x61   : > { %p12718_p1 = scmp.ne.s32.totalorder %s464_s29, %s12717_s22  ;;  %p12725_p4 = scmp.lt.s32.totalorder %s464_s29, %s464_s29 }
  0x62   : > { %p12726_p7 = scmp.lt.s32.totalorder %s12724_s26, %s12717_s22 }
  0x63   : > { %p12720_p2 = pnand %p12718_p1, %p13313_p0 }
  0x64   : > { %p12727_p8 = por %p12726_p7, %p12725_p4 }
  0x65   : > { %p12721_p3 = pneg %p12720_p2 }
  0x67   : > { %p12728_p11 = pnand %p12727_p8, %p12721_p3 }
  0x69   : > { %12731 = shalt.err (!%p12728_p11)
}
  0x6a   : > { %11205 = dma.hbm_to_vmem [thread:$0]  (!%p13301_p12), %s14153_s6, 48, %s464_s29, [#allocation12]  }
  0x6b   : > { %s13143_s15 = smov [#allocation14]   ;;  %s12732_s20 = scalar_lea.hbm %s14155_s8, 24576 }
  0x6c   : > { %s486_s21 = sshll.u32 %s13143_s15, 4  ;;  %p12733_p5 = scmp.ne.s32.totalorder %s14155_s8, %s12732_s20  ;;  %s487_s21 = int_to_ptr.vmem [resolvable:$true] %s486_s21 }
  0x6d   : > { %p12739_p10 = scmp.lt.u32.totalorder %s12732_s20, %s14155_s8 }
  0x6e   : > { %p12735_p6 = pnand %p12733_p5, %p13313_p0 }
  0x70   : > { %p12736_p9 = pneg %p12735_p6 }
  0x72   : > { %p12741_p13 = pnand %p12739_p10, %p12736_p9 }
  0x74   : > { %12744 = shalt.err (!%p12741_p13)
}
  0x75   : > { %s12745_s29 = scalar_lea.vmem %s487_s21, 24576  ;;  %p12753_p4 = scmp.lt.s32.totalorder %s487_s21, %s487_s21 }
  0x76   : > { %p12746_p1 = scmp.ne.s32.totalorder %s487_s21, %s12745_s29  ;;  %p12754_p7 = scmp.lt.s32.totalorder %s12745_s29, %s12745_s29 }
  0x78   : > { %p12748_p2 = pnand %p12746_p1, %p13313_p0  ;;  %p12755_p8 = por %p12754_p7, %p12753_p4 }
  0x7a   : > { %p12749_p3 = pneg %p12748_p2 }
  0x7c   : > { %p12756_p11 = pnand %p12755_p8, %p12749_p3 }
  0x7e   : > { %12759 = shalt.err (!%p12756_p11)
}
  0x7f   : > { %s13144_s18 = smov 128   ;;  %s13145_s28 = smov 8  }
  0x80   : > { %11211 = dma.hbm_to_vmem [thread:$0]  (!%p13301_p12), %s14155_s8, 24576, %s487_s21, [#allocation15], %s13144_s18, %s13144_s18, %s13145_s28  }
  0x81   : > { %s13146_s24 = smov [#allocation17]   ;;  %s12760_s22 = scalar_lea.hbm %s14157_s10, 64 }
  0x82   : > { %s510_s25 = sshll.u32 %s13146_s24, 4  ;;  %p12761_p5 = scmp.ne.s32.totalorder %s14157_s10, %s12760_s22  ;;  %s511_s25 = int_to_ptr.vmem [resolvable:$true] %s510_s25 }
  0x83   : > { %p12767_p10 = scmp.lt.u32.totalorder %s12760_s22, %s14157_s10 }
  0x84   : > { %p12763_p6 = pnand %p12761_p5, %p13313_p0 }
  0x86   : > { %p12764_p9 = pneg %p12763_p6 }
  0x88   : > { %p12769_p13 = pnand %p12767_p10, %p12764_p9 }
  0x8a   : > { %12772 = shalt.err (!%p12769_p13)
}
  0x8b   : > { %s12773_s21 = scalar_lea.vmem %s511_s25, 64  ;;  %p12781_p4 = scmp.lt.s32.totalorder %s511_s25, %s511_s25 }
  0x8c   : > { %p12774_p1 = scmp.ne.s32.totalorder %s511_s25, %s12773_s21  ;;  %p12782_p7 = scmp.lt.s32.totalorder %s12773_s21, %s12773_s21 }
  0x8e   : > { %p12776_p2 = pnand %p12774_p1, %p13313_p0  ;;  %p12783_p8 = por %p12782_p7, %p12781_p4 }
  0x90   : > { %p12777_p3 = pneg %p12776_p2 }
  0x92   : > { %p12784_p11 = pnand %p12783_p8, %p12777_p3 }
  0x94   : > { %12787 = shalt.err (!%p12784_p11)
}
  0x95   : > { %s13147_s18 = smov 32   ;;  %s13148_s28 = smov 2  }
  0x96   : > { %11217 = dma.hbm_to_vmem [thread:$0]  (!%p13301_p12), %s14157_s10, 64, %s511_s25, [#allocation18], %s13147_s18, %s13147_s18, %s13148_s28  }
  0x97   : > { %s13149_s30 = smov [#allocation20]   ;;  %s13150_s24 = smov [#allocation2]  }
  0x98   : > { %s537_s15 = sshll.u32 %s13149_s30, 4  ;;  %s399_s20 = sshll.u32 %s13150_s24, 4  ;;  %s538_s15 = int_to_ptr.vmem [resolvable:$true] %s537_s15  ;;  %s400_s20 = int_to_ptr.vmem [resolvable:$true] %s399_s20 }
  0x99   : > { %s12788_s26 = scalar_lea.hbm %s14159_s12, 64 }
  0x9a   : > { %p12789_p5 = scmp.ne.s32.totalorder %s14159_s12, %s12788_s26  ;;  %p12795_p10 = scmp.lt.u32.totalorder %s12788_s26, %s14159_s12 }
  0x9c   : > { %p12791_p6 = pnand %p12789_p5, %p13313_p0 }
  0x9e   : > { %p12792_p9 = pneg %p12791_p6 }
  0xa0   : > { %p12797_p13 = pnand %p12795_p10, %p12792_p9 }
  0xa2   : > { %12800 = shalt.err (!%p12797_p13)
}
  0xa3   : > { %s12801_s25 = scalar_lea.vmem %s538_s15, 64  ;;  %p12809_p4 = scmp.lt.s32.totalorder %s538_s15, %s538_s15 }
  0xa4   : > { %p12802_p1 = scmp.ne.s32.totalorder %s538_s15, %s12801_s25  ;;  %p12810_p7 = scmp.lt.s32.totalorder %s12801_s25, %s12801_s25 }
  0xa6   : > { %p12804_p2 = pnand %p12802_p1, %p13313_p0  ;;  %p12811_p8 = por %p12810_p7, %p12809_p4 }
  0xa8   : > { %p12805_p3 = pneg %p12804_p2 }
  0xaa   : > { %p12812_p11 = pnand %p12811_p8, %p12805_p3 }
  0xac   : > { %12815 = shalt.err (!%p12812_p11)
}
  0xad   : > { %11223 = dma.hbm_to_vmem [thread:$0]  (!%p13301_p12), %s14159_s12, 64, %s538_s15, [#allocation21]  }
  0xae   : > { %s14206_s1 = sld [smem:[#allocation46_spill]] }
  0xb4   : > { %s12816_s27 = scalar_lea.hbm %s14206_s1, 2048 }
  0xb5   : > { %p12817_p5 = scmp.ne.s32.totalorder %s14206_s1, %s12816_s27  ;;  %p12823_p10 = scmp.lt.u32.totalorder %s12816_s27, %s14206_s1 }
  0xb7   : > { %p12819_p6 = pnand %p12817_p5, %p13313_p0 }
  0xb9   : > { %p12820_p9 = pneg %p12819_p6 }
  0xbb   : > { %p12825_p13 = pnand %p12823_p10, %p12820_p9 }
  0xbd   : > { %12828 = shalt.err (!%p12825_p13)
}
  0xbe   : > { %s12829_s22 = scalar_lea.vmem %s400_s20, 2048  ;;  %p12837_p4 = scmp.lt.s32.totalorder %s400_s20, %s400_s20 }
  0xbf   : > { %p12830_p1 = scmp.ne.s32.totalorder %s400_s20, %s12829_s22  ;;  %p12838_p7 = scmp.lt.s32.totalorder %s12829_s22, %s12829_s22 }
  0xc1   : > { %p12832_p2 = pnand %p12830_p1, %p13313_p0  ;;  %p12839_p8 = por %p12838_p7, %p12837_p4 }
  0xc3   : > { %p12833_p3 = pneg %p12832_p2 }
  0xc5   : > { %p12840_p11 = pnand %p12839_p8, %p12833_p3 }
  0xc7   : > { %12843 = shalt.err (!%p12840_p11)
}
  0xc8   : > { %s14207_s15 = smov 4   ;;  %s14208_s26 = smov 64  }
  0xc9   : > { %11190 = dma.hbm_to_vmem [thread:$0]  (!%p13301_p12), %s14206_s1, 2048, %s400_s20, [#allocation3], %s14208_s26, %s14208_s26, %s14207_s15  }
  0xca   : > { %s13151_s25 = smov [#allocation7]   ;;  %s13152_s28 = smov [#allocation10]  }
  0xcb   : > { %s426_s18 = sshll.u32 %s13151_s25, 4  ;;  %s449_s2 = sshll.u32 %s13152_s28, 4  ;;  %s427_s18 = int_to_ptr.vmem [resolvable:$true] %s426_s18  ;;  %s450_s2 = int_to_ptr.vmem [resolvable:$true] %s449_s2 }
  0xcc   : > { %s14209_s3 = sld [smem:[#allocation48_spill]] }
  0xd2   : > { %s12844_s0 = scalar_lea.hbm %s14209_s3, 64 }
  0xd3   : > { %p12845_p5 = scmp.ne.s32.totalorder %s14209_s3, %s12844_s0  ;;  %p12851_p10 = scmp.lt.u32.totalorder %s12844_s0, %s14209_s3 }
  0xd5   : > { %p12847_p6 = pnand %p12845_p5, %p13313_p0 }
  0xd7   : > { %p12848_p9 = pneg %p12847_p6 }
  0xd9   : > { %p12853_p13 = pnand %p12851_p10, %p12848_p9 }
  0xdb   : > { %12856 = shalt.err (!%p12853_p13)
}
  0xdc   : > { %s12857_s20 = scalar_lea.vmem %s427_s18, 64  ;;  %p12865_p4 = scmp.lt.s32.totalorder %s427_s18, %s427_s18 }
  0xdd   : > { %p12858_p1 = scmp.ne.s32.totalorder %s427_s18, %s12857_s20  ;;  %p12866_p7 = scmp.lt.s32.totalorder %s12857_s20, %s12857_s20 }
  0xdf   : > { %p12860_p2 = pnand %p12858_p1, %p13313_p0  ;;  %p12867_p8 = por %p12866_p7, %p12865_p4 }
  0xe1   : > { %p12861_p3 = pneg %p12860_p2 }
  0xe3   : > { %p12868_p11 = pnand %p12867_p8, %p12861_p3 }
  0xe5   : > { %12871 = shalt.err (!%p12868_p11)
}
  0xe6   : > { %11196 = dma.hbm_to_vmem [thread:$0]  (!%p13301_p12), %s14209_s3, 64, %s427_s18, [#allocation6]  }
  0xe7   : > { %s12872_s19 = scalar_lea.hbm %s14152_s5, 49152 }
  0xe8   : > { %p12873_p5 = scmp.ne.s32.totalorder %s14152_s5, %s12872_s19  ;;  %p12879_p10 = scmp.lt.u32.totalorder %s12872_s19, %s14152_s5 }
  0xea   : > { %p12875_p6 = pnand %p12873_p5, %p13313_p0 }
  0xec   : > { %p12876_p9 = pneg %p12875_p6 }
  0xee   : > { %p12881_p13 = pnand %p12879_p10, %p12876_p9 }
  0xf0   : > { %12884 = shalt.err (!%p12881_p13)
}
  0xf1   : > { %s12885_s17 = scalar_lea.vmem %s450_s2, 49152  ;;  %p12893_p4 = scmp.lt.s32.totalorder %s450_s2, %s450_s2 }
  0xf2   : > { %p12886_p1 = scmp.ne.s32.totalorder %s450_s2, %s12885_s17  ;;  %p12894_p7 = scmp.lt.s32.totalorder %s12885_s17, %s12885_s17 }
  0xf4   : > { %p12888_p2 = pnand %p12886_p1, %p13313_p0  ;;  %p12895_p8 = por %p12894_p7, %p12893_p4 }
  0xf6   : > { %p12889_p3 = pneg %p12888_p2 }
  0xf8   : > { %p12896_p11 = pnand %p12895_p8, %p12889_p3 }
  0xfa   : > { %12899 = shalt.err (!%p12896_p11)
}
  0xfb   : > { %s13153_s18 = smov 192   ;;  %s13154_s22 = smov 12  }
  0xfc   : > { %11202 = dma.hbm_to_vmem [thread:$0]  (!%p13301_p12), %s14152_s5, 49152, %s450_s2, [#allocation9], %s13153_s18, %s13153_s18, %s13154_s22  }
  0xfd   : > { %s13155_s21 = smov [#allocation13]   ;;  %s13156_s28 = smov [#allocation16]  }
  0xfe   : > { %s473_s25 = sshll.u32 %s13155_s21, 4  ;;  %s500_s19 = sshll.u32 %s13156_s28, 4  ;;  %s474_s25 = int_to_ptr.vmem [resolvable:$true] %s473_s25  ;;  %s501_s19 = int_to_ptr.vmem [resolvable:$true] %s500_s19 }
  0xff   : > { %s12900_s30 = scalar_lea.hbm %s14154_s7, 256 }
 0x100   : > { %p12901_p5 = scmp.ne.s32.totalorder %s14154_s7, %s12900_s30  ;;  %p12907_p10 = scmp.lt.u32.totalorder %s12900_s30, %s14154_s7 }
 0x102   : > { %p12903_p6 = pnand %p12901_p5, %p13313_p0 }
 0x104   : > { %p12904_p9 = pneg %p12903_p6 }
 0x106   : > { %p12909_p13 = pnand %p12907_p10, %p12904_p9 }
 0x108   : > { %12912 = shalt.err (!%p12909_p13)
}
 0x109   : > { %s12913_s2 = scalar_lea.vmem %s474_s25, 256  ;;  %p12921_p4 = scmp.lt.s32.totalorder %s474_s25, %s474_s25 }
 0x10a   : > { %p12914_p1 = scmp.ne.s32.totalorder %s474_s25, %s12913_s2  ;;  %p12922_p7 = scmp.lt.s32.totalorder %s12913_s2, %s12913_s2 }
 0x10c   : > { %p12916_p2 = pnand %p12914_p1, %p13313_p0  ;;  %p12923_p8 = por %p12922_p7, %p12921_p4 }
 0x10e   : > { %p12917_p3 = pneg %p12916_p2 }
 0x110   : > { %p12924_p11 = pnand %p12923_p8, %p12917_p3 }
 0x112   : > { %12927 = shalt.err (!%p12924_p11)
}
 0x113   : > { %11208 = dma.hbm_to_vmem [thread:$0]  (!%p13301_p12), %s14154_s7, 256, %s474_s25, [#allocation12], %s14208_s26, %s14208_s26, %s14207_s15  }
 0x114   : > { %s12928_s20 = scalar_lea.hbm %s14156_s9, 32 }
 0x115   : > { %p12929_p5 = scmp.ne.s32.totalorder %s14156_s9, %s12928_s20  ;;  %p12935_p10 = scmp.lt.u32.totalorder %s12928_s20, %s14156_s9 }
 0x117   : > { %p12931_p6 = pnand %p12929_p5, %p13313_p0 }
 0x119   : > { %p12932_p9 = pneg %p12931_p6 }
 0x11b   : > { %p12937_p13 = pnand %p12935_p10, %p12932_p9 }
 0x11d   : > { %12940 = shalt.err (!%p12937_p13)
}
 0x11e   : > { %s12941_s0 = scalar_lea.vmem %s501_s19, 32  ;;  %p12949_p4 = scmp.lt.s32.totalorder %s501_s19, %s501_s19 }
 0x11f   : > { %p12942_p1 = scmp.ne.s32.totalorder %s501_s19, %s12941_s0  ;;  %p12950_p7 = scmp.lt.s32.totalorder %s12941_s0, %s12941_s0 }
 0x121   : > { %p12944_p2 = pnand %p12942_p1, %p13313_p0  ;;  %p12951_p8 = por %p12950_p7, %p12949_p4 }
 0x123   : > { %p12945_p3 = pneg %p12944_p2 }
 0x125   : > { %p12952_p11 = pnand %p12951_p8, %p12945_p3 }
 0x127   : > { %12955 = shalt.err (!%p12952_p11)
}
 0x128   : > { %11214 = dma.hbm_to_vmem [thread:$0]  (!%p13301_p12), %s14156_s9, 32, %s501_s19, [#allocation15]  }
 0x129   : > { %s13157_s24 = smov [#allocation19]   ;;  %s13158_s2 = smov [#allocation22]  }
 0x12a   : > { %s523_s17 = sshll.u32 %s13157_s24, 4  ;;  %s547_s1 = sshll.u32 %s13158_s2, 4  ;;  %s524_s17 = int_to_ptr.vmem [resolvable:$true] %s523_s17  ;;  %s548_s1 = int_to_ptr.vmem [resolvable:$true] %s547_s1 }
 0x12b   : > { %s12956_s22 = scalar_lea.hbm %s14158_s11, 16384 }
 0x12c   : > { %p12957_p5 = scmp.ne.s32.totalorder %s14158_s11, %s12956_s22  ;;  %p12963_p10 = scmp.lt.u32.totalorder %s12956_s22, %s14158_s11 }
 0x12e   : > { %p12959_p6 = pnand %p12957_p5, %p13313_p0 }
 0x130   : > { %p12960_p9 = pneg %p12959_p6 }
 0x132   : > { %p12965_p13 = pnand %p12963_p10, %p12960_p9 }
 0x134   : > { %12968 = shalt.err (!%p12965_p13)
}
 0x135   : > { %s12969_s19 = scalar_lea.vmem %s524_s17, 16384  ;;  %p12977_p4 = scmp.lt.s32.totalorder %s524_s17, %s524_s17 }
 0x136   : > { %p12970_p1 = scmp.ne.s32.totalorder %s524_s17, %s12969_s19  ;;  %p12978_p7 = scmp.lt.s32.totalorder %s12969_s19, %s12969_s19 }
 0x138   : > { %p12972_p2 = pnand %p12970_p1, %p13313_p0  ;;  %p12979_p8 = por %p12978_p7, %p12977_p4 }
 0x13a   : > { %p12973_p3 = pneg %p12972_p2 }
 0x13c   : > { %p12980_p11 = pnand %p12979_p8, %p12973_p3 }
 0x13e   : > { %12983 = shalt.err (!%p12980_p11)
}
 0x13f   : > { %s14210_s27 = smov 16   ;;  %s14211_s0 = smov 256  }
 0x140   : > { %11220 = dma.hbm_to_vmem [thread:$0]  (!%p13301_p12), %s14158_s11, 16384, %s524_s17, [#allocation18], %s14211_s0, %s14211_s0, %s14210_s27  }
 0x141   : > { %s12984_s3 = scalar_lea.hbm %s14160_s13, 4096 }
 0x142   : > { %p12985_p5 = scmp.ne.s32.totalorder %s14160_s13, %s12984_s3  ;;  %p12991_p10 = scmp.lt.u32.totalorder %s12984_s3, %s14160_s13 }
 0x144   : > { %p12987_p6 = pnand %p12985_p5, %p13313_p0 }
 0x146   : > { %p12988_p9 = pneg %p12987_p6 }
 0x148   : > { %p12993_p13 = pnand %p12991_p10, %p12988_p9 }
 0x14a   : > { %12996 = shalt.err (!%p12993_p13)
}
 0x14b   : > { %s12997_s21 = scalar_lea.vmem %s548_s1, 4096  ;;  %p13005_p4 = scmp.lt.s32.totalorder %s548_s1, %s548_s1 }
 0x14c   : > { %p12998_p1 = scmp.ne.s32.totalorder %s548_s1, %s12997_s21  ;;  %p13006_p7 = scmp.lt.s32.totalorder %s12997_s21, %s12997_s21 }
 0x14e   : > { %p13000_p2 = pnand %p12998_p1, %p13313_p0  ;;  %p13007_p8 = por %p13006_p7, %p13005_p4 }
 0x150   : > { %p13001_p3 = pneg %p13000_p2 }
 0x152   : > { %p13008_p11 = pnand %p13007_p8, %p13001_p3 }
 0x154   : > { %13011 = shalt.err (!%p13008_p11)
}
 0x155   : > { %11226 = dma.hbm_to_vmem [thread:$0]  (!%p13301_p12), %s14160_s13, 4096, %s548_s1, [#allocation21], %s14208_s26, %s14208_s26, %s14207_s15  }
 0x156   : > { %s13159_s19 = smov [#allocation23]   ;;  %s13012_s30 = scalar_lea.hbm %s14161_s14, 16 }
 0x157   : > { %s561_s27 = sshll.u32 %s13159_s19, 4  ;;  %p13013_p5 = scmp.ne.s32.totalorder %s14161_s14, %s13012_s30  ;;  %s562_s27 = int_to_ptr.vmem [resolvable:$true] %s561_s27 }
 0x158   : > { %p13019_p10 = scmp.lt.u32.totalorder %s13012_s30, %s14161_s14 }
 0x159   : > { %p13015_p6 = pnand %p13013_p5, %p13313_p0 }
 0x15b   : > { %p13016_p9 = pneg %p13015_p6 }
 0x15d   : > { %p13021_p13 = pnand %p13019_p10, %p13016_p9 }
 0x15f   : > { %13024 = shalt.err (!%p13021_p13)
}
 0x160   : > { %s13025_s15 = scalar_lea.vmem %s562_s27, 16  ;;  %s13032_s26 = scalar_lea.vmem %s562_s27, 32 }
 0x161   : > { %p13026_p1 = scmp.ne.s32.totalorder %s562_s27, %s13025_s15  ;;  %p13033_p4 = scmp.lt.s32.totalorder %s562_s27, %s562_s27 }
 0x162   : > { %p13034_p7 = scmp.lt.s32.totalorder %s13032_s26, %s13025_s15 }
 0x163   : > { %p13028_p2 = pnand %p13026_p1, %p13313_p0 }
 0x164   : > { %p13035_p8 = por %p13034_p7, %p13033_p4 }
 0x165   : > { %p13029_p3 = pneg %p13028_p2 }
 0x167   : > { %p13036_p11 = pnand %p13035_p8, %p13029_p3 }
 0x169   : > { %13039 = shalt.err (!%p13036_p11)
}
 0x16a   : > { %11229 = dma.hbm_to_vmem [thread:$0]  (!%p13301_p12), %s14161_s14, 16, %s562_s27, [#allocation24]  }
 0x16b   : > { %s14212_s20 = sld [smem:[#allocation44_spill]] }
 0x171   : > { %p14213_p5 = scmp.ne.s32.totalorder %s14212_s20, 0 }
 0x172   : > { %s14214_s29 = sld [smem:[#allocation39_spill]] (!%p14213_p5) }
 0x173   : > { %583 = sbr.rel (%p14213_p5) target bundleno = 3522 (0xdc2), region = 80 }
 0x178   : > { %p14215_p6 = scmp.eq.s32.totalorder (!%p14213_p5), %s14214_s29, 0 }
 0x17a   : > { %13085 = dma.done.wait (%p14215_p6), [#allocation3], 2048   ;;  %p14216_p0 = pmov %p14215_p6 }
 0x17c   : > { %13087 = vsyncadd (%p14216_p0), [#allocation3], 4294965248  ;;  %p14217_p9 = pmov %p14216_p0 }
 0x17d   : > { %p14218_p10 = pmov %p14216_p0 }
 0x17e   : > { %13089 = dma.done.wait (%p14217_p9), [#allocation6], 16448  }
 0x17f   : > { %13091 = vsyncadd (%p14218_p10), [#allocation6], 4294950848  ;;  %p14219_p13 = pmov %p14216_p0 }
 0x180   : > { %p14220_p12 = pmov %p14216_p0 }
 0x181   : > { %13093 = dma.done.wait (%p14219_p13), [#allocation9], 49920  }
 0x182   : > { %13095 = vsyncadd (%p14220_p12), [#allocation9], 4294917376  ;;  %p14221_p1 = pmov %p14216_p0 }
 0x183   : > { %p14222_p2 = pmov %p14216_p0 }
 0x184   : > { %13097 = dma.done.wait (%p14221_p1), [#allocation12], 304  }
 0x185   : > { %13099 = vsyncadd (%p14222_p2), [#allocation12], 4294966992  ;;  %p14223_p3 = pmov %p14216_p0 }
 0x186   : > { %p14224_p4 = pmov %p14216_p0 }
 0x187   : > { %13101 = dma.done.wait (%p14223_p3), [#allocation15], 24608  }
 0x188   : > { %13103 = vsyncadd (%p14224_p4), [#allocation15], 4294942688  ;;  %p14225_p7 = pmov %p14216_p0 }
 0x189   : > { %p14226_p8 = pmov %p14216_p0 }
 0x18a   : > { %13105 = dma.done.wait (%p14225_p7), [#allocation18], 16448  }
 0x18b   : > { %13107 = vsyncadd (%p14226_p8), [#allocation18], 4294950848  ;;  %p14227_p11 = pmov %p14216_p0 }
 0x18c   : > { %p14228_p5 = pmov %p14216_p0 }
 0x18d   : > { %13109 = dma.done.wait (%p14227_p11), [#allocation21], 4160  }
 0x18e   : > { %13111 = vsyncadd (%p14228_p5), [#allocation21], 4294963136  ;;  %p14229_p6 = pmov %p14216_p0 }
 0x190   : > { %13113 = dma.done.wait (%p14229_p6), [#allocation24], 16  }
 0x191   : > { %13115 = vsyncadd (%p14216_p0), [#allocation24], 4294967280  ;;  %s9578_s23 = sshll.u32 %s14214_s29, 2  ;;  %s14230_s28 = sld [smem:[#allocation45_spill]]  ;;  %v11322_v4 = vld [vmem:[#allocation2] sm:$0xff]   ;;  %v11324_v14 = vld [vmem:[#allocation2 + $0x8] sm:$0xff]  }
 0x192   : > { %p684_p9 = scmp.lt.s32.totalorder %s9578_s23, 7  ;;  %v11323_v5 = vld [vmem:[#allocation2 + $0x20] sm:$0xff]   ;;  %10857 = vmatprep.mubr.bf16.mxu0 %v11322_v4  ;;  %v11325_v15 = vld [vmem:[#allocation2 + $0x28] sm:$0xff]   ;;  %v11326_v16 = vld [vmem:[#allocation2 + $0x30] sm:$0xff]   ;;  %vm2257_vm0 = vcmask 1045504   ;;  %vm2250_vm1 = vcmask 490496  }
 0x193   : > { %10881 = vmatprep.mubr.bf16.mxu1 %v11323_v5  ;;  %v11327_v17 = vld [vmem:[#allocation2 + $0x10] sm:$0xff]   ;;  %v11328_v18 = vld [vmem:[#allocation2 + $0x38] sm:$0x3f]   ;;  %v11330_v20 = vld [vmem:[#allocation2 + $0x60] sm:$0xff]   ;;  %vm6153_vm2 = vcmask 1043456   ;;  %vm6149_vm3 = vcmask 195584  }
 0x194   : > { %s14244_s23 = smov (!%p684_p9, %s9578_s23), 7  ;;  %v11329_v19 = vld [vmem:[#allocation2 + $0x18] sm:$0x3f]   ;;  %v11331_v21 = vld [vmem:[#allocation2 + $0x40] sm:$0xff]   ;;  %v11332_v24 = vld [vmem:[#allocation2 + $0x68] sm:$0xff]   ;;  %vm13162_vm4 = vmmov 0  }
 0x195   : > { %s9579_s16 = sshll.u32 %s14244_s23, 3  ;;  %v11340_v22 = vld [vmem:[#allocation5 + $0x4] ss:$16 sps:$4 sm:$0xff]   ;;  %v11343_v23 = vld [vmem:[#allocation5 + $0xc] ss:$16 sps:$4 sm:$0xff]   ;;  %vm7929_vm5 = vcmask 64512  }
 0x196   : > { %v11333_v25 = vld [vmem:[#allocation2 + $0x48] sm:$0xff]   ;;  %v11334_v26 = vld [vmem:[#allocation2 + $0x70] sm:$0xff]   ;;  %v11336_v36 = vld [vmem:[#allocation2 + $0x78] sm:$0x3f]   ;;  %s14231_s27 = sld [smem:[#allocation36_spill]]  ;;  %s14232_s30 = sld [smem:[#allocation42_spill]] }
 0x197   : > { %s13619_s19 = scalar_lea.vmem %s14230_s28, %s9579_s16  ;;  %v11335_v27 = vld [vmem:[#allocation2 + $0x50] sm:$0xff]   ;;  %v11341_v29 = vld [vmem:[#allocation5 + $0x8] ss:$16 sps:$4 sm:$0xff]   ;;  %v11349_v31 = vld [vmem:[#allocation5 + $0x2c] ss:$16 sps:$4 sm:$0xff]   ;;  %s10510_s24 = sshll.u32 %s14214_s29, 6 }
 0x198   : > { %v690_v0 = vld [vmem:[%s13619_s19] sm:$0xff]  ;;  %v691_v3 = vld [vmem:[%s13619_s19 + $0x8] sm:$0xff]  ;;  %v692_v8 = vld [vmem:[%s13619_s19 + $0x10] sm:$0xff]  ;;  %s14233_s26 = sld [smem:[#allocation49_spill]]  ;;  %s13163_s29 = smov [#allocation25]  }
 0x199   : > { %v694_v1 = vunpack.c.l.u8.bf16 %v690_v0  ;;  %v695_v2 = vunpack.c.h.u8.bf16 %v690_v0  ;;  %v696_v6 = vunpack.c.l.u8.bf16 %v691_v3  ;;  %v697_v7 = vunpack.c.h.u8.bf16 %v691_v3  ;;  %v693_v11 = vld [vmem:[%s13619_s19 + $0x18] sm:$0xff]  ;;  %v11338_v28 = vld [vmem:[#allocation5] ss:$16 sps:$4 sm:$0xff]   ;;  %v11346_v30 = vld [vmem:[#allocation5 + $0x24] ss:$16 sps:$4 sm:$0xff]   ;;  %s13044_s23 = sshll.u32 %s13163_s29, 4  ;;  %s13045_s23 = int_to_ptr.vmem [resolvable:$false] %s13044_s23 }
 0x19a   : > { %v698_v9 = vunpack.c.l.u8.bf16 %v692_v8  ;;  %v699_v10 = vunpack.c.h.u8.bf16 %v692_v8  ;;  %v700_v12 = vunpack.c.l.u8.bf16 %v693_v11  ;;  %v701_v13 = vunpack.c.h.u8.bf16 %v693_v11  ;;  %v11344_v32 = vld [vmem:[#allocation5 + $0x20] ss:$16 sps:$4 sm:$0xff]   ;;  %v11347_v33 = vld [vmem:[#allocation5 + $0x28] ss:$16 sps:$4 sm:$0xff]   ;;  %v11352_v34 = vld [vmem:[#allocation5 + $0x44] ss:$16 sps:$4 sm:$0xff]  }
 0x19b   : > { %10841 = vmatprep.subr.bf16.mxu0 %v694_v1  ;;  %10865 = vmatprep.subr.bf16.mxu1 %v694_v1  ;;  %v11355_v35 = vld [vmem:[#allocation5 + $0x4c] ss:$16 sps:$4 sm:$0xff]   ;;  %v11350_v38 = vld [vmem:[#allocation5 + $0x40] ss:$16 sps:$4 sm:$0xff]   ;;  %v11353_v39 = vld [vmem:[#allocation5 + $0x48] ss:$16 sps:$4 sm:$0xff]  }
 0x19c   : > { %10842 = vmatpush3.bf16.msra.mxu0 %v694_v1  ;;  %10866 = vmatpush3.bf16.msra.mxu1 %v694_v1  ;;  %v11337_v37 = vld [vmem:[#allocation2 + $0x58] sm:$0x3f]   ;;  %v11358_v40 = vld [vmem:[#allocation5 + $0x64] ss:$16 sps:$4 sm:$0xff]   ;;  %v11356_v42 = vld [vmem:[#allocation5 + $0x60] ss:$16 sps:$4 sm:$0xff]  }
 0x19d   : > { %10843 = vmatprep.subr.bf16.mxu0 %v695_v2  ;;  %10867 = vmatprep.subr.bf16.mxu1 %v695_v2  ;;  %v11361_v41 = vld [vmem:[#allocation5 + $0x6c] ss:$16 sps:$4 sm:$0xff]   ;;  %v11359_v43 = vld [vmem:[#allocation5 + $0x68] ss:$16 sps:$4 sm:$0xff]   ;;  %v11364_v44 = vld [vmem:[#allocation5 + $0x84] ss:$16 sps:$4 sm:$0xff]  }
 0x19e   : > { %v11367_v45 = vld [vmem:[#allocation5 + $0x8c] ss:$16 sps:$4 sm:$0xff]   ;;  %v11362_v46 = vld [vmem:[#allocation5 + $0x80] ss:$16 sps:$4 sm:$0xff]   ;;  %v11365_v47 = vld [vmem:[#allocation5 + $0x88] ss:$16 sps:$4 sm:$0xff]   ;;  %s14105_s1 = scalar_lea.hbm %s14233_s26, %s10510_s24 }
 0x19f   : > { %v11370_v48 = vld [vmem:[#allocation5 + $0xa4] ss:$16 sps:$4 sm:$0xff]   ;;  %v11373_v49 = vld [vmem:[#allocation5 + $0xac] ss:$16 sps:$4 sm:$0xff]   ;;  %v11368_v50 = vld [vmem:[#allocation5 + $0xa0] ss:$16 sps:$4 sm:$0xff]  }
 0x1a0   : > { %10844 = vmatpush3.bf16.msra.mxu0 %v695_v2  ;;  %10868 = vmatpush3.bf16.msra.mxu1 %v695_v2  ;;  %v11371_v51 = vld [vmem:[#allocation5 + $0xa8] ss:$16 sps:$4 sm:$0xff]   ;;  %v11376_v52 = vld [vmem:[#allocation5 + $0xc4] ss:$16 sps:$4 sm:$0xff]   ;;  %v11379_v53 = vld [vmem:[#allocation5 + $0xcc] ss:$16 sps:$4 sm:$0xff]  }
 0x1a1   : > { %10845 = vmatprep.subr.bf16.mxu0 %v696_v6  ;;  %10869 = vmatprep.subr.bf16.mxu1 %v696_v6  ;;  %v11374_v54 = vld [vmem:[#allocation5 + $0xc0] ss:$16 sps:$4 sm:$0xff]   ;;  %v11377_v55 = vld [vmem:[#allocation5 + $0xc8] ss:$16 sps:$4 sm:$0xff]   ;;  %v11382_v56 = vld [vmem:[#allocation5 + $0xe4] ss:$16 sps:$4 sm:$0xff]  }
 0x1a2   : > { %v11385_v57 = vld [vmem:[#allocation5 + $0xec] ss:$16 sps:$4 sm:$0xff]   ;;  %v11380_v58 = vld [vmem:[#allocation5 + $0xe0] ss:$16 sps:$4 sm:$0xff]   ;;  %v11383_v59 = vld [vmem:[#allocation5 + $0xe8] ss:$16 sps:$4 sm:$0xff]  }
 0x1a3   : > { %v11388_v60 = vld [vmem:[#allocation5 + $0x104] ss:$16 sps:$4 sm:$0xff]   ;;  %v11391_v61 = vld [vmem:[#allocation5 + $0x10c] ss:$16 sps:$4 sm:$0xff]   ;;  %v11386_v62 = vld [vmem:[#allocation5 + $0x100] ss:$16 sps:$4 sm:$0xff]  }
 0x1a4   : > { %10846 = vmatpush3.bf16.msra.mxu0 %v696_v6  ;;  %10870 = vmatpush3.bf16.msra.mxu1 %v696_v6  ;;  %v11389_v63 = vld [vmem:[#allocation5 + $0x108] ss:$16 sps:$4 sm:$0xff]   ;;  %v11394_v0 = vld [vmem:[#allocation5 + $0x124] ss:$16 sps:$4 sm:$0xff]   ;;  %v11403_v5 = vld [vmem:[#allocation5 + $0x14c] ss:$16 sps:$4 sm:$0xff]  }
 0x1a5   : > { %10847 = vmatprep.subr.bf16.mxu0 %v697_v7  ;;  %10871 = vmatprep.subr.bf16.mxu1 %v697_v7  ;;  %v11395_v3 = vld [vmem:[#allocation5 + $0x128] ss:$16 sps:$4 sm:$0xff]   ;;  %v11400_v4 = vld [vmem:[#allocation5 + $0x144] ss:$16 sps:$4 sm:$0xff]   ;;  %s680_s0 = sand.u32 1, %s14231_s27   ;;  %p14234_p13 = scmp.ne.s32.totalorder %s14232_s30, 0 }
 0x1a6   : > { %v11406_v8 = vld [vmem:[#allocation5 + $0x164] ss:$16 sps:$4 sm:$0xff]   ;;  %v11407_v11 = vld [vmem:[#allocation5 + $0x168] ss:$16 sps:$4 sm:$0xff]   ;;  %s9577_s25 = sshll.u32 %s680_s0, 2  ;;  %s9337_s22 = scalar_lea.sflag [#allocation4], %s680_s0 }
 0x1a7   : > { %s682_s2 = scalar_lea.vmem [#allocation25], %s9577_s25  ;;  %s13046_s16 = scalar_lea.vmem %s13045_s23, 128 }
 0x1a8   : > { %10848 = vmatpush3.bf16.msra.mxu0 %v697_v7  ;;  %10872 = vmatpush3.bf16.msra.mxu1 %v697_v7  ;;  %s9350_s3 = sshll.u32 %s682_s2, 4  ;;  %s14107_s3 = int_to_ptr.vmem [resolvable:$true] %s9350_s3 }
 0x1a9   : > { %10849 = vmatprep.subr.bf16.mxu0 %v698_v9  ;;  %10873 = vmatprep.subr.bf16.mxu1 %v698_v9  ;;  %s13040_s20 = scalar_lea.vmem %s14107_s3, 64  ;;  %p13047_p2 = scmp.lt.s32.totalorder %s14107_s3, %s13045_s23 }
 0x1aa   : > { %p13041_p10 = scmp.ne.s32.totalorder %s14107_s3, %s13040_s20  ;;  %p13048_p3 = scmp.lt.s32.totalorder %s13046_s16, %s13040_s20 }
 0x1ac   : > { %10850 = vmatpush3.bf16.msra.mxu0 %v698_v9  ;;  %10874 = vmatpush3.bf16.msra.mxu1 %v698_v9  ;;  %p13042_p12 = pnand %p13041_p10, %p14234_p13  ;;  %p13049_p4 = por %p13048_p3, %p13047_p2 }
 0x1ad   : > { %10851 = vmatprep.subr.bf16.mxu0 %v699_v10  ;;  %10875 = vmatprep.subr.bf16.mxu1 %v699_v10 }
 0x1ae   : > { %p13043_p1 = pneg %p13042_p12 }
 0x1b0   : > { %10852 = vmatpush3.bf16.msra.mxu0 %v699_v10  ;;  %10876 = vmatpush3.bf16.msra.mxu1 %v699_v10  ;;  %p13050_p7 = pnand %p13049_p4, %p13043_p1 }
 0x1b1   : > { %10853 = vmatprep.subr.bf16.mxu0 %v700_v12  ;;  %10877 = vmatprep.subr.bf16.mxu1 %v700_v12 }
 0x1b4   : > { %10854 = vmatpush3.bf16.msra.mxu0 %v700_v12  ;;  %10878 = vmatpush3.bf16.msra.mxu1 %v700_v12 }
 0x1b5   : > { %10855 = vmatprep.subr.bf16.mxu0 %v701_v13  ;;  %10879 = vmatprep.subr.bf16.mxu1 %v701_v13 }
 0x1b8   : > { %10856 = vmatpush3.bf16.msra.mxu0 %v701_v13  ;;  %10880 = vmatpush3.bf16.msra.mxu1 %v701_v13 }
 0x1b9   : > { %10913 = vmatprep.subr.bf16.mxu1 %v694_v1  ;;  %10889 = vmatprep.subr.bf16.mxu0 %v694_v1 }
 0x1bb   : > { %10858 = vmatmul.mubr.bf16.vlgmr.msra.gmra.mrb[0].mxu0 %v11324_v14  ;;  %10882 = vmatmul.mubr.bf16.vlgmr.msra.gmra.mrb[0].mxu1 %v11325_v15  ;;  %v11410_v14 = vld [vmem:[#allocation5 + $0x180] ss:$16 sps:$4 sm:$0xff]   ;;  %v11413_v15 = vld [vmem:[#allocation5 + $0x188] ss:$16 sps:$4 sm:$0xff]  }
 0x1bc   : > { %10914 = vmatpush3.bf16.msra.mxu1 %v694_v1  ;;  %10890 = vmatpush3.bf16.msra.mxu0 %v694_v1  ;;  %v11397_v1 = vld [vmem:[#allocation5 + $0x12c] ss:$16 sps:$4 sm:$0xff]  }
 0x1bd   : > { %10915 = vmatprep.subr.bf16.mxu1 %v695_v2  ;;  %10891 = vmatprep.subr.bf16.mxu0 %v695_v2 }
 0x1be   : > { %10885 = vmatprep.mubr.bf16.mxu1 %v11326_v16  ;;  %10861 = vmatprep.mubr.bf16.mxu0 %v11327_v17  ;;  %v11418_v16 = vld [vmem:[#allocation5 + $0x1a4] ss:$16 sps:$4 sm:$0xff]   ;;  %v11421_v17 = vld [vmem:[#allocation5 + $0x1ac] ss:$16 sps:$4 sm:$0xff]  }
 0x1c0   : > { %10916 = vmatpush3.bf16.msra.mxu1 %v695_v2  ;;  %10892 = vmatpush3.bf16.msra.mxu0 %v695_v2  ;;  %v11392_v2 = vld [vmem:[#allocation5 + $0x120] ss:$16 sps:$4 sm:$0xff]  }
 0x1c1   : > { %10917 = vmatprep.subr.bf16.mxu1 %v696_v6  ;;  %10893 = vmatprep.subr.bf16.mxu0 %v696_v6 }
 0x1c3   : > { %10886 = vmatmul.mubr.bf16.gmra.mrb[4].mxu1 %v11328_v18  ;;  %10862 = vmatmul.mubr.bf16.gmra.mrb[4].mxu0 %v11329_v19  ;;  %v11416_v18 = vld [vmem:[#allocation5 + $0x1a0] ss:$16 sps:$4 sm:$0xff]   ;;  %v11419_v19 = vld [vmem:[#allocation5 + $0x1a8] ss:$16 sps:$4 sm:$0xff]  }
 0x1c4   : > { %10918 = vmatpush3.bf16.msra.mxu1 %v696_v6  ;;  %10894 = vmatpush3.bf16.msra.mxu0 %v696_v6  ;;  %v11398_v6 = vld [vmem:[#allocation5 + $0x140] ss:$16 sps:$4 sm:$0xff]  }
 0x1c5   : > { %10919 = vmatprep.subr.bf16.mxu1 %v697_v7  ;;  %10895 = vmatprep.subr.bf16.mxu0 %v697_v7 }
 0x1c6   : > { %10929 = vmatprep.mubr.bf16.mxu1 %v11330_v20  ;;  %10905 = vmatprep.mubr.bf16.mxu0 %v11331_v21  ;;  %v11424_v20 = vld [vmem:[#allocation5 + $0x1c4] ss:$16 sps:$4 sm:$0xff]   ;;  %v11427_v21 = vld [vmem:[#allocation5 + $0x1cc] ss:$16 sps:$4 sm:$0xff]  }
 0x1c8   : > { %10920 = vmatpush3.bf16.msra.mxu1 %v697_v7  ;;  %10896 = vmatpush3.bf16.msra.mxu0 %v697_v7  ;;  %v11401_v7 = vld [vmem:[#allocation5 + $0x148] ss:$16 sps:$4 sm:$0xff]  }
 0x1c9   : > { %10921 = vmatprep.subr.bf16.mxu1 %v698_v9  ;;  %10897 = vmatprep.subr.bf16.mxu0 %v698_v9 }
 0x1cc   : > { %10922 = vmatpush3.bf16.msra.mxu1 %v698_v9  ;;  %10898 = vmatpush3.bf16.msra.mxu0 %v698_v9  ;;  %v11409_v9 = vld [vmem:[#allocation5 + $0x16c] ss:$16 sps:$4 sm:$0xff]  }
 0x1cd   : > { %10923 = vmatprep.subr.bf16.mxu1 %v699_v10  ;;  %10899 = vmatprep.subr.bf16.mxu0 %v699_v10 }
 0x1d0   : > { %10924 = vmatpush3.bf16.msra.mxu1 %v699_v10  ;;  %10900 = vmatpush3.bf16.msra.mxu0 %v699_v10  ;;  %v11404_v10 = vld [vmem:[#allocation5 + $0x160] ss:$16 sps:$4 sm:$0xff]  }
 0x1d1   : > { %10925 = vmatprep.subr.bf16.mxu1 %v700_v12  ;;  %10901 = vmatprep.subr.bf16.mxu0 %v700_v12 }
 0x1d4   : > { %10926 = vmatpush3.bf16.msra.mxu1 %v700_v12  ;;  %10902 = vmatpush3.bf16.msra.mxu0 %v700_v12  ;;  %v11412_v12 = vld [vmem:[#allocation5 + $0x184] ss:$16 sps:$4 sm:$0xff]  }
 0x1d5   : > { %10927 = vmatprep.subr.bf16.mxu1 %v701_v13  ;;  %10903 = vmatprep.subr.bf16.mxu0 %v701_v13 }
 0x1d8   : > { %10928 = vmatpush3.bf16.msra.mxu1 %v701_v13  ;;  %10904 = vmatpush3.bf16.msra.mxu0 %v701_v13  ;;  %v11415_v13 = vld [vmem:[#allocation5 + $0x18c] ss:$16 sps:$4 sm:$0xff]  }
 0x1d9   : > { %1899 = vmatprep.subr.bf16.mxu0 %v11340_v22  ;;  %2045 = vmatprep.subr.bf16.mxu1 %v11343_v23  ;;  %v11422_v22 = vld [vmem:[#allocation5 + $0x1c0] ss:$16 sps:$4 sm:$0xff]   ;;  %v11425_v23 = vld [vmem:[#allocation5 + $0x1c8] ss:$16 sps:$4 sm:$0xff]  }
 0x1db   : > { %10930 = vmatmul.mubr.bf16.vlgmr.msra.gmra.mrb[8].mxu1 %v11332_v24  ;;  %10906 = vmatmul.mubr.bf16.vlgmr.msra.gmra.mrb[8].mxu0 %v11333_v25  ;;  %v11430_v24 = vld [vmem:[#allocation5 + $0x1e4] ss:$16 sps:$4 sm:$0xff]   ;;  %v11433_v25 = vld [vmem:[#allocation5 + $0x1ec] ss:$16 sps:$4 sm:$0xff]  }
 0x1dc   : > { %10933 = vmatprep.mubr.bf16.mxu1 %v11334_v26  ;;  %10909 = vmatprep.mubr.bf16.mxu0 %v11335_v27  ;;  %v11428_v26 = vld [vmem:[#allocation5 + $0x1e0] ss:$16 sps:$4 sm:$0xff]   ;;  %v11431_v27 = vld [vmem:[#allocation5 + $0x1e8] ss:$16 sps:$4 sm:$0xff]  }
 0x1dd   : > { %1900 = vmatpush1.bf16.msra.mxu0 %v11338_v28  ;;  %2046 = vmatpush1.bf16.msra.mxu1 %v11341_v29  ;;  %v11436_v28 = vld [vmem:[#allocation5 + $0x204] ss:$16 sps:$4 sm:$0xff]   ;;  %v11439_v29 = vld [vmem:[#allocation5 + $0x20c] ss:$16 sps:$4 sm:$0xff]  }
 0x1de   : > { %1901 = vmatprep.subr.bf16.mxu0 %v11346_v30  ;;  %2047 = vmatprep.subr.bf16.mxu1 %v11349_v31 }
 0x1e1   : > { %1902 = vmatpush1.bf16.msra.mxu0 %v11344_v32  ;;  %2048 = vmatpush1.bf16.msra.mxu1 %v11347_v33 }
 0x1e2   : > { %1903 = vmatprep.subr.bf16.mxu0 %v11352_v34  ;;  %2049 = vmatprep.subr.bf16.mxu1 %v11355_v35 }
 0x1e3   : > { %10934 = vmatmul.mubr.bf16.gmra.mrb[12].mxu1 %v11336_v36  ;;  %10910 = vmatmul.mubr.bf16.gmra.mrb[12].mxu0 %v11337_v37  ;;  %v11434_v36 = vld [vmem:[#allocation5 + $0x200] ss:$16 sps:$4 sm:$0xff]   ;;  %v11437_v37 = vld [vmem:[#allocation5 + $0x208] ss:$16 sps:$4 sm:$0xff]  }
 0x1e5   : > { %1904 = vmatpush1.bf16.msra.mxu0 %v11350_v38  ;;  %2050 = vmatpush1.bf16.msra.mxu1 %v11353_v39 }
 0x1e6   : > { %1905 = vmatprep.subr.bf16.mxu0 %v11358_v40  ;;  %2051 = vmatprep.subr.bf16.mxu1 %v11361_v41 }
 0x1e9   : > { %1906 = vmatpush1.bf16.msra.mxu0 %v11356_v42  ;;  %2052 = vmatpush1.bf16.msra.mxu1 %v11359_v43 }
 0x1ea   : > { %1907 = vmatprep.subr.bf16.mxu0 %v11364_v44  ;;  %2053 = vmatprep.subr.bf16.mxu1 %v11367_v45  ;;  %v11442_v44 = vld [vmem:[#allocation5 + $0x224] ss:$16 sps:$4 sm:$0xff]   ;;  %v11445_v45 = vld [vmem:[#allocation5 + $0x22c] ss:$16 sps:$4 sm:$0xff]  }
 0x1ed   : > { %1908 = vmatpush1.bf16.msra.mxu0 %v11362_v46  ;;  %2054 = vmatpush1.bf16.msra.mxu1 %v11365_v47  ;;  %v11440_v46 = vld [vmem:[#allocation5 + $0x220] ss:$16 sps:$4 sm:$0xff]   ;;  %v11443_v47 = vld [vmem:[#allocation5 + $0x228] ss:$16 sps:$4 sm:$0xff]  }
 0x1ee   : > { %1909 = vmatprep.subr.bf16.mxu0 %v11370_v48  ;;  %2055 = vmatprep.subr.bf16.mxu1 %v11373_v49  ;;  %v11448_v48 = vld [vmem:[#allocation5 + $0x244] ss:$16 sps:$4 sm:$0xff]   ;;  %v11451_v49 = vld [vmem:[#allocation5 + $0x24c] ss:$16 sps:$4 sm:$0xff]  }
 0x1f1   : > { %1910 = vmatpush1.bf16.msra.mxu0 %v11368_v50  ;;  %2056 = vmatpush1.bf16.msra.mxu1 %v11371_v51 }
 0x1f2   : > { %1911 = vmatprep.subr.bf16.mxu0 %v11376_v52  ;;  %2057 = vmatprep.subr.bf16.mxu1 %v11379_v53 }
 0x1f5   : > { %1912 = vmatpush1.bf16.msra.mxu0 %v11374_v54  ;;  %2058 = vmatpush1.bf16.msra.mxu1 %v11377_v55  ;;  %v11446_v54 = vld [vmem:[#allocation5 + $0x240] ss:$16 sps:$4 sm:$0xff]   ;;  %v11449_v55 = vld [vmem:[#allocation5 + $0x248] ss:$16 sps:$4 sm:$0xff]  }
 0x1f6   : > { %1913 = vmatprep.subr.bf16.mxu0 %v11382_v56  ;;  %2059 = vmatprep.subr.bf16.mxu1 %v11385_v57 }
 0x1f9   : > { %1914 = vmatpush1.bf16.msra.mxu0 %v11380_v58  ;;  %2060 = vmatpush1.bf16.msra.mxu1 %v11383_v59  ;;  %v11454_v58 = vld [vmem:[#allocation5 + $0x264] ss:$16 sps:$4 sm:$0xff]   ;;  %v11457_v59 = vld [vmem:[#allocation5 + $0x26c] ss:$16 sps:$4 sm:$0xff]  }
 0x1fa   : > { %1915 = vmatprep.subr.bf16.mxu0 %v11388_v60  ;;  %2061 = vmatprep.subr.bf16.mxu1 %v11391_v61 }
 0x1fd   : > { %1916 = vmatpush1.bf16.msra.mxu0 %v11386_v62  ;;  %2062 = vmatpush1.bf16.msra.mxu1 %v11389_v63 }
 0x1fe   : > { %1917 = vmatprep.subr.bf16.mxu0 %v11394_v0  ;;  %2063 = vmatprep.subr.bf16.mxu1 %v11397_v1 }
 0x201   : > { %1918 = vmatpush1.bf16.msra.mxu0 %v11392_v2  ;;  %2064 = vmatpush1.bf16.msra.mxu1 %v11395_v3  ;;  %v11452_v2 = vld [vmem:[#allocation5 + $0x260] ss:$16 sps:$4 sm:$0xff]   ;;  %v11455_v3 = vld [vmem:[#allocation5 + $0x268] ss:$16 sps:$4 sm:$0xff]  }
 0x202   : > { %1919 = vmatprep.subr.bf16.mxu0 %v11400_v4  ;;  %2065 = vmatprep.subr.bf16.mxu1 %v11403_v5  ;;  %v11460_v4 = vld [vmem:[#allocation5 + $0x284] ss:$16 sps:$4 sm:$0xff]   ;;  %v11463_v5 = vld [vmem:[#allocation5 + $0x28c] ss:$16 sps:$4 sm:$0xff]  }
 0x205   : > { %1920 = vmatpush1.bf16.msra.mxu0 %v11398_v6  ;;  %2066 = vmatpush1.bf16.msra.mxu1 %v11401_v7  ;;  %v11458_v6 = vld [vmem:[#allocation5 + $0x280] ss:$16 sps:$4 sm:$0xff]   ;;  %v11461_v7 = vld [vmem:[#allocation5 + $0x288] ss:$16 sps:$4 sm:$0xff]  }
 0x206   : > { %1921 = vmatprep.subr.bf16.mxu0 %v11406_v8  ;;  %2067 = vmatprep.subr.bf16.mxu1 %v11409_v9  ;;  %v11466_v8 = vld [vmem:[#allocation5 + $0x2a4] ss:$16 sps:$4 sm:$0xff]   ;;  %v11469_v9 = vld [vmem:[#allocation5 + $0x2ac] ss:$16 sps:$4 sm:$0xff]  }
 0x209   : > { %1922 = vmatpush1.bf16.msra.mxu0 %v11404_v10  ;;  %2068 = vmatpush1.bf16.msra.mxu1 %v11407_v11  ;;  %v11464_v10 = vld [vmem:[#allocation5 + $0x2a0] ss:$16 sps:$4 sm:$0xff]   ;;  %v11467_v11 = vld [vmem:[#allocation5 + $0x2a8] ss:$16 sps:$4 sm:$0xff]  }
 0x20a   : > { %1923 = vmatprep.subr.bf16.mxu0 %v11412_v12  ;;  %2069 = vmatprep.subr.bf16.mxu1 %v11415_v13  ;;  %v11472_v12 = vld [vmem:[#allocation5 + $0x2c4] ss:$16 sps:$4 sm:$0xff]   ;;  %v11475_v13 = vld [vmem:[#allocation5 + $0x2cc] ss:$16 sps:$4 sm:$0xff]  }
 0x20d   : > { %1924 = vmatpush1.bf16.msra.mxu0 %v11410_v14  ;;  %2070 = vmatpush1.bf16.msra.mxu1 %v11413_v15  ;;  %v11470_v14 = vld [vmem:[#allocation5 + $0x2c0] ss:$16 sps:$4 sm:$0xff]   ;;  %v11473_v15 = vld [vmem:[#allocation5 + $0x2c8] ss:$16 sps:$4 sm:$0xff]  }
 0x20e   : > { %1925 = vmatprep.subr.bf16.mxu0 %v11418_v16  ;;  %2071 = vmatprep.subr.bf16.mxu1 %v11421_v17  ;;  %v11478_v16 = vld [vmem:[#allocation5 + $0x2e4] ss:$16 sps:$4 sm:$0xff]   ;;  %v11481_v17 = vld [vmem:[#allocation5 + $0x2ec] ss:$16 sps:$4 sm:$0xff]  }
 0x211   : > { %1926 = vmatpush1.bf16.msra.mxu0 %v11416_v18  ;;  %2072 = vmatpush1.bf16.msra.mxu1 %v11419_v19  ;;  %v11476_v18 = vld [vmem:[#allocation5 + $0x2e0] ss:$16 sps:$4 sm:$0xff]   ;;  %v11479_v19 = vld [vmem:[#allocation5 + $0x2e8] ss:$16 sps:$4 sm:$0xff]  }
 0x212   : > { %1927 = vmatprep.subr.bf16.mxu0 %v11424_v20  ;;  %2073 = vmatprep.subr.bf16.mxu1 %v11427_v21  ;;  %v11484_v20 = vld [vmem:[#allocation5 + $0x304] ss:$16 sps:$4 sm:$0xff]   ;;  %v11487_v21 = vld [vmem:[#allocation5 + $0x30c] ss:$16 sps:$4 sm:$0xff]  }
 0x215   : > { %1928 = vmatpush1.bf16.msra.mxu0 %v11422_v22  ;;  %2074 = vmatpush1.bf16.msra.mxu1 %v11425_v23 }
 0x216   : > { %1929 = vmatprep.subr.bf16.mxu0 %v11430_v24  ;;  %2075 = vmatprep.subr.bf16.mxu1 %v11433_v25 }
 0x219   : > { %1930 = vmatpush1.bf16.msra.mxu0 %v11428_v26  ;;  %2076 = vmatpush1.bf16.msra.mxu1 %v11431_v27  ;;  %v11482_v26 = vld [vmem:[#allocation5 + $0x300] ss:$16 sps:$4 sm:$0xff]   ;;  %v11485_v27 = vld [vmem:[#allocation5 + $0x308] ss:$16 sps:$4 sm:$0xff]  }
 0x21a   : > { %1972 = vmatprep.subr.bf16.mxu0 %v11436_v28  ;;  %2118 = vmatprep.subr.bf16.mxu1 %v11439_v29 }
 0x28e   : > { %v10859_v30 = vpop.f32.mrb[0].mxu0  ;;  %v10883_v31 = vpop.f32.mrb[0].mxu1 }
 0x28f   : > { %v768_v32 = vpop.f32.mrb[1].mxu0  ;;  %v870_v33 = vpop.f32.mrb[1].mxu1 }
 0x290   : > { %v10860_v34 = vpop.f32.mrb[2].mxu0  ;;  %v10884_v35 = vpop.f32.mrb[2].mxu1 }
 0x291   : > { %v800_v38 = vpack.c.bf16 %v10860_v34, %v10859_v30  ;;  %v902_v39 = vpack.c.bf16 %v10884_v35, %v10883_v31  ;;  %v771_v40 = vpop.f32.mrb[3].mxu0  ;;  %v873_v41 = vpop.f32.mrb[3].mxu1  ;;  %v11490_v30 = vld [vmem:[#allocation5 + $0x324] ss:$16 sps:$4 sm:$0xff]   ;;  %v11493_v31 = vld [vmem:[#allocation5 + $0x32c] ss:$16 sps:$4 sm:$0xff]  }
 0x292   : > { %v799_v42 = vpack.c.bf16 %v771_v40, %v768_v32  ;;  %v901_v43 = vpack.c.bf16 %v873_v41, %v870_v33  ;;  %v11496_v40 = vld [vmem:[#allocation5 + $0x344] ss:$16 sps:$4 sm:$0xff]   ;;  %v11499_v41 = vld [vmem:[#allocation5 + $0x34c] ss:$16 sps:$4 sm:$0xff]  }
 0x294   : > { %1931 = vmatprep.mubr.bf16.mxu0 %v901_v43  ;;  %2077 = vmatprep.mubr.bf16.mxu1 %v901_v43 }
 0x295   : > { %1932 = vmatmul.mubr.bf16.vlgmr.msra.gmra.mrb[16].mxu0 %v799_v42  ;;  %2078 = vmatmul.mubr.bf16.vlgmr.msra.gmra.mrb[16].mxu1 %v799_v42 }
 0x296   : > { %1973 = vmatpush1.bf16.msra.mxu0 %v11434_v36  ;;  %2119 = vmatpush1.bf16.msra.mxu1 %v11437_v37  ;;  %v10887_v50 = vpop.f32.mrb[4].mxu1  ;;  %v10863_v51 = vpop.f32.mrb[4].mxu0 }
 0x297   : > { %1941 = vmatprep.mubr.bf16.mxu0 %v902_v39  ;;  %2087 = vmatprep.mubr.bf16.mxu1 %v902_v39  ;;  %v886_v52 = vpop.f32.mrb[5].mxu1  ;;  %v784_v53 = vpop.f32.mrb[5].mxu0  ;;  %v11491_v39 = vld [vmem:[#allocation5 + $0x328] ss:$16 sps:$4 sm:$0xff]  }
 0x298   : > { %1974 = vmatprep.subr.bf16.mxu0 %v11442_v44  ;;  %2120 = vmatprep.subr.bf16.mxu1 %v11445_v45  ;;  %v10888_v56 = vpop.f32.mrb[6].mxu1  ;;  %v10864_v57 = vpop.f32.mrb[6].mxu0 }
 0x299   : > { %v904_v60 = vpack.c.bf16 %v10888_v56, %v10887_v50  ;;  %v802_v61 = vpack.c.bf16 %v10864_v57, %v10863_v51  ;;  %v889_v62 = vpop.f32.mrb[7].mxu1  ;;  %v787_v63 = vpop.f32.mrb[7].mxu0  ;;  %v11502_v50 = vld [vmem:[#allocation5 + $0x364] ss:$16 sps:$4 sm:$0xff]   ;;  %v11505_v51 = vld [vmem:[#allocation5 + $0x36c] ss:$16 sps:$4 sm:$0xff]  }
 0x29a   : > { %1975 = vmatpush1.bf16.msra.mxu0 %v11440_v46  ;;  %2121 = vmatpush1.bf16.msra.mxu1 %v11443_v47  ;;  %v903_v0 = vpack.c.bf16 %v889_v62, %v886_v52  ;;  %v801_v1 = vpack.c.bf16 %v787_v63, %v784_v53  ;;  %v11494_v46 = vld [vmem:[#allocation5 + $0x340] ss:$16 sps:$4 sm:$0xff]   ;;  %v11497_v47 = vld [vmem:[#allocation5 + $0x348] ss:$16 sps:$4 sm:$0xff]  }
 0x29b   : > { %1976 = vmatprep.subr.bf16.mxu0 %v11448_v48  ;;  %2122 = vmatprep.subr.bf16.mxu1 %v11451_v49  ;;  %v11506_v62 = vld [vmem:[#allocation5 + $0x380] ss:$16 sps:$4 sm:$0xff]   ;;  %v11509_v63 = vld [vmem:[#allocation5 + $0x388] ss:$16 sps:$4 sm:$0xff]  }
 0x29d   : > { %1942 = vmatmul.mubr.bf16.gmra.mrb[20].mxu0 %v800_v38  ;;  %2088 = vmatmul.mubr.bf16.gmra.mrb[20].mxu1 %v800_v38  ;;  %v11488_v38 = vld [vmem:[#allocation5 + $0x320] ss:$16 sps:$4 sm:$0xff]  }
 0x29e   : > { %1977 = vmatpush1.bf16.msra.mxu0 %v11446_v54  ;;  %2123 = vmatpush1.bf16.msra.mxu1 %v11449_v55 }
 0x29f   : > { %1978 = vmatprep.subr.bf16.mxu0 %v11454_v58  ;;  %2124 = vmatprep.subr.bf16.mxu1 %v11457_v59  ;;  %v11500_v58 = vld [vmem:[#allocation5 + $0x360] ss:$16 sps:$4 sm:$0xff]   ;;  %v11503_v59 = vld [vmem:[#allocation5 + $0x368] ss:$16 sps:$4 sm:$0xff]  }
 0x2a0   : > { %1951 = vmatprep.mubr.bf16.mxu0 %v903_v0  ;;  %2097 = vmatprep.mubr.bf16.mxu1 %v903_v0  ;;  %v11514_v0 = vld [vmem:[#allocation5 + $0x3a4] ss:$16 sps:$4 sm:$0xff]  }
 0x2a2   : > { %1979 = vmatpush1.bf16.msra.mxu0 %v11452_v2  ;;  %2125 = vmatpush1.bf16.msra.mxu1 %v11455_v3  ;;  %v11512_v2 = vld [vmem:[#allocation5 + $0x3a0] ss:$16 sps:$4 sm:$0xff]   ;;  %v11515_v3 = vld [vmem:[#allocation5 + $0x3a8] ss:$16 sps:$4 sm:$0xff]  }
 0x2a3   : > { %1980 = vmatprep.subr.bf16.mxu0 %v11460_v4  ;;  %2126 = vmatprep.subr.bf16.mxu1 %v11463_v5  ;;  %v11520_v4 = vld [vmem:[#allocation5 + $0x3c4] ss:$16 sps:$4 sm:$0xff]   ;;  %v11523_v5 = vld [vmem:[#allocation5 + $0x3cc] ss:$16 sps:$4 sm:$0xff]  }
 0x2a5   : > { %1952 = vmatmul.mubr.bf16.gmra.mrb[24].mxu0 %v801_v1  ;;  %2098 = vmatmul.mubr.bf16.gmra.mrb[24].mxu1 %v801_v1  ;;  %v11517_v1 = vld [vmem:[#allocation5 + $0x3ac] ss:$16 sps:$4 sm:$0xff]  }
 0x2a6   : > { %1981 = vmatpush1.bf16.msra.mxu0 %v11458_v6  ;;  %2127 = vmatpush1.bf16.msra.mxu1 %v11461_v7  ;;  %v11518_v6 = vld [vmem:[#allocation5 + $0x3c0] ss:$16 sps:$4 sm:$0xff]   ;;  %v11521_v7 = vld [vmem:[#allocation5 + $0x3c8] ss:$16 sps:$4 sm:$0xff]  }
 0x2a7   : > { %1982 = vmatprep.subr.bf16.mxu0 %v11466_v8  ;;  %2128 = vmatprep.subr.bf16.mxu1 %v11469_v9  ;;  %v11526_v8 = vld [vmem:[#allocation5 + $0x3e4] ss:$16 sps:$4 sm:$0xff]   ;;  %v11529_v9 = vld [vmem:[#allocation5 + $0x3ec] ss:$16 sps:$4 sm:$0xff]  }
 0x2a8   : > { %1961 = vmatprep.mubr.bf16.mxu0 %v904_v60  ;;  %2107 = vmatprep.mubr.bf16.mxu1 %v904_v60  ;;  %v11508_v60 = vld [vmem:[#allocation5 + $0x384] ss:$16 sps:$4 sm:$0xff]  }
 0x2aa   : > { %1983 = vmatpush1.bf16.msra.mxu0 %v11464_v10  ;;  %2129 = vmatpush1.bf16.msra.mxu1 %v11467_v11  ;;  %v11524_v10 = vld [vmem:[#allocation5 + $0x3e0] ss:$16 sps:$4 sm:$0xff]   ;;  %v11527_v11 = vld [vmem:[#allocation5 + $0x3e8] ss:$16 sps:$4 sm:$0xff]  }
 0x2ab   : > { %1984 = vmatprep.subr.bf16.mxu0 %v11472_v12  ;;  %2130 = vmatprep.subr.bf16.mxu1 %v11475_v13  ;;  %v13160_v12 = vmov 0   ;;  %v1239_v13 = vlaneseq }
 0x2ad   : > { %1962 = vmatmul.mubr.bf16.gmra.mrb[28].mxu0 %v802_v61  ;;  %2108 = vmatmul.mubr.bf16.gmra.mrb[28].mxu1 %v802_v61  ;;  %v11511_v61 = vld [vmem:[#allocation5 + $0x38c] ss:$16 sps:$4 sm:$0xff]  }
 0x2ae   : > { %1985 = vmatpush1.bf16.msra.mxu0 %v11470_v14  ;;  %2131 = vmatpush1.bf16.msra.mxu1 %v11473_v15  ;;  %v10931_v22 = vpop.f32.mrb[8].mxu1  ;;  %v10907_v23 = vpop.f32.mrb[8].mxu0  ;;  %v13639_v14 = vshrl.u32 %v1239_v13, 7 }
 0x2af   : > { %1986 = vmatprep.subr.bf16.mxu0 %v11478_v16  ;;  %2132 = vmatprep.subr.bf16.mxu1 %v11481_v17  ;;  %v1074_v24 = vpop.f32.mrb[9].mxu1  ;;  %v972_v25 = vpop.f32.mrb[9].mxu0  ;;  %v1237_v17 = vld [vmem:[#allocation7] sm:$0xf] }
 0x2b0   : > { %v10932_v28 = vpop.f32.mrb[10].mxu1  ;;  %v10908_v29 = vpop.f32.mrb[10].mxu0  ;;  %v13642_v15 = vsub.s32 0, %v13639_v14  ;;  %v13645_v16 = vsub.s32 2, %v13639_v14 }
 0x2b1   : > { %v13625_v32 = vpack.c.bf16 %v10932_v28, %v10931_v22  ;;  %v13627_v33 = vpack.c.bf16 %v10908_v29, %v10907_v23  ;;  %v1077_v34 = vpop.f32.mrb[11].mxu1  ;;  %v975_v35 = vpop.f32.mrb[11].mxu0 }
 0x2b2   : > { %1987 = vmatpush1.bf16.msra.mxu0 %v11476_v18  ;;  %2133 = vmatpush1.bf16.msra.mxu1 %v11479_v19  ;;  %v1105_v36 = vpack.c.bf16 %v1077_v34, %v1074_v24  ;;  %v13629_v37 = vpack.c.bf16 %v975_v35, %v972_v25  ;;  %v13648_v18 = vsub.s32 1, %v13639_v14  ;;  %v1253_v19 = vsub.s32 3, %v13639_v14 }
 0x2b3   : > { %1988 = vmatprep.subr.bf16.mxu0 %v11484_v20  ;;  %2134 = vmatprep.subr.bf16.mxu1 %v11487_v21  ;;  %v13652_v20 = vrot.slane %v1237_v17, %v13642_v15  ;;  %v13655_v21 = vrot.slane %v1237_v17, %v13645_v16 }
 0x2b4   : > { %2004 = vmatprep.mubr.bf16.mxu0 %v1105_v36  ;;  %2150 = vmatprep.mubr.bf16.mxu1 %v1105_v36  ;;  %v13658_v22 = vrot.slane %v1237_v17, %v13648_v18  ;;  %v13662_v23 = vrot.slane %v1237_v17, %v1253_v19 }
 0x2b6   : > { %1989 = vmatpush1.bf16.msra.mxu0 %v11482_v26  ;;  %2135 = vmatpush1.bf16.msra.mxu1 %v11485_v27  ;;  %v10935_v42 = vpop.f32.mrb[12].mxu1  ;;  %v10911_v43 = vpop.f32.mrb[12].mxu0 }
 0x2b7   : > { %1990 = vmatprep.subr.bf16.mxu0 %v11490_v30  ;;  %2136 = vmatprep.subr.bf16.mxu1 %v11493_v31  ;;  %v1090_v44 = vpop.f32.mrb[13].mxu1  ;;  %v988_v45 = vpop.f32.mrb[13].mxu0 }
 0x2b8   : > { %v10936_v48 = vpop.f32.mrb[14].mxu1  ;;  %v10912_v49 = vpop.f32.mrb[14].mxu0 }
 0x2b9   : > { %v1108_v52 = vpack.c.bf16 %v10936_v48, %v10935_v42  ;;  %v1006_v53 = vpack.c.bf16 %v10912_v49, %v10911_v43  ;;  %v1093_v54 = vpop.f32.mrb[15].mxu1  ;;  %v991_v55 = vpop.f32.mrb[15].mxu0 }
 0x2ba   : > { %1991 = vmatpush1.bf16.msra.mxu0 %v11488_v38  ;;  %2137 = vmatpush1.bf16.msra.mxu1 %v11491_v39  ;;  %v1107_v56 = vpack.c.bf16 %v1093_v54, %v1090_v44  ;;  %v1005_v57 = vpack.c.bf16 %v991_v55, %v988_v45 }
 0x2bb   : > { %1992 = vmatprep.subr.bf16.mxu0 %v11496_v40  ;;  %2138 = vmatprep.subr.bf16.mxu1 %v11499_v41 }
 0x2be   : > { %1993 = vmatpush1.bf16.msra.mxu0 %v11494_v46  ;;  %2139 = vmatpush1.bf16.msra.mxu1 %v11497_v47 }
 0x2bf   : > { %1994 = vmatprep.subr.bf16.mxu0 %v11502_v50  ;;  %2140 = vmatprep.subr.bf16.mxu1 %v11505_v51 }
 0x2c2   : > { %1995 = vmatpush1.bf16.msra.mxu0 %v11500_v58  ;;  %2141 = vmatpush1.bf16.msra.mxu1 %v11503_v59 }
 0x2c3   : > { %1996 = vmatprep.subr.bf16.mxu0 %v11508_v60  ;;  %2142 = vmatprep.subr.bf16.mxu1 %v11511_v61 }
 0x2c6   : > { %1997 = vmatpush1.bf16.msra.mxu0 %v11506_v62  ;;  %2143 = vmatpush1.bf16.msra.mxu1 %v11509_v63 }
 0x2c7   : > { %1998 = vmatprep.subr.bf16.mxu0 %v11514_v0  ;;  %2144 = vmatprep.subr.bf16.mxu1 %v11517_v1 }
 0x2ca   : > { %1999 = vmatpush1.bf16.msra.mxu0 %v11512_v2  ;;  %2145 = vmatpush1.bf16.msra.mxu1 %v11515_v3 }
 0x2cb   : > { %2000 = vmatprep.subr.bf16.mxu0 %v11520_v4  ;;  %2146 = vmatprep.subr.bf16.mxu1 %v11523_v5 }
 0x2ce   : > { %2001 = vmatpush1.bf16.msra.mxu0 %v11518_v6  ;;  %2147 = vmatpush1.bf16.msra.mxu1 %v11521_v7 }
 0x2cf   : > { %2002 = vmatprep.subr.bf16.mxu0 %v11526_v8  ;;  %2148 = vmatprep.subr.bf16.mxu1 %v11529_v9 }
 0x2d2   : > { %2003 = vmatpush1.bf16.msra.mxu0 %v11524_v10  ;;  %2149 = vmatpush1.bf16.msra.mxu1 %v11527_v11 }
 0x2d5   : > { %2005 = vmatmul.mubr.bf16.vlgmr.msra.gmra.mrb[16].mxu0 %v13629_v37  ;;  %2151 = vmatmul.mubr.bf16.vlgmr.msra.gmra.mrb[16].mxu1 %v13629_v37 }
 0x2d6   : > { %2014 = vmatprep.mubr.bf16.mxu0 %v13625_v32  ;;  %2160 = vmatprep.mubr.bf16.mxu1 %v13625_v32 }
 0x2dd   : > { %2015 = vmatmul.mubr.bf16.gmra.mrb[20].mxu0 %v13627_v33  ;;  %2161 = vmatmul.mubr.bf16.gmra.mrb[20].mxu1 %v13627_v33 }
 0x2de   : > { %2024 = vmatprep.mubr.bf16.mxu0 %v1107_v56  ;;  %2170 = vmatprep.mubr.bf16.mxu1 %v1107_v56 }
 0x2e5   : > { %2025 = vmatmul.mubr.bf16.gmra.mrb[24].mxu0 %v1005_v57  ;;  %2171 = vmatmul.mubr.bf16.gmra.mrb[24].mxu1 %v1005_v57 }
 0x2e6   : > { %2034 = vmatprep.mubr.bf16.mxu0 %v1108_v52  ;;  %2180 = vmatprep.mubr.bf16.mxu1 %v1108_v52 }
 0x2ed   : > { %2035 = vmatmul.mubr.bf16.gmra.mrb[28].mxu0 %v1006_v53  ;;  %2181 = vmatmul.mubr.bf16.gmra.mrb[28].mxu1 %v1006_v53 }
 0x2ee   : > { %2302 = vmatprep.mubr.bf16.mxu0 %v13160_v12  ;;  %2353 = vmatprep.mubr.bf16.mxu1 %v13160_v12 }
 0x3a8   : > { %v2006_v24 = vpop.f32.mrb[16].mxu0  ;;  %v2152_v25 = vpop.f32.mrb[16].mxu1 }
 0x3a9   : > { %v10969_v26 = vadd.f32 %v2006_v24, %v13652_v20  ;;  %v10985_v27 = vadd.f32 %v2152_v25, %v13655_v21  ;;  %v2008_v28 = vpop.f32.mrb[17].mxu0  ;;  %v2154_v29 = vpop.f32.mrb[17].mxu1 }
 0x3aa   : > { %v10970_v30 = vadd.f32 %v2008_v28, %v13658_v22  ;;  %v10986_v31 = vadd.f32 %v2154_v29, %v13662_v23  ;;  %v2010_v32 = vpop.f32.mrb[18].mxu0  ;;  %v2156_v33 = vpop.f32.mrb[18].mxu1 }
 0x3ab   : > { %12562 = vtanh.f32 %v10969_v26  ;;  %v10971_v34 = vadd.f32 %v2010_v32, %v13652_v20  ;;  %v2012_v35 = vpop.f32.mrb[19].mxu0  ;;  %v2158_v36 = vpop.f32.mrb[19].mxu1  ;;  %v10987_v37 = vadd.f32 %v2156_v33, %v13655_v21 }
 0x3ac   : > { %12564 = vtanh.f32 %v10985_v27  ;;  %v10972_v38 = vadd.f32 %v2012_v35, %v13658_v22  ;;  %v10988_v39 = vadd.f32 %v2158_v36, %v13662_v23 }
 0x3ad   : > { %12566 = vtanh.f32 %v10970_v30 }
 0x3ae   : > { %12568 = vtanh.f32 %v10986_v31 }
 0x3af   : > { %12570 = vtanh.f32 %v10971_v34 }
 0x3b0   : > { %12572 = vtanh.f32 %v10987_v37  ;;  %v2016_v40 = vpop.f32.mrb[20].mxu0  ;;  %v2162_v41 = vpop.f32.mrb[20].mxu1 }
 0x3b1   : > { %12574 = vtanh.f32 %v10972_v38  ;;  %v10973_v42 = vadd.f32 %v2016_v40, %v13652_v20  ;;  %v10989_v43 = vadd.f32 %v2162_v41, %v13655_v21  ;;  %v2018_v44 = vpop.f32.mrb[21].mxu0  ;;  %v2164_v45 = vpop.f32.mrb[21].mxu1 }
 0x3b2   : > { %12576 = vtanh.f32 %v10988_v39  ;;  %v10974_v46 = vadd.f32 %v2018_v44, %v13658_v22  ;;  %v10990_v47 = vadd.f32 %v2164_v45, %v13662_v23  ;;  %v2020_v48 = vpop.f32.mrb[22].mxu0  ;;  %v2166_v49 = vpop.f32.mrb[22].mxu1 }
 0x3b3   : > { %12578 = vtanh.f32 %v10973_v42  ;;  %v10975_v50 = vadd.f32 %v2020_v48, %v13652_v20  ;;  %v2022_v51 = vpop.f32.mrb[23].mxu0  ;;  %v2168_v52 = vpop.f32.mrb[23].mxu1  ;;  %v10991_v53 = vadd.f32 %v2166_v49, %v13655_v21 }
 0x3b4   : > { %12580 = vtanh.f32 %v10989_v43  ;;  %v10976_v55 = vadd.f32 %v2022_v51, %v13658_v22  ;;  %v10992_v57 = vadd.f32 %v2168_v52, %v13662_v23 }
 0x3b5   : > { %v12563_v54 = vpop.eup %12562  ;;  %12582 = vtanh.f32 %v10974_v46 }
 0x3b6   : > { %v12565_v56 = vpop.eup %12564  ;;  %12584 = vtanh.f32 %v10990_v47 }
 0x3b7   : > { %v12567_v58 = vpop.eup %12566  ;;  %12586 = vtanh.f32 %v10975_v50 }
 0x3b8   : > { %v12569_v59 = vpop.eup %12568  ;;  %12588 = vtanh.f32 %v10991_v53  ;;  %v2026_v60 = vpop.f32.mrb[24].mxu0 }
 0x3b9   : > { %v2172_v61 = vpop.f32.mrb[24].mxu1  ;;  %v12571_v62 = vpop.eup %12570  ;;  %12590 = vtanh.f32 %v10976_v55  ;;  %v10977_v63 = vadd.f32 %v2026_v60, %v13652_v20 }
 0x3ba   : > { %v10993_v0 = vadd.f32 %v2172_v61, %v13655_v21  ;;  %v2028_v1 = vpop.f32.mrb[25].mxu0  ;;  %v2174_v2 = vpop.f32.mrb[25].mxu1  ;;  %12592 = vtanh.f32 %v10992_v57  ;;  %v13684_v8 = vpack.c.bf16 %v12571_v62, %v12563_v54 }
 0x3bb   : > { %v12573_v3 = vpop.eup %12572  ;;  %v10978_v4 = vadd.f32 %v2028_v1, %v13658_v22  ;;  %v10994_v5 = vadd.f32 %v2174_v2, %v13662_v23  ;;  %v2030_v6 = vpop.f32.mrb[26].mxu0  ;;  %12594 = vtanh.f32 %v10977_v63 }
 0x3bc   : > { %v2176_v7 = vpop.f32.mrb[26].mxu1  ;;  %v12575_v9 = vpop.eup %12574  ;;  %v10979_v10 = vadd.f32 %v2030_v6, %v13652_v20  ;;  %v13687_v17 = vpack.c.bf16 %v12573_v3, %v12565_v56  ;;  %12596 = vtanh.f32 %v10993_v0 }
 0x3bd   : > { %v2032_v11 = vpop.f32.mrb[27].mxu0  ;;  %v2178_v13 = vpop.f32.mrb[27].mxu1  ;;  %v10995_v25 = vadd.f32 %v2176_v7, %v13655_v21  ;;  %v13690_v26 = vpack.c.bf16 %v12575_v9, %v12567_v58  ;;  %12598 = vtanh.f32 %v10978_v4 }
 0x3be   : > { %v12577_v24 = vpop.eup %12576  ;;  %v10980_v28 = vadd.f32 %v2032_v11, %v13658_v22  ;;  %12600 = vtanh.f32 %v10994_v5  ;;  %v10996_v31 = vadd.f32 %v2178_v13, %v13662_v23 }
 0x3bf   : > { %v12579_v27 = vpop.eup %12578  ;;  %v13693_v29 = vpack.c.bf16 %v12577_v24, %v12569_v59  ;;  %2270 = vmatprep.subr.bf16.mxu0 %v13690_v26  ;;  %12602 = vtanh.f32 %v10979_v10 }
 0x3c0   : > { %v12581_v30 = vpop.eup %12580  ;;  %2271 = vmatpush1.bf16.msra.mxu0 %v13684_v8  ;;  %12604 = vtanh.f32 %v10995_v25  ;;  %v2036_v34 = vpop.f32.mrb[28].mxu0 }
 0x3c1   : > { %v12583_v32 = vpop.eup %12582  ;;  %2321 = vmatprep.subr.bf16.mxu1 %v13693_v29  ;;  %v2182_v35 = vpop.f32.mrb[28].mxu1  ;;  %12606 = vtanh.f32 %v10980_v28  ;;  %v10981_v37 = vadd.f32 %v2036_v34, %v13652_v20  ;;  %v11534_v34 = vld [vmem:[#allocation8 + $0x18] sm:$0xff]  }
 0x3c2   : > { %v12585_v33 = vpop.eup %12584  ;;  %2322 = vmatpush1.bf16.msra.mxu1 %v13687_v17  ;;  %v10997_v38 = vadd.f32 %v2182_v35, %v13655_v21  ;;  %v2038_v39 = vpop.f32.mrb[29].mxu0  ;;  %12608 = vtanh.f32 %v10996_v31  ;;  %v11531_v31 = vld [vmem:[#allocation8 + $0x8] ss:$0 sps:$4 sm:$0xff]   ;;  %v11535_v35 = vld [vmem:[#allocation8 + $0x20] ss:$0 sps:$4 sm:$0xff]  }
 0x3c3   : > { %v12587_v36 = vpop.eup %12586  ;;  %v2184_v40 = vpop.f32.mrb[29].mxu1  ;;  %v10982_v42 = vadd.f32 %v2038_v39, %v13658_v22  ;;  %12610 = vtanh.f32 %v10981_v37  ;;  %v11565_v37 = vld [vmem:[#allocation10 + $0x8] ss:$12 sps:$4 sm:$0xff]   ;;  %v11569_v39 = vld [vmem:[#allocation10 + $0xe0] ss:$12 sps:$4 sm:$0xff]  }
 0x3c4   : > { %v12589_v41 = vpop.eup %12588  ;;  %v10998_v43 = vadd.f32 %v2184_v40, %v13662_v23  ;;  %v2040_v44 = vpop.f32.mrb[30].mxu0  ;;  %v13704_v46 = vpack.c.bf16 %v12587_v36, %v12579_v27  ;;  %12612 = vtanh.f32 %v10997_v38  ;;  %v11542_v36 = vld [vmem:[#allocation10 + $0x1c] ss:$12 sps:$4 sm:$0xff]   ;;  %v11540_v38 = vld [vmem:[#allocation10 + $0x18] ss:$12 sps:$4 sm:$0xff]  }
 0x3c5   : > { %v2186_v45 = vpop.f32.mrb[30].mxu1  ;;  %v12591_v47 = vpop.eup %12590  ;;  %v10983_v48 = vadd.f32 %v2040_v44, %v13652_v20  ;;  %v13707_v51 = vpack.c.bf16 %v12589_v41, %v12581_v30  ;;  %12614 = vtanh.f32 %v10982_v42  ;;  %v11530_v30 = vld [vmem:[#allocation8] sm:$0xff]   ;;  %v11570_v41 = vld [vmem:[#allocation10 + $0x20] ss:$12 sps:$4 sm:$0xff]   ;;  %v11581_v42 = vld [vmem:[#allocation8 + $0x2c] ss:$0 sps:$4 sm:$0xff]  }
 0x3c6   : > { %v2042_v49 = vpop.f32.mrb[31].mxu0  ;;  %v2188_v50 = vpop.f32.mrb[31].mxu1  ;;  %v10999_v53 = vadd.f32 %v2186_v45, %v13655_v21  ;;  %v13710_v54 = vpack.c.bf16 %v12591_v47, %v12583_v32  ;;  %12616 = vtanh.f32 %v10998_v43  ;;  %v11532_v32 = vld [vmem:[#allocation8 + $0xc] sm:$0xff]   ;;  %v11574_v44 = vld [vmem:[#allocation10 + $0xf8] ss:$12 sps:$4 sm:$0xff]  }
 0x3c7   : > { %v12593_v52 = vpop.eup %12592  ;;  %v10984_v56 = vadd.f32 %v2042_v49, %v13658_v22  ;;  %v11000_v20 = vadd.f32 %v2188_v50, %v13662_v23  ;;  %12618 = vtanh.f32 %v10983_v48  ;;  %v11545_v40 = vld [vmem:[#allocation10 + $0x34] ss:$12 sps:$4 sm:$0xff]   ;;  %v11543_v43 = vld [vmem:[#allocation10 + $0x30] ss:$12 sps:$4 sm:$0xff]   ;;  %v11548_v45 = vld [vmem:[#allocation10 + $0x4c] ss:$12 sps:$4 sm:$0xff]  }
 0x3c8   : > { %v12595_v55 = vpop.eup %12594  ;;  %v13713_v57 = vpack.c.bf16 %v12593_v52, %v12585_v33  ;;  %2272 = vmatprep.subr.bf16.mxu0 %v13710_v54  ;;  %12620 = vtanh.f32 %v10999_v53  ;;  %v11533_v33 = vld [vmem:[#allocation8 + $0x14] ss:$0 sps:$4 sm:$0xff]   ;;  %v11546_v47 = vld [vmem:[#allocation10 + $0x48] ss:$12 sps:$4 sm:$0xff]   ;;  %v11579_v48 = vld [vmem:[#allocation10 + $0x110] ss:$12 sps:$4 sm:$0xff]  }
 0x3c9   : > { %v12597_v58 = vpop.eup %12596  ;;  %2273 = vmatpush1.bf16.msra.mxu0 %v13704_v46  ;;  %12622 = vtanh.f32 %v10984_v56  ;;  %v11551_v49 = vld [vmem:[#allocation10 + $0x64] ss:$12 sps:$4 sm:$0xff]   ;;  %v11585_v52 = vld [vmem:[#allocation10 + $0x128] ss:$12 sps:$4 sm:$0xff]   ;;  %v11590_v56 = vld [vmem:[#allocation10 + $0x140] ss:$12 sps:$4 sm:$0xff]  }
 0x3ca   : > { %v12599_v59 = vpop.eup %12598  ;;  %2323 = vmatprep.subr.bf16.mxu1 %v13713_v57  ;;  %12624 = vtanh.f32 %v11000_v20  ;;  %v11580_v50 = vld [vmem:[#allocation10 + $0x50] ss:$12 sps:$4 sm:$0xff]  }
 0x3cb   : > { %v12601_v21 = vpop.eup %12600  ;;  %2324 = vmatpush1.bf16.msra.mxu1 %v13707_v51  ;;  %v11554_v53 = vld [vmem:[#allocation10 + $0x7c] ss:$12 sps:$4 sm:$0xff]  }
 0x3cc   : > { %v12603_v60 = vpop.eup %12602  ;;  %v11555_v20 = vld [vmem:[#allocation10 + $0x90] ss:$12 sps:$4 sm:$0xff]  }
 0x3cd   : > { %v12605_v22 = vpop.eup %12604  ;;  %v13720_v61 = vpack.c.bf16 %v12603_v60, %v12595_v55  ;;  %v11552_v55 = vld [vmem:[#allocation10 + $0x78] ss:$12 sps:$4 sm:$0xff]  }
 0x3ce   : > { %v12607_v62 = vpop.eup %12606  ;;  %v13722_v23 = vpack.c.bf16 %v12605_v22, %v12597_v58  ;;  %v11591_v58 = vld [vmem:[#allocation10 + $0x80] ss:$12 sps:$4 sm:$0xff]   ;;  %v11596_v60 = vld [vmem:[#allocation10 + $0x98] ss:$12 sps:$4 sm:$0xff]   ;;  %v11558_v22 = vld [vmem:[#allocation10 + $0xa8] ss:$12 sps:$4 sm:$0xff]  }
 0x3cf   : > { %v12609_v63 = vpop.eup %12608  ;;  %v13724_v0 = vpack.c.bf16 %v12607_v62, %v12599_v59  ;;  %v11595_v59 = vld [vmem:[#allocation10 + $0x158] ss:$12 sps:$4 sm:$0xff]   ;;  %v11561_v62 = vld [vmem:[#allocation10 + $0xc0] ss:$12 sps:$4 sm:$0xff]  }
 0x3d0   : > { %v12611_v1 = vpop.eup %12610  ;;  %v13726_v2 = vpack.c.bf16 %v12609_v63, %v12601_v21  ;;  %v11560_v21 = vld [vmem:[#allocation10 + $0xac] ss:$12 sps:$4 sm:$0xff]  }
 0x3d1   : > { %v12613_v3 = vpop.eup %12612  ;;  %2274 = vmatprep.subr.bf16.mxu0 %v13724_v0  ;;  %v11566_v63 = vld [vmem:[#allocation10 + $0xd8] ss:$12 sps:$4 sm:$0xff]  }
 0x3d2   : > { %v12615_v4 = vpop.eup %12614  ;;  %2325 = vmatprep.subr.bf16.mxu1 %v13726_v2  ;;  %2275 = vmatpush1.bf16.msra.mxu0 %v13720_v61 }
 0x3d3   : > { %v12617_v5 = vpop.eup %12616  ;;  %2326 = vmatpush1.bf16.msra.mxu1 %v13722_v23 }
 0x3d4   : > { %v12619_v6 = vpop.eup %12618 }
 0x3d5   : > { %v12621_v7 = vpop.eup %12620  ;;  %v2235_v9 = vpack.c.bf16 %v12619_v6, %v12611_v1  ;;  %v11600_v1 = vld [vmem:[#allocation10 + $0x170] ss:$12 sps:$4 sm:$0xff]   ;;  %v11576_v6 = vld [vmem:[#allocation10 + $0x108] ss:$12 sps:$4 sm:$0xff]  }
 0x3d6   : > { %v12623_v10 = vpop.eup %12622  ;;  %v2237_v11 = vpack.c.bf16 %v12621_v7, %v12613_v3  ;;  %v11601_v3 = vld [vmem:[#allocation10 + $0xb0] ss:$12 sps:$4 sm:$0xff]  }
 0x3d7   : > { %v12625_v13 = vpop.eup %12624  ;;  %v13732_v24 = vpack.c.bf16 %v12623_v10, %v12615_v4  ;;  %v13735_v25 = vsel %vm2257_vm0, %v2235_v9, 0  ;;  %v11578_v4 = vld [vmem:[#allocation10 + $0x10c] ss:$12 sps:$4 sm:$0xff]   ;;  %v11584_v7 = vld [vmem:[#allocation10 + $0x124] ss:$12 sps:$4 sm:$0xff]  }
 0x3d8   : > { %v13737_v27 = vpack.c.bf16 %v12625_v13, %v12617_v5  ;;  %v13740_v28 = vsel %vm2257_vm0, %v2237_v11, 0  ;;  %v11605_v5 = vld [vmem:[#allocation10 + $0x248] ss:$12 sps:$4 sm:$0xff]   ;;  %v11582_v9 = vld [vmem:[#allocation10 + $0x120] ss:$12 sps:$4 sm:$0xff]  }
 0x3d9   : > { %9726 = vmatprep.subr.msk.bf16.mxu0 %vm2257_vm0, %v13732_v24  ;;  %v11589_v10 = vld [vmem:[#allocation10 + $0x13c] ss:$12 sps:$4 sm:$0xff]   ;;  %v11587_v11 = vld [vmem:[#allocation10 + $0x138] ss:$12 sps:$4 sm:$0xff]   ;;  %v11594_v13 = vld [vmem:[#allocation10 + $0x154] ss:$12 sps:$4 sm:$0xff]  }
 0x3da   : > { %9729 = vmatprep.subr.msk.bf16.mxu1 %vm2257_vm0, %v13737_v27  ;;  %2277 = vmatpush1.bf16.msra.mxu0 %v13735_v25 }
 0x3db   : > { %2328 = vmatpush1.bf16.msra.mxu1 %v13740_v28  ;;  %2398 = vmatprep.subr.bf16.mxu0 %v13690_v26 }
 0x3dc   : > { %2449 = vmatprep.subr.bf16.mxu1 %v13693_v29 }
 0x3dd   : > { %9727 = vmatmul.mubr.msk.bf16.vlgmr.msra.gmra.mrb[32].mxu0 %vm2250_vm1, %v11530_v30 }
 0x3de   : > { %9730 = vmatmul.mubr.msk.bf16.vlgmr.msra.gmra.mrb[32].mxu1 %vm2250_vm1, %v11530_v30  ;;  %2399 = vmatpush1.bf16.msra.mxu0 %v13684_v8 }
 0x3df   : > { %2450 = vmatpush1.bf16.msra.mxu1 %v13687_v17  ;;  %2400 = vmatprep.subr.bf16.mxu0 %v13710_v54 }
 0x3e0   : > { %2451 = vmatprep.subr.bf16.mxu1 %v13713_v57  ;;  %2312 = vmatprep.mubr.bf16.mxu0 %v13160_v12 }
 0x3e1   : > { %2363 = vmatprep.mubr.bf16.mxu1 %v13160_v12 }
 0x3e2   : > { %2401 = vmatpush1.bf16.msra.mxu0 %v13704_v46 }
 0x3e3   : > { %2452 = vmatpush1.bf16.msra.mxu1 %v13707_v51  ;;  %2402 = vmatprep.subr.bf16.mxu0 %v13724_v0 }
 0x3e4   : > { %2453 = vmatprep.subr.bf16.mxu1 %v13726_v2 }
 0x3e5   : > { %9728 = vmatmul.mubr.msk.bf16.gmra.mrb[36].mxu0 %vm2250_vm1, %v11531_v31 }
 0x3e6   : > { %9731 = vmatmul.mubr.msk.bf16.gmra.mrb[36].mxu1 %vm2250_vm1, %v11531_v31  ;;  %2403 = vmatpush1.bf16.msra.mxu0 %v13720_v61 }
 0x3e7   : > { %2454 = vmatpush1.bf16.msra.mxu1 %v13722_v23  ;;  %9734 = vmatprep.subr.msk.bf16.mxu0 %vm2257_vm0, %v13732_v24 }
 0x3e8   : > { %9737 = vmatprep.subr.msk.bf16.mxu1 %vm2257_vm0, %v13737_v27  ;;  %2430 = vmatprep.mubr.bf16.mxu0 %v13160_v12 }
 0x3e9   : > { %2481 = vmatprep.mubr.bf16.mxu1 %v13160_v12 }
 0x3ea   : > { %2405 = vmatpush1.bf16.msra.mxu0 %v13735_v25 }
 0x3eb   : > { %2456 = vmatpush1.bf16.msra.mxu1 %v13740_v28  ;;  %2526 = vmatprep.subr.bf16.mxu0 %v13690_v26 }
 0x3ec   : > { %2577 = vmatprep.subr.bf16.mxu1 %v13693_v29 }
 0x3ed   : > { %9735 = vmatmul.mubr.msk.bf16.vlgmr.msra.gmra.mrb[40].mxu0 %vm2250_vm1, %v11532_v32 }
 0x3ee   : > { %9738 = vmatmul.mubr.msk.bf16.vlgmr.msra.gmra.mrb[40].mxu1 %vm2250_vm1, %v11532_v32  ;;  %2527 = vmatpush1.bf16.msra.mxu0 %v13684_v8 }
 0x3ef   : > { %2578 = vmatpush1.bf16.msra.mxu1 %v13687_v17  ;;  %2528 = vmatprep.subr.bf16.mxu0 %v13710_v54 }
 0x3f0   : > { %2579 = vmatprep.subr.bf16.mxu1 %v13713_v57  ;;  %2440 = vmatprep.mubr.bf16.mxu0 %v13160_v12 }
 0x3f1   : > { %2491 = vmatprep.mubr.bf16.mxu1 %v13160_v12 }
 0x3f2   : > { %2529 = vmatpush1.bf16.msra.mxu0 %v13704_v46 }
 0x3f3   : > { %2580 = vmatpush1.bf16.msra.mxu1 %v13707_v51  ;;  %2530 = vmatprep.subr.bf16.mxu0 %v13724_v0 }
 0x3f4   : > { %2581 = vmatprep.subr.bf16.mxu1 %v13726_v2 }
 0x3f5   : > { %9736 = vmatmul.mubr.msk.bf16.gmra.mrb[44].mxu0 %vm2250_vm1, %v11533_v33 }
 0x3f6   : > { %9739 = vmatmul.mubr.msk.bf16.gmra.mrb[44].mxu1 %vm2250_vm1, %v11533_v33  ;;  %2531 = vmatpush1.bf16.msra.mxu0 %v13720_v61 }
 0x3f7   : > { %2582 = vmatpush1.bf16.msra.mxu1 %v13722_v23  ;;  %9742 = vmatprep.subr.msk.bf16.mxu0 %vm2257_vm0, %v13732_v24 }
 0x3f8   : > { %9745 = vmatprep.subr.msk.bf16.mxu1 %vm2257_vm0, %v13737_v27  ;;  %2558 = vmatprep.mubr.bf16.mxu0 %v13160_v12 }
 0x3f9   : > { %2609 = vmatprep.mubr.bf16.mxu1 %v13160_v12 }
 0x3fa   : > { %2533 = vmatpush1.bf16.msra.mxu0 %v13735_v25 }
 0x3fb   : > { %2584 = vmatpush1.bf16.msra.mxu1 %v13740_v28  ;;  %2654 = vmatprep.subr.bf16.mxu0 %v13690_v26  ;;  %v11536_v26 = vld [vmem:[#allocation8 + $0x24] sm:$0xff]  }
 0x3fc   : > { %2705 = vmatprep.subr.bf16.mxu1 %v13693_v29  ;;  %v11537_v29 = vld [vmem:[#allocation10] ss:$12 sps:$4 sm:$0xff]  }
 0x3fd   : > { %9743 = vmatmul.mubr.msk.bf16.vlgmr.msra.gmra.mrb[48].mxu0 %vm2250_vm1, %v11534_v34 }
 0x3fe   : > { %9746 = vmatmul.mubr.msk.bf16.vlgmr.msra.gmra.mrb[48].mxu1 %vm2250_vm1, %v11534_v34  ;;  %2655 = vmatpush1.bf16.msra.mxu0 %v13684_v8  ;;  %v11539_v8 = vld [vmem:[#allocation10 + $0x4] ss:$12 sps:$4 sm:$0xff]  }
 0x3ff   : > { %2706 = vmatpush1.bf16.msra.mxu1 %v13687_v17  ;;  %2656 = vmatprep.subr.bf16.mxu0 %v13710_v54  ;;  %v11564_v17 = vld [vmem:[#allocation10 + $0xc8] ss:$12 sps:$4 sm:$0xff]  }
 0x400   : > { %2707 = vmatprep.subr.bf16.mxu1 %v13713_v57  ;;  %2568 = vmatprep.mubr.bf16.mxu0 %v13160_v12  ;;  %v11586_v54 = vld [vmem:[#allocation10 + $0x68] ss:$12 sps:$4 sm:$0xff]  }
 0x401   : > { %2619 = vmatprep.mubr.bf16.mxu1 %v13160_v12  ;;  %v11557_v57 = vld [vmem:[#allocation10 + $0x94] ss:$12 sps:$4 sm:$0xff]  }
 0x402   : > { %2657 = vmatpush1.bf16.msra.mxu0 %v13704_v46  ;;  %v11575_v46 = vld [vmem:[#allocation10 + $0x38] ss:$12 sps:$4 sm:$0xff]  }
 0x403   : > { %2708 = vmatpush1.bf16.msra.mxu1 %v13707_v51  ;;  %2658 = vmatprep.subr.bf16.mxu0 %v13724_v0  ;;  %v11549_v51 = vld [vmem:[#allocation10 + $0x60] ss:$12 sps:$4 sm:$0xff]  }
 0x404   : > { %2709 = vmatprep.subr.bf16.mxu1 %v13726_v2  ;;  %v11573_v0 = vld [vmem:[#allocation10 + $0xf4] ss:$12 sps:$4 sm:$0xff]   ;;  %v11571_v2 = vld [vmem:[#allocation10 + $0xf0] ss:$12 sps:$4 sm:$0xff]  }
 0x405   : > { %9744 = vmatmul.mubr.msk.bf16.gmra.mrb[52].mxu0 %vm2250_vm1, %v11535_v35 }
 0x406   : > { %2659 = vmatpush1.bf16.msra.mxu0 %v13720_v61  ;;  %2686 = vmatprep.mubr.bf16.mxu0 %v13160_v12  ;;  %v11563_v61 = vld [vmem:[#allocation10 + $0xc4] ss:$12 sps:$4 sm:$0xff]  }
 0x407   : > { %2710 = vmatpush1.bf16.msra.mxu1 %v13722_v23  ;;  %9750 = vmatprep.subr.msk.bf16.mxu0 %vm2257_vm0, %v13732_v24  ;;  %v11568_v23 = vld [vmem:[#allocation10 + $0xdc] ss:$12 sps:$4 sm:$0xff]  }
 0x408   : > { %9753 = vmatprep.subr.msk.bf16.mxu1 %vm2257_vm0, %v13737_v27  ;;  %9747 = vmatmul.mubr.msk.bf16.gmra.mrb[52].mxu1 %vm2250_vm1, %v11535_v35  ;;  %v11592_v24 = vld [vmem:[#allocation10 + $0x150] ss:$12 sps:$4 sm:$0xff]   ;;  %v11597_v27 = vld [vmem:[#allocation10 + $0x168] ss:$12 sps:$4 sm:$0xff]  }
 0x409   : > { %2737 = vmatprep.mubr.bf16.mxu1 %v13160_v12 }
 0x40a   : > { %2661 = vmatpush1.bf16.msra.mxu0 %v13735_v25  ;;  %v11599_v25 = vld [vmem:[#allocation10 + $0x16c] ss:$12 sps:$4 sm:$0xff]  }
 0x40b   : > { %2712 = vmatpush1.bf16.msra.mxu1 %v13740_v28  ;;  %5341 = vmatprep.subr.bf16.mxu0 %v11539_v8  ;;  %v11604_v28 = vld [vmem:[#allocation10 + $0x184] ss:$12 sps:$4 sm:$0xff]  }
 0x40c   : > { %10561 = vmatprep.subr.bf16.mxu1 %v11564_v17 }
 0x40d   : > { %9751 = vmatmul.mubr.msk.bf16.vlgmr.msra.gmra.mrb[56].mxu0 %vm2250_vm1, %v11536_v26 }
 0x40e   : > { %5342 = vmatpush1.bf16.msra.mxu0 %v11537_v29  ;;  %2696 = vmatprep.mubr.bf16.mxu0 %v13160_v12  ;;  %v11602_v29 = vld [vmem:[#allocation10 + $0x180] ss:$12 sps:$4 sm:$0xff]  }
 0x40f   : > { %5343 = vmatprep.subr.bf16.mxu0 %v11542_v36  ;;  %v11606_v36 = vld [vmem:[#allocation10 + $0x188] ss:$12 sps:$4 sm:$0xff]  }
 0x410   : > { %9754 = vmatmul.mubr.msk.bf16.vlgmr.msra.gmra.mrb[56].mxu1 %vm2250_vm1, %v11536_v26 }
 0x411   : > { %10562 = vmatpush3.bf16.msra.mxu1 %v11565_v37  ;;  %2747 = vmatprep.mubr.bf16.mxu1 %v13160_v12 }
 0x412   : > { %5344 = vmatpush1.bf16.msra.mxu0 %v11540_v38  ;;  %10563 = vmatprep.subr.bf16.mxu1 %v11569_v39  ;;  %v11609_v39 = vld [vmem:[#allocation10 + $0x19c] ss:$12 sps:$4 sm:$0xff]  }
 0x413   : > { %5345 = vmatprep.subr.bf16.mxu0 %v11545_v40  ;;  %v11610_v40 = vld [vmem:[#allocation10 + $0x260] ss:$12 sps:$4 sm:$0xff]  }
 0x415   : > { %10564 = vmatpush3.bf16.msra.mxu1 %v11570_v41  ;;  %9752 = vmatmul.mubr.msk.bf16.gmra.mrb[60].mxu0 %vm2250_vm1, %v11581_v42 }
 0x416   : > { %5346 = vmatpush1.bf16.msra.mxu0 %v11543_v43  ;;  %10565 = vmatprep.subr.bf16.mxu1 %v11574_v44  ;;  %v11611_v43 = vld [vmem:[#allocation10 + $0x1a0] ss:$12 sps:$4 sm:$0xff]  }
 0x417   : > { %5347 = vmatprep.subr.bf16.mxu0 %v11548_v45  ;;  %v11614_v45 = vld [vmem:[#allocation10 + $0x1b4] ss:$12 sps:$4 sm:$0xff]  }
 0x418   : > { %9755 = vmatmul.mubr.msk.bf16.gmra.mrb[60].mxu1 %vm2250_vm1, %v11581_v42  ;;  %v11607_v42 = vld [vmem:[#allocation10 + $0x198] ss:$12 sps:$4 sm:$0xff]  }
 0x419   : > { %10566 = vmatpush3.bf16.msra.mxu1 %v11575_v46  ;;  %v11615_v46 = vld [vmem:[#allocation10 + $0x278] ss:$12 sps:$4 sm:$0xff]  }
 0x41a   : > { %5348 = vmatpush1.bf16.msra.mxu0 %v11546_v47  ;;  %10567 = vmatprep.subr.bf16.mxu1 %v11579_v48 }
 0x41b   : > { %5349 = vmatprep.subr.bf16.mxu0 %v11551_v49 }
 0x41d   : > { %10568 = vmatpush3.bf16.msra.mxu1 %v11580_v50 }
 0x41e   : > { %5350 = vmatpush1.bf16.msra.mxu0 %v11549_v51  ;;  %10569 = vmatprep.subr.bf16.mxu1 %v11585_v52 }
 0x41f   : > { %5351 = vmatprep.subr.bf16.mxu0 %v11554_v53 }
 0x421   : > { %10570 = vmatpush3.bf16.msra.mxu1 %v11586_v54 }
 0x422   : > { %5352 = vmatpush1.bf16.msra.mxu0 %v11552_v55  ;;  %10571 = vmatprep.subr.bf16.mxu1 %v11590_v56  ;;  %v11612_v55 = vld [vmem:[#allocation10 + $0x1b0] ss:$12 sps:$4 sm:$0xff]   ;;  %v11616_v56 = vld [vmem:[#allocation10 + $0x1b8] ss:$12 sps:$4 sm:$0xff]  }
 0x423   : > { %5353 = vmatprep.subr.bf16.mxu0 %v11557_v57 }
 0x425   : > { %10572 = vmatpush3.bf16.msra.mxu1 %v11591_v58  ;;  %v11619_v58 = vld [vmem:[#allocation10 + $0x1cc] ss:$12 sps:$4 sm:$0xff]  }
 0x426   : > { %5354 = vmatpush1.bf16.msra.mxu0 %v11555_v20  ;;  %10573 = vmatprep.subr.bf16.mxu1 %v11595_v59  ;;  %v11620_v20 = vld [vmem:[#allocation10 + $0x290] ss:$12 sps:$4 sm:$0xff]   ;;  %v11617_v59 = vld [vmem:[#allocation10 + $0x1c8] ss:$12 sps:$4 sm:$0xff]  }
 0x427   : > { %5355 = vmatprep.subr.bf16.mxu0 %v11560_v21  ;;  %v11621_v21 = vld [vmem:[#allocation10 + $0x1d0] ss:$12 sps:$4 sm:$0xff]  }
 0x429   : > { %10574 = vmatpush3.bf16.msra.mxu1 %v11596_v60 }
 0x42a   : > { %5356 = vmatpush1.bf16.msra.mxu0 %v11558_v22  ;;  %10575 = vmatprep.subr.bf16.mxu1 %v11600_v1  ;;  %v11624_v22 = vld [vmem:[#allocation10 + $0x1e4] ss:$12 sps:$4 sm:$0xff]  }
 0x42b   : > { %5357 = vmatprep.subr.bf16.mxu0 %v11563_v61  ;;  %v11625_v61 = vld [vmem:[#allocation10 + $0x2a8] ss:$12 sps:$4 sm:$0xff]  }
 0x42d   : > { %10576 = vmatpush3.bf16.msra.mxu1 %v11601_v3 }
 0x42e   : > { %5358 = vmatpush1.bf16.msra.mxu0 %v11561_v62  ;;  %10589 = vmatprep.subr.bf16.mxu1 %v11605_v5  ;;  %v11626_v5 = vld [vmem:[#allocation10 + $0x1e8] ss:$12 sps:$4 sm:$0xff]  }
 0x42f   : > { %5359 = vmatprep.subr.bf16.mxu0 %v11568_v23 }
 0x432   : > { %5360 = vmatpush1.bf16.msra.mxu0 %v11566_v63 }
 0x433   : > { %5361 = vmatprep.subr.bf16.mxu0 %v11573_v0 }
 0x436   : > { %5362 = vmatpush1.bf16.msra.mxu0 %v11571_v2 }
 0x437   : > { %5363 = vmatprep.subr.bf16.mxu0 %v11578_v4  ;;  %v11622_v4 = vld [vmem:[#allocation10 + $0x1e0] ss:$12 sps:$4 sm:$0xff]  }
 0x43a   : > { %5364 = vmatpush1.bf16.msra.mxu0 %v11576_v6 }
 0x43b   : > { %5365 = vmatprep.subr.bf16.mxu0 %v11584_v7 }
 0x43e   : > { %5366 = vmatpush1.bf16.msra.mxu0 %v11582_v9 }
 0x43f   : > { %5367 = vmatprep.subr.bf16.mxu0 %v11589_v10  ;;  %v11629_v10 = vld [vmem:[#allocation10 + $0x1fc] ss:$12 sps:$4 sm:$0xff]  }
 0x442   : > { %5368 = vmatpush1.bf16.msra.mxu0 %v11587_v11  ;;  %v11630_v11 = vld [vmem:[#allocation10 + $0x2c0] ss:$12 sps:$4 sm:$0xff]  }
 0x443   : > { %5369 = vmatprep.subr.bf16.mxu0 %v11594_v13 }
 0x446   : > { %5370 = vmatpush1.bf16.msra.mxu0 %v11592_v24  ;;  %v11627_v24 = vld [vmem:[#allocation10 + $0x1f8] ss:$12 sps:$4 sm:$0xff]  }
 0x447   : > { %5371 = vmatprep.subr.bf16.mxu0 %v11599_v25  ;;  %v11631_v25 = vld [vmem:[#allocation10 + $0x200] ss:$12 sps:$4 sm:$0xff]  }
 0x44a   : > { %5372 = vmatpush1.bf16.msra.mxu0 %v11597_v27 }
 0x44b   : > { %5392 = vmatprep.subr.bf16.mxu0 %v11604_v28  ;;  %v11634_v28 = vld [vmem:[#allocation10 + $0x214] ss:$12 sps:$4 sm:$0xff]  }
 0x4b0   : > { %v2304_v30 = vpop.f32.mrb[32].mxu0 }
 0x4b1   : > { %v2306_v31 = vpop.f32.mrb[33].mxu0  ;;  %v2355_v32 = vpop.f32.mrb[32].mxu1 }
 0x4b2   : > { %v2308_v33 = vpop.f32.mrb[34].mxu0  ;;  %v2357_v34 = vpop.f32.mrb[33].mxu1 }
 0x4b3   : > { %v2372_v35 = vpack.c.bf16 %v2308_v33, %v2304_v30  ;;  %v2310_v8 = vpop.f32.mrb[35].mxu0  ;;  %v2359_v17 = vpop.f32.mrb[34].mxu1  ;;  %v11635_v30 = vld [vmem:[#allocation10 + $0x2d8] ss:$12 sps:$4 sm:$0xff]  }
 0x4b4   : > { %v2373_v26 = vpack.c.bf16 %v2310_v8, %v2306_v31  ;;  %v13832_v37 = vpack.c.bf16 %v2359_v17, %v2355_v32  ;;  %v2361_v38 = vpop.f32.mrb[35].mxu1  ;;  %v11632_v17 = vld [vmem:[#allocation10 + $0x210] ss:$12 sps:$4 sm:$0xff]  }
 0x4b5   : > { %v2375_v41 = vpack.c.bf16 %v2361_v38, %v2357_v34  ;;  %v11640_v38 = vld [vmem:[#allocation10 + $0x2f0] ss:$12 sps:$4 sm:$0xff]  }
 0x4b6   : > { %5373 = vmatprep.mubr.bf16.mxu0 %v2373_v26  ;;  %5781 = vmatprep.mubr.bf16.mxu1 %v2373_v26  ;;  %v11636_v26 = vld [vmem:[#allocation10 + $0x218] ss:$12 sps:$4 sm:$0xff]  }
 0x4b7   : > { %5374 = vmatmul.mubr.bf16.vlgmr.msra.gmra.mrb[64].mxu0 %v2372_v35  ;;  %5782 = vmatmul.mubr.bf16.vlgmr.msra.gmra.mrb[64].mxu1 %v2372_v35 }
 0x4b8   : > { %5393 = vmatpush1.bf16.msra.mxu0 %v11602_v29  ;;  %10590 = vmatpush3.bf16.msra.mxu1 %v11606_v36  ;;  %v2314_v44 = vpop.f32.mrb[36].mxu0  ;;  %v11639_v36 = vld [vmem:[#allocation10 + $0x22c] ss:$12 sps:$4 sm:$0xff]  }
 0x4b9   : > { %5394 = vmatprep.subr.bf16.mxu0 %v11609_v39  ;;  %10591 = vmatprep.subr.bf16.mxu1 %v11610_v40  ;;  %v2316_v47 = vpop.f32.mrb[37].mxu0  ;;  %v13834_v48 = vpop.f32.mrb[36].mxu1  ;;  %v2376_v52 = vpack.c.bf16 %v2314_v44, %v2314_v44  ;;  %v11637_v39 = vld [vmem:[#allocation10 + $0x228] ss:$12 sps:$4 sm:$0xff]   ;;  %v11641_v40 = vld [vmem:[#allocation10 + $0x230] ss:$12 sps:$4 sm:$0xff]  }
 0x4ba   : > { %v2377_v49 = vpack.c.bf16 %v2316_v47, %v2316_v47  ;;  %v2318_v50 = vpop.f32.mrb[38].mxu0  ;;  %v13836_v51 = vpop.f32.mrb[37].mxu1 }
 0x4bb   : > { %v2319_v53 = vpop.f32.mrb[39].mxu0  ;;  %v2369_v54 = vpop.f32.mrb[38].mxu1 }
 0x4bc   : > { %5395 = vmatpush1.bf16.msra.mxu0 %v11607_v42  ;;  %10592 = vmatpush3.bf16.msra.mxu1 %v11611_v43  ;;  %v2370_v57 = vpop.f32.mrb[39].mxu1  ;;  %v11644_v42 = vld [vmem:[#allocation10 + $0x244] ss:$12 sps:$4 sm:$0xff]   ;;  %v11645_v43 = vld [vmem:[#allocation10 + $0x3c8] ss:$12 sps:$4 sm:$0xff]  }
 0x4bd   : > { %5396 = vmatprep.subr.bf16.mxu0 %v11614_v45  ;;  %10593 = vmatprep.subr.bf16.mxu1 %v11615_v46  ;;  %v11642_v53 = vld [vmem:[#allocation10 + $0x240] ss:$12 sps:$4 sm:$0xff]   ;;  %v11646_v54 = vld [vmem:[#allocation10 + $0x308] ss:$12 sps:$4 sm:$0xff]  }
 0x4be   : > { %5789 = vmatprep.mubr.bf16.mxu1 %v2377_v49  ;;  %5383 = vmatprep.mubr.bf16.mxu0 %v2377_v49 }
 0x4bf   : > { %5790 = vmatmul.mubr.bf16.gmra.mrb[68].mxu1 %v2376_v52  ;;  %5384 = vmatmul.mubr.bf16.gmra.mrb[68].mxu0 %v2376_v52 }
 0x4c0   : > { %5397 = vmatpush1.bf16.msra.mxu0 %v11612_v55  ;;  %10594 = vmatpush3.bf16.msra.mxu1 %v11616_v56  ;;  %v2432_v60 = vpop.f32.mrb[40].mxu0 }
 0x4c1   : > { %5398 = vmatprep.subr.bf16.mxu0 %v11619_v58  ;;  %10595 = vmatprep.subr.bf16.mxu1 %v11620_v20  ;;  %v2434_v62 = vpop.f32.mrb[41].mxu0  ;;  %v2483_v23 = vpop.f32.mrb[40].mxu1  ;;  %v11649_v58 = vld [vmem:[#allocation10 + $0x25c] ss:$12 sps:$4 sm:$0xff]   ;;  %v11650_v20 = vld [vmem:[#allocation10 + $0x3e0] ss:$12 sps:$4 sm:$0xff]  }
 0x4c2   : > { %5829 = vmatprep.mubr.bf16.mxu1 %v2375_v41  ;;  %v2436_v63 = vpop.f32.mrb[42].mxu0  ;;  %5424 = vmatprep.mubr.bf16.mxu0 %v2375_v41  ;;  %v2485_v0 = vpop.f32.mrb[41].mxu1 }
 0x4c3   : > { %v13838_v1 = vpack.c.bf16 %v2436_v63, %v2432_v60  ;;  %v2438_v2 = vpop.f32.mrb[43].mxu0  ;;  %v2487_v3 = vpop.f32.mrb[42].mxu1  ;;  %v11647_v60 = vld [vmem:[#allocation10 + $0x258] ss:$12 sps:$4 sm:$0xff]  }
 0x4c4   : > { %5399 = vmatpush1.bf16.msra.mxu0 %v11617_v59  ;;  %10596 = vmatpush3.bf16.msra.mxu1 %v11621_v21  ;;  %v13840_v6 = vpack.c.bf16 %v2438_v2, %v2434_v62  ;;  %v13842_v7 = vpack.c.bf16 %v2487_v3, %v2483_v23  ;;  %v2489_v9 = vpop.f32.mrb[43].mxu1  ;;  %v13864_v21 = vpack.c.bf16 %v13836_v51, %v13836_v51  ;;  %v11654_v62 = vld [vmem:[#allocation10 + $0x274] ss:$12 sps:$4 sm:$0xff]   ;;  %v11655_v23 = vld [vmem:[#allocation10 + $0x3f8] ss:$12 sps:$4 sm:$0xff]  }
 0x4c5   : > { %5400 = vmatprep.subr.bf16.mxu0 %v11624_v22  ;;  %10597 = vmatprep.subr.bf16.mxu1 %v11625_v61  ;;  %v13844_v13 = vpack.c.bf16 %v2489_v9, %v2485_v0  ;;  %v11651_v22 = vld [vmem:[#allocation10 + $0x320] ss:$12 sps:$4 sm:$0xff]   ;;  %v13874_v51 = vpack.c.bf16 %v13834_v48, %v13834_v48  ;;  %v11657_v48 = vld [vmem:[#allocation10 + $0x288] ss:$12 sps:$4 sm:$0xff]  }
 0x4c8   : > { %5401 = vmatpush1.bf16.msra.mxu0 %v11622_v4  ;;  %10598 = vmatpush3.bf16.msra.mxu1 %v11626_v5  ;;  %v13846_v27 = vpop.f32.mrb[44].mxu0  ;;  %v11652_v4 = vld [vmem:[#allocation10 + $0x270] ss:$12 sps:$4 sm:$0xff]   ;;  %v11656_v5 = vld [vmem:[#allocation10 + $0x338] ss:$12 sps:$4 sm:$0xff]  }
 0x4c9   : > { %5402 = vmatprep.subr.bf16.mxu0 %v11629_v10  ;;  %10599 = vmatprep.subr.bf16.mxu1 %v11630_v11  ;;  %v13848_v31 = vpop.f32.mrb[45].mxu0  ;;  %v13850_v32 = vpop.f32.mrb[44].mxu1  ;;  %v11659_v10 = vld [vmem:[#allocation10 + $0x28c] ss:$12 sps:$4 sm:$0xff]   ;;  %v11660_v11 = vld [vmem:[#allocation10 + $0x410] ss:$12 sps:$4 sm:$0xff]  }
 0x4ca   : > { %v13852_v33 = vpop.f32.mrb[45].mxu1  ;;  %v2446_v34 = vpop.f32.mrb[46].mxu0 }
 0x4cb   : > { %v2447_v35 = vpop.f32.mrb[47].mxu0  ;;  %v2497_v8 = vpop.f32.mrb[46].mxu1  ;;  %v11664_v34 = vld [vmem:[#allocation10 + $0x2a4] ss:$12 sps:$4 sm:$0xff]  }
 0x4cc   : > { %5403 = vmatpush1.bf16.msra.mxu0 %v11627_v24  ;;  %10600 = vmatpush3.bf16.msra.mxu1 %v11631_v25  ;;  %v2498_v29 = vpop.f32.mrb[47].mxu1  ;;  %v11665_v35 = vld [vmem:[#allocation10 + $0x428] ss:$12 sps:$4 sm:$0xff]  }
 0x4cd   : > { %5404 = vmatprep.subr.bf16.mxu0 %v11634_v28  ;;  %10601 = vmatprep.subr.bf16.mxu1 %v11635_v30  ;;  %v11661_v28 = vld [vmem:[#allocation10 + $0x350] ss:$12 sps:$4 sm:$0xff]  }
 0x4d0   : > { %5405 = vmatpush1.bf16.msra.mxu0 %v11632_v17  ;;  %10602 = vmatpush3.bf16.msra.mxu1 %v11636_v26  ;;  %v2560_v41 = vpop.f32.mrb[48].mxu0 }
 0x4d1   : > { %5406 = vmatprep.subr.bf16.mxu0 %v11639_v36  ;;  %10603 = vmatprep.subr.bf16.mxu1 %v11640_v38  ;;  %v2562_v44 = vpop.f32.mrb[49].mxu0  ;;  %v2611_v45 = vpop.f32.mrb[48].mxu1  ;;  %v11662_v36 = vld [vmem:[#allocation10 + $0x2a0] ss:$12 sps:$4 sm:$0xff]   ;;  %v11666_v38 = vld [vmem:[#allocation10 + $0x368] ss:$12 sps:$4 sm:$0xff]  }
 0x4d2   : > { %v2564_v46 = vpop.f32.mrb[50].mxu0  ;;  %v2613_v47 = vpop.f32.mrb[49].mxu1 }
 0x4d3   : > { %v13854_v49 = vpack.c.bf16 %v2564_v46, %v2560_v41  ;;  %v2566_v50 = vpop.f32.mrb[51].mxu0  ;;  %v2615_v52 = vpop.f32.mrb[50].mxu1  ;;  %v11670_v41 = vld [vmem:[#allocation10 + $0x440] ss:$12 sps:$4 sm:$0xff]   ;;  %v11672_v46 = vld [vmem:[#allocation10 + $0x2d0] ss:$12 sps:$4 sm:$0xff]  }
 0x4d4   : > { %5407 = vmatpush1.bf16.msra.mxu0 %v11637_v39  ;;  %10604 = vmatpush3.bf16.msra.mxu1 %v11641_v40  ;;  %v13856_v55 = vpack.c.bf16 %v2566_v50, %v2562_v44  ;;  %v13858_v56 = vpack.c.bf16 %v2615_v52, %v2611_v45  ;;  %v2617_v57 = vpop.f32.mrb[51].mxu1  ;;  %v11669_v40 = vld [vmem:[#allocation10 + $0x2bc] ss:$12 sps:$4 sm:$0xff]   ;;  %v11674_v44 = vld [vmem:[#allocation10 + $0x2d4] ss:$12 sps:$4 sm:$0xff]  }
 0x4d5   : > { %5408 = vmatprep.subr.bf16.mxu0 %v11644_v42  ;;  %10617 = vmatprep.subr.bf16.mxu1 %v11645_v43  ;;  %v13860_v59 = vpack.c.bf16 %v2617_v57, %v2613_v47  ;;  %v11667_v42 = vld [vmem:[#allocation10 + $0x2b8] ss:$12 sps:$4 sm:$0xff]   ;;  %v11671_v43 = vld [vmem:[#allocation10 + $0x380] ss:$12 sps:$4 sm:$0xff]   ;;  %v11680_v52 = vld [vmem:[#allocation10 + $0x470] ss:$12 sps:$4 sm:$0xff]  }
 0x4d6   : > { %v11675_v45 = vld [vmem:[#allocation10 + $0x458] ss:$12 sps:$4 sm:$0xff]  }
 0x4d7   : > { %5830 = vmatmul.mubr.bf16.vlgmr.msra.gmra.mrb[72].mxu1 %v13832_v37  ;;  %v11676_v47 = vld [vmem:[#allocation10 + $0x398] ss:$12 sps:$4 sm:$0xff]  }
 0x4d8   : > { %5409 = vmatpush1.bf16.msra.mxu0 %v11642_v53  ;;  %10618 = vmatpush3.bf16.msra.mxu1 %v11646_v54  ;;  %v13867_v61 = vpop.f32.mrb[52].mxu0  ;;  %v11679_v50 = vld [vmem:[#allocation10 + $0x2ec] ss:$12 sps:$4 sm:$0xff]   ;;  %v11677_v53 = vld [vmem:[#allocation10 + $0x2e8] ss:$12 sps:$4 sm:$0xff]  }
 0x4d9   : > { %5410 = vmatprep.subr.bf16.mxu0 %v11649_v58  ;;  %10619 = vmatprep.subr.bf16.mxu1 %v11650_v20  ;;  %v13869_v63 = vpop.f32.mrb[53].mxu0  ;;  %v11681_v54 = vld [vmem:[#allocation10 + $0x3b0] ss:$12 sps:$4 sm:$0xff]   ;;  %v11685_v58 = vld [vmem:[#allocation10 + $0x548] ss:$12 sps:$4 sm:$0xff]  }
 0x4da   : > { %5837 = vmatprep.mubr.bf16.mxu1 %v13864_v21  ;;  %v2574_v0 = vpop.f32.mrb[54].mxu0  ;;  %v11684_v57 = vld [vmem:[#allocation10 + $0x304] ss:$12 sps:$4 sm:$0xff]   ;;  %v11682_v20 = vld [vmem:[#allocation10 + $0x300] ss:$12 sps:$4 sm:$0xff]  }
 0x4db   : > { %v2575_v2 = vpop.f32.mrb[55].mxu0  ;;  %v13876_v3 = vpop.f32.mrb[52].mxu1  ;;  %v11687_v0 = vld [vmem:[#allocation10 + $0x318] ss:$12 sps:$4 sm:$0xff]  }
 0x4dc   : > { %5411 = vmatpush1.bf16.msra.mxu0 %v11647_v60  ;;  %10620 = vmatpush3.bf16.msra.mxu1 %v11651_v22  ;;  %v13878_v9 = vpop.f32.mrb[53].mxu1  ;;  %v11686_v60 = vld [vmem:[#allocation10 + $0x488] ss:$12 sps:$4 sm:$0xff]   ;;  %v11691_v2 = vld [vmem:[#allocation10 + $0x4a0] ss:$12 sps:$4 sm:$0xff]  }
 0x4dd   : > { %5412 = vmatprep.subr.bf16.mxu0 %v11654_v62  ;;  %10621 = vmatprep.subr.bf16.mxu1 %v11655_v23  ;;  %v2625_v24 = vpop.f32.mrb[54].mxu1  ;;  %v11689_v22 = vld [vmem:[#allocation10 + $0x31c] ss:$12 sps:$4 sm:$0xff]   ;;  %v11690_v62 = vld [vmem:[#allocation10 + $0x560] ss:$12 sps:$4 sm:$0xff]   ;;  %v13888_v23 = vpack.c.bf16 %v13848_v31, %v13848_v31 }
 0x4de   : > { %v2626_v25 = vpop.f32.mrb[55].mxu1  ;;  %v11692_v24 = vld [vmem:[#allocation10 + $0x330] ss:$12 sps:$4 sm:$0xff]  }
 0x4df   : > { %5838 = vmatmul.mubr.bf16.gmra.mrb[76].mxu1 %v13874_v51  ;;  %v11696_v25 = vld [vmem:[#allocation10 + $0x4b8] ss:$12 sps:$4 sm:$0xff]  }
 0x4e0   : > { %5413 = vmatpush1.bf16.msra.mxu0 %v11652_v4  ;;  %10622 = vmatpush3.bf16.msra.mxu1 %v11656_v5  ;;  %v2688_v30 = vpop.f32.mrb[56].mxu0  ;;  %v11694_v4 = vld [vmem:[#allocation10 + $0x334] ss:$12 sps:$4 sm:$0xff]   ;;  %v11695_v5 = vld [vmem:[#allocation10 + $0x578] ss:$12 sps:$4 sm:$0xff]  }
 0x4e1   : > { %5414 = vmatprep.subr.bf16.mxu0 %v11659_v10  ;;  %10623 = vmatprep.subr.bf16.mxu1 %v11660_v11  ;;  %v2690_v8 = vpop.f32.mrb[57].mxu0 }
 0x4e2   : > { %5877 = vmatprep.mubr.bf16.mxu1 %v13840_v6  ;;  %v2692_v17 = vpop.f32.mrb[58].mxu0 }
 0x4e3   : > { %v13882_v26 = vpack.c.bf16 %v2692_v17, %v2688_v30  ;;  %v2694_v29 = vpop.f32.mrb[59].mxu0  ;;  %v11700_v30 = vld [vmem:[#allocation10 + $0x590] ss:$12 sps:$4 sm:$0xff]  }
 0x4e4   : > { %5415 = vmatpush1.bf16.msra.mxu0 %v11657_v48  ;;  %10624 = vmatpush3.bf16.msra.mxu1 %v11661_v28  ;;  %v13884_v39 = vpack.c.bf16 %v2694_v29, %v2690_v8  ;;  %v11699_v28 = vld [vmem:[#allocation10 + $0x34c] ss:$12 sps:$4 sm:$0xff]   ;;  %v2739_v8 = vpop.f32.mrb[56].mxu1 }
 0x4e5   : > { %5416 = vmatprep.subr.bf16.mxu0 %v11664_v34  ;;  %10625 = vmatprep.subr.bf16.mxu1 %v11665_v35  ;;  %v11701_v34 = vld [vmem:[#allocation10 + $0x4d0] ss:$12 sps:$4 sm:$0xff]   ;;  %v11705_v35 = vld [vmem:[#allocation10 + $0x5a8] ss:$12 sps:$4 sm:$0xff]   ;;  %v2741_v17 = vpop.f32.mrb[57].mxu1 }
 0x4e6   : > { %v11702_v29 = vld [vmem:[#allocation10 + $0x360] ss:$12 sps:$4 sm:$0xff]  }
 0x4e8   : > { %5417 = vmatpush1.bf16.msra.mxu0 %v11662_v36  ;;  %10626 = vmatpush3.bf16.msra.mxu1 %v11666_v38  ;;  %v13892_v10 = vpop.f32.mrb[60].mxu0  ;;  %v11706_v36 = vld [vmem:[#allocation10 + $0x4e8] ss:$12 sps:$4 sm:$0xff]   ;;  %v11710_v38 = vld [vmem:[#allocation10 + $0x5c0] ss:$12 sps:$4 sm:$0xff]  }
 0x4e9   : > { %5418 = vmatprep.subr.bf16.mxu0 %v11669_v40  ;;  %10627 = vmatprep.subr.bf16.mxu1 %v11670_v41  ;;  %v13896_v31 = vpop.f32.mrb[61].mxu0  ;;  %v2743_v40 = vpop.f32.mrb[58].mxu1 }
 0x4ea   : > { %v2702_v11 = vpop.f32.mrb[62].mxu0  ;;  %v13906_v41 = vpack.c.bf16 %v2743_v40, %v2739_v8  ;;  %v11737_v8 = vld [vmem:[#allocation10 + $0x408] ss:$12 sps:$4 sm:$0xff]   ;;  %v11750_v40 = vld [vmem:[#allocation10 + $0x740] ss:$12 sps:$4 sm:$0xff]  }
 0x4eb   : > { %v2703_v48 = vpop.f32.mrb[63].mxu0  ;;  %v11730_v11 = vld [vmem:[#allocation10 + $0x6e0] ss:$12 sps:$4 sm:$0xff]  }
 0x4ec   : > { %5419 = vmatpush1.bf16.msra.mxu0 %v11667_v42  ;;  %10628 = vmatpush3.bf16.msra.mxu1 %v11671_v43  ;;  %v2745_v42 = vpop.f32.mrb[59].mxu1  ;;  %v11731_v48 = vld [vmem:[#allocation10 + $0x620] ss:$12 sps:$4 sm:$0xff]  }
 0x4ed   : > { %5420 = vmatprep.subr.bf16.mxu0 %v11674_v44  ;;  %10629 = vmatprep.subr.bf16.mxu1 %v11675_v45  ;;  %v13908_v43 = vpack.c.bf16 %v2745_v42, %v2741_v17  ;;  %v13910_v44 = vpop.f32.mrb[60].mxu1  ;;  %v11711_v45 = vld [vmem:[#allocation10 + $0x500] ss:$12 sps:$4 sm:$0xff]   ;;  %v11741_v17 = vld [vmem:[#allocation10 + $0x650] ss:$12 sps:$4 sm:$0xff]  }
 0x4ee   : > { %v11747_v42 = vld [vmem:[#allocation10 + $0x438] ss:$12 sps:$4 sm:$0xff]  }
 0x4f0   : > { %5421 = vmatpush1.bf16.msra.mxu0 %v11672_v46  ;;  %10630 = vmatpush3.bf16.msra.mxu1 %v11676_v47  ;;  %v13912_v46 = vpop.f32.mrb[61].mxu1  ;;  %v11714_v47 = vld [vmem:[#allocation10 + $0x394] ss:$12 sps:$4 sm:$0xff]  }
 0x4f1   : > { %5422 = vmatprep.subr.bf16.mxu0 %v11679_v50  ;;  %10631 = vmatprep.subr.bf16.mxu1 %v11680_v52  ;;  %v11715_v50 = vld [vmem:[#allocation10 + $0x5d8] ss:$12 sps:$4 sm:$0xff]   ;;  %v2753_v52 = vpop.f32.mrb[62].mxu1 }
 0x4f2   : > { %v11756_v52 = vld [vmem:[#allocation10 + $0x698] ss:$12 sps:$4 sm:$0xff]  }
 0x4f4   : > { %5423 = vmatpush1.bf16.msra.mxu0 %v11677_v53  ;;  %10632 = vmatpush3.bf16.msra.mxu1 %v11681_v54  ;;  %v2754_v53 = vpop.f32.mrb[63].mxu1  ;;  %v11712_v54 = vld [vmem:[#allocation10 + $0x390] ss:$12 sps:$4 sm:$0xff]  }
 0x4f5   : > { %5443 = vmatprep.subr.bf16.mxu0 %v11684_v57  ;;  %10645 = vmatprep.subr.bf16.mxu1 %v11685_v58  ;;  %v11716_v57 = vld [vmem:[#allocation10 + $0x518] ss:$12 sps:$4 sm:$0xff]  }
 0x4f6   : > { %v11719_v58 = vld [vmem:[#allocation10 + $0x3ac] ss:$12 sps:$4 sm:$0xff]  }
 0x4f7   : > { %5425 = vmatmul.mubr.bf16.vlgmr.msra.gmra.mrb[64].mxu0 %v13832_v37  ;;  %5878 = vmatmul.mubr.bf16.vlgmr.msra.gmra.mrb[80].mxu1 %v13838_v1  ;;  %v13900_v37 = vpack.c.bf16 %v13846_v27, %v13846_v27  ;;  %v11704_v27 = vld [vmem:[#allocation10 + $0x364] ss:$12 sps:$4 sm:$0xff]   ;;  %v11759_v53 = vld [vmem:[#allocation10 + $0x46c] ss:$12 sps:$4 sm:$0xff]  }
 0x4f8   : > { %5444 = vmatpush1.bf16.msra.mxu0 %v11682_v20  ;;  %10646 = vmatpush3.bf16.msra.mxu1 %v11686_v60  ;;  %v11720_v20 = vld [vmem:[#allocation10 + $0x5f0] ss:$12 sps:$4 sm:$0xff]   ;;  %v11717_v60 = vld [vmem:[#allocation10 + $0x3a8] ss:$12 sps:$4 sm:$0xff]  }
 0x4f9   : > { %5445 = vmatprep.subr.bf16.mxu0 %v11689_v22  ;;  %10647 = vmatprep.subr.bf16.mxu1 %v11690_v62  ;;  %v11721_v22 = vld [vmem:[#allocation10 + $0x530] ss:$12 sps:$4 sm:$0xff]  }
 0x4fa   : > { %5885 = vmatprep.mubr.bf16.mxu1 %v13888_v23  ;;  %5434 = vmatprep.mubr.bf16.mxu0 %v13864_v21  ;;  %v11697_v21 = vld [vmem:[#allocation10 + $0x348] ss:$12 sps:$4 sm:$0xff]   ;;  %v11724_v62 = vld [vmem:[#allocation10 + $0x3c4] ss:$12 sps:$4 sm:$0xff]  }
 0x4fc   : > { %5446 = vmatpush1.bf16.msra.mxu0 %v11687_v0  ;;  %10648 = vmatpush3.bf16.msra.mxu1 %v11691_v2  ;;  %v11725_v0 = vld [vmem:[#allocation10 + $0x6c8] ss:$12 sps:$4 sm:$0xff]   ;;  %v11722_v2 = vld [vmem:[#allocation10 + $0x3c0] ss:$12 sps:$4 sm:$0xff]  }
 0x4fd   : > { %5447 = vmatprep.subr.bf16.mxu0 %v11694_v4  ;;  %10649 = vmatprep.subr.bf16.mxu1 %v11695_v5  ;;  %v11726_v4 = vld [vmem:[#allocation10 + $0x608] ss:$12 sps:$4 sm:$0xff]  }
 0x4fe   : > { %v11729_v5 = vld [vmem:[#allocation10 + $0x3dc] ss:$12 sps:$4 sm:$0xff]  }
 0x4ff   : > { %5886 = vmatmul.mubr.bf16.gmra.mrb[84].mxu1 %v13900_v37  ;;  %5435 = vmatmul.mubr.bf16.gmra.mrb[68].mxu0 %v13874_v51  ;;  %v11709_v51 = vld [vmem:[#allocation10 + $0x37c] ss:$12 sps:$4 sm:$0xff]  }
 0x500   : > { %5448 = vmatpush1.bf16.msra.mxu0 %v11692_v24  ;;  %10650 = vmatpush3.bf16.msra.mxu1 %v11696_v25  ;;  %v13916_v24 = vpack.c.bf16 %v13852_v33, %v13852_v33  ;;  %v11727_v25 = vld [vmem:[#allocation10 + $0x3d8] ss:$12 sps:$4 sm:$0xff]   ;;  %v11732_v33 = vld [vmem:[#allocation10 + $0x3f0] ss:$12 sps:$4 sm:$0xff]  }
 0x501   : > { %5449 = vmatprep.subr.bf16.mxu0 %v11699_v28  ;;  %10651 = vmatprep.subr.bf16.mxu1 %v11700_v30  ;;  %v11734_v28 = vld [vmem:[#allocation10 + $0x3f4] ss:$12 sps:$4 sm:$0xff]   ;;  %v11735_v30 = vld [vmem:[#allocation10 + $0x6f8] ss:$12 sps:$4 sm:$0xff]  }
 0x502   : > { %5925 = vmatprep.mubr.bf16.mxu1 %v13844_v13  ;;  %5475 = vmatprep.mubr.bf16.mxu0 %v13840_v6  ;;  %v11707_v6 = vld [vmem:[#allocation10 + $0x378] ss:$12 sps:$4 sm:$0xff]  }
 0x504   : > { %5450 = vmatpush1.bf16.msra.mxu0 %v11697_v21  ;;  %10652 = vmatpush3.bf16.msra.mxu1 %v11701_v34  ;;  %v13922_v21 = vpack.c.bf16 %v13850_v32, %v13850_v32  ;;  %v11736_v34 = vld [vmem:[#allocation10 + $0x638] ss:$12 sps:$4 sm:$0xff]   ;;  %v11742_v32 = vld [vmem:[#allocation10 + $0x420] ss:$12 sps:$4 sm:$0xff]  }
 0x505   : > { %5451 = vmatprep.subr.bf16.mxu0 %v11704_v27  ;;  %10653 = vmatprep.subr.bf16.mxu1 %v11705_v35  ;;  %v11739_v27 = vld [vmem:[#allocation10 + $0x40c] ss:$12 sps:$4 sm:$0xff]   ;;  %v11740_v35 = vld [vmem:[#allocation10 + $0x710] ss:$12 sps:$4 sm:$0xff]  }
 0x508   : > { %5452 = vmatpush1.bf16.msra.mxu0 %v11702_v29  ;;  %10654 = vmatpush3.bf16.msra.mxu1 %v11706_v36  ;;  %v11744_v29 = vld [vmem:[#allocation10 + $0x424] ss:$12 sps:$4 sm:$0xff]   ;;  %v11745_v36 = vld [vmem:[#allocation10 + $0x728] ss:$12 sps:$4 sm:$0xff]  }
 0x509   : > { %5453 = vmatprep.subr.bf16.mxu0 %v11709_v51  ;;  %10655 = vmatprep.subr.bf16.mxu1 %v11710_v38  ;;  %v11746_v51 = vld [vmem:[#allocation10 + $0x668] ss:$12 sps:$4 sm:$0xff]  }
 0x50a   : > { %v11749_v38 = vld [vmem:[#allocation10 + $0x43c] ss:$12 sps:$4 sm:$0xff]  }
 0x50c   : > { %5454 = vmatpush1.bf16.msra.mxu0 %v11707_v6  ;;  %10656 = vmatpush3.bf16.msra.mxu1 %v11711_v45  ;;  %v11751_v6 = vld [vmem:[#allocation10 + $0x680] ss:$12 sps:$4 sm:$0xff]  }
 0x50d   : > { %5455 = vmatprep.subr.bf16.mxu0 %v11714_v47  ;;  %10657 = vmatprep.subr.bf16.mxu1 %v11715_v50  ;;  %v11754_v45 = vld [vmem:[#allocation10 + $0x454] ss:$12 sps:$4 sm:$0xff]   ;;  %v11755_v47 = vld [vmem:[#allocation10 + $0x758] ss:$12 sps:$4 sm:$0xff]   ;;  %v11752_v50 = vld [vmem:[#allocation10 + $0x450] ss:$12 sps:$4 sm:$0xff]  }
 0x510   : > { %5456 = vmatpush1.bf16.msra.mxu0 %v11712_v54  ;;  %10658 = vmatpush3.bf16.msra.mxu1 %v11716_v57  ;;  %v11760_v54 = vld [vmem:[#allocation10 + $0x770] ss:$12 sps:$4 sm:$0xff]   ;;  %v11757_v57 = vld [vmem:[#allocation10 + $0x468] ss:$12 sps:$4 sm:$0xff]  }
 0x511   : > { %5457 = vmatprep.subr.bf16.mxu0 %v11719_v58  ;;  %10659 = vmatprep.subr.bf16.mxu1 %v11720_v20  ;;  %v11761_v58 = vld [vmem:[#allocation10 + $0x6b0] ss:$12 sps:$4 sm:$0xff]  }
 0x512   : > { %v11764_v20 = vld [vmem:[#allocation10 + $0x484] ss:$12 sps:$4 sm:$0xff]  }
 0x514   : > { %5458 = vmatpush1.bf16.msra.mxu0 %v11717_v60  ;;  %10660 = vmatpush3.bf16.msra.mxu1 %v11721_v22  ;;  %v11765_v60 = vld [vmem:[#allocation10 + $0x848] ss:$12 sps:$4 sm:$0xff]   ;;  %v11762_v22 = vld [vmem:[#allocation10 + $0x480] ss:$12 sps:$4 sm:$0xff]  }
 0x515   : > { %5459 = vmatprep.subr.bf16.mxu0 %v11724_v62  ;;  %10673 = vmatprep.subr.bf16.mxu1 %v11725_v0  ;;  %v11766_v62 = vld [vmem:[#allocation10 + $0x788] ss:$12 sps:$4 sm:$0xff]  }
 0x516   : > { %v11769_v0 = vld [vmem:[#allocation10 + $0x49c] ss:$12 sps:$4 sm:$0xff]  }
 0x517   : > { %5926 = vmatmul.mubr.bf16.vlgmr.msra.gmra.mrb[88].mxu1 %v13842_v7 }
 0x518   : > { %5460 = vmatpush1.bf16.msra.mxu0 %v11722_v2  ;;  %10674 = vmatpush3.bf16.msra.mxu1 %v11726_v4  ;;  %v13928_v2 = vpack.c.bf16 %v13869_v63, %v13869_v63  ;;  %v11770_v4 = vld [vmem:[#allocation10 + $0x860] ss:$12 sps:$4 sm:$0xff]   ;;  %v13936_v63 = vpack.c.bf16 %v13867_v61, %v13867_v61  ;;  %v11781_v61 = vld [vmem:[#allocation10 + $0x7d0] ss:$12 sps:$4 sm:$0xff]  }
 0x519   : > { %5461 = vmatprep.subr.bf16.mxu0 %v11729_v5  ;;  %10675 = vmatprep.subr.bf16.mxu1 %v11730_v11  ;;  %v11767_v5 = vld [vmem:[#allocation10 + $0x498] ss:$12 sps:$4 sm:$0xff]   ;;  %v11771_v11 = vld [vmem:[#allocation10 + $0x7a0] ss:$12 sps:$4 sm:$0xff]  }
 0x51a   : > { %5933 = vmatprep.mubr.bf16.mxu1 %v13916_v24 }
 0x51c   : > { %5462 = vmatpush1.bf16.msra.mxu0 %v11727_v25  ;;  %10676 = vmatpush3.bf16.msra.mxu1 %v11731_v48  ;;  %v11774_v25 = vld [vmem:[#allocation10 + $0x4b4] ss:$12 sps:$4 sm:$0xff]   ;;  %v11775_v48 = vld [vmem:[#allocation10 + $0x878] ss:$12 sps:$4 sm:$0xff]  }
 0x51d   : > { %5463 = vmatprep.subr.bf16.mxu0 %v11734_v28  ;;  %10677 = vmatprep.subr.bf16.mxu1 %v11735_v30  ;;  %v11776_v28 = vld [vmem:[#allocation10 + $0x7b8] ss:$12 sps:$4 sm:$0xff]   ;;  %v11780_v30 = vld [vmem:[#allocation10 + $0x890] ss:$12 sps:$4 sm:$0xff]  }
 0x51f   : > { %5934 = vmatmul.mubr.bf16.gmra.mrb[92].mxu1 %v13922_v21 }
 0x520   : > { %5464 = vmatpush1.bf16.msra.mxu0 %v11732_v33  ;;  %10678 = vmatpush3.bf16.msra.mxu1 %v11736_v34  ;;  %v11777_v33 = vld [vmem:[#allocation10 + $0x4c8] ss:$12 sps:$4 sm:$0xff]   ;;  %v11784_v34 = vld [vmem:[#allocation10 + $0x4e4] ss:$12 sps:$4 sm:$0xff]  }
 0x521   : > { %5465 = vmatprep.subr.bf16.mxu0 %v11739_v27  ;;  %10679 = vmatprep.subr.bf16.mxu1 %v11740_v35  ;;  %v11785_v27 = vld [vmem:[#allocation10 + $0x8a8] ss:$12 sps:$4 sm:$0xff]   ;;  %v11782_v35 = vld [vmem:[#allocation10 + $0x4e0] ss:$12 sps:$4 sm:$0xff]  }
 0x522   : > { %5973 = vmatprep.mubr.bf16.mxu1 %v13856_v55 }
 0x524   : > { %5466 = vmatpush1.bf16.msra.mxu0 %v11737_v8  ;;  %10680 = vmatpush3.bf16.msra.mxu1 %v11741_v17  ;;  %v11786_v8 = vld [vmem:[#allocation10 + $0x7e8] ss:$12 sps:$4 sm:$0xff]   ;;  %v11790_v17 = vld [vmem:[#allocation10 + $0x8c0] ss:$12 sps:$4 sm:$0xff]  }
 0x525   : > { %5467 = vmatprep.subr.bf16.mxu0 %v11744_v29  ;;  %10681 = vmatprep.subr.bf16.mxu1 %v11745_v36  ;;  %v11787_v29 = vld [vmem:[#allocation10 + $0x4f8] ss:$12 sps:$4 sm:$0xff]   ;;  %v11791_v36 = vld [vmem:[#allocation10 + $0x800] ss:$12 sps:$4 sm:$0xff]  }
 0x528   : > { %5468 = vmatpush1.bf16.msra.mxu0 %v11742_v32  ;;  %10682 = vmatpush3.bf16.msra.mxu1 %v11746_v51  ;;  %v11794_v32 = vld [vmem:[#allocation10 + $0x514] ss:$12 sps:$4 sm:$0xff]   ;;  %v11795_v51 = vld [vmem:[#allocation10 + $0x8d8] ss:$12 sps:$4 sm:$0xff]  }
 0x529   : > { %5469 = vmatprep.subr.bf16.mxu0 %v11749_v38  ;;  %10683 = vmatprep.subr.bf16.mxu1 %v11750_v40  ;;  %v11792_v38 = vld [vmem:[#allocation10 + $0x510] ss:$12 sps:$4 sm:$0xff]   ;;  %v11799_v40 = vld [vmem:[#allocation10 + $0x52c] ss:$12 sps:$4 sm:$0xff]  }
 0x52c   : > { %5470 = vmatpush1.bf16.msra.mxu0 %v11747_v42  ;;  %10684 = vmatpush3.bf16.msra.mxu1 %v11751_v6  ;;  %v11800_v42 = vld [vmem:[#allocation10 + $0x8f0] ss:$12 sps:$4 sm:$0xff]   ;;  %v11797_v6 = vld [vmem:[#allocation10 + $0x528] ss:$12 sps:$4 sm:$0xff]  }
 0x52d   : > { %5471 = vmatprep.subr.bf16.mxu0 %v11754_v45  ;;  %10685 = vmatprep.subr.bf16.mxu1 %v11755_v47  ;;  %v11801_v45 = vld [vmem:[#allocation10 + $0x830] ss:$12 sps:$4 sm:$0xff]  }
 0x52e   : > { %v11804_v47 = vld [vmem:[#allocation10 + $0x544] ss:$12 sps:$4 sm:$0xff]  }
 0x530   : > { %5472 = vmatpush1.bf16.msra.mxu0 %v11752_v50  ;;  %10686 = vmatpush3.bf16.msra.mxu1 %v11756_v52  ;;  %v11805_v50 = vld [vmem:[#allocation10 + $0x9c8] ss:$12 sps:$4 sm:$0xff]   ;;  %v11802_v52 = vld [vmem:[#allocation10 + $0x540] ss:$12 sps:$4 sm:$0xff]  }
 0x531   : > { %5473 = vmatprep.subr.bf16.mxu0 %v11759_v53  ;;  %10687 = vmatprep.subr.bf16.mxu1 %v11760_v54  ;;  %v11806_v53 = vld [vmem:[#allocation10 + $0x908] ss:$12 sps:$4 sm:$0xff]  }
 0x532   : > { %v11809_v54 = vld [vmem:[#allocation10 + $0x55c] ss:$12 sps:$4 sm:$0xff]  }
 0x534   : > { %5474 = vmatpush1.bf16.msra.mxu0 %v11757_v57  ;;  %10688 = vmatpush3.bf16.msra.mxu1 %v11761_v58  ;;  %v13944_v57 = vpack.c.bf16 %v13878_v9, %v13878_v9  ;;  %v11810_v58 = vld [vmem:[#allocation10 + $0x9e0] ss:$12 sps:$4 sm:$0xff]   ;;  %v11812_v9 = vld [vmem:[#allocation10 + $0x570] ss:$12 sps:$4 sm:$0xff]  }
 0x535   : > { %5494 = vmatprep.subr.bf16.mxu0 %v11764_v20  ;;  %10701 = vmatprep.subr.bf16.mxu1 %v11765_v60  ;;  %v11807_v20 = vld [vmem:[#allocation10 + $0x558] ss:$12 sps:$4 sm:$0xff]   ;;  %v11811_v60 = vld [vmem:[#allocation10 + $0x920] ss:$12 sps:$4 sm:$0xff]  }
 0x537   : > { %5476 = vmatmul.mubr.bf16.vlgmr.msra.gmra.mrb[64].mxu0 %v13838_v1  ;;  %5974 = vmatmul.mubr.bf16.vlgmr.msra.gmra.mrb[96].mxu1 %v13854_v49  ;;  %v11772_v1 = vld [vmem:[#allocation10 + $0x4b0] ss:$12 sps:$4 sm:$0xff]  }
 0x538   : > { %5485 = vmatprep.mubr.bf16.mxu0 %v13888_v23  ;;  %5495 = vmatpush1.bf16.msra.mxu0 %v11762_v22  ;;  %v11779_v23 = vld [vmem:[#allocation10 + $0x4cc] ss:$12 sps:$4 sm:$0xff]   ;;  %v11814_v22 = vld [vmem:[#allocation10 + $0x574] ss:$12 sps:$4 sm:$0xff]  }
 0x539   : > { %10702 = vmatpush3.bf16.msra.mxu1 %v11766_v62  ;;  %5496 = vmatprep.subr.bf16.mxu0 %v11769_v0  ;;  %v11815_v62 = vld [vmem:[#allocation10 + $0x9f8] ss:$12 sps:$4 sm:$0xff]   ;;  %v13950_v0 = vpack.c.bf16 %v13876_v3, %v13876_v3  ;;  %v11825_v3 = vld [vmem:[#allocation10 + $0xa28] ss:$12 sps:$4 sm:$0xff]  }
 0x53a   : > { %10703 = vmatprep.subr.bf16.mxu1 %v11770_v4  ;;  %5981 = vmatprep.mubr.bf16.mxu1 %v13928_v2  ;;  %v11816_v4 = vld [vmem:[#allocation10 + $0x938] ss:$12 sps:$4 sm:$0xff]  }
 0x53c   : > { %5497 = vmatpush1.bf16.msra.mxu0 %v11767_v5  ;;  %v11819_v5 = vld [vmem:[#allocation10 + $0x58c] ss:$12 sps:$4 sm:$0xff]  }
 0x53d   : > { %10704 = vmatpush3.bf16.msra.mxu1 %v11771_v11  ;;  %5498 = vmatprep.subr.bf16.mxu0 %v11774_v25  ;;  %v11820_v11 = vld [vmem:[#allocation10 + $0xa10] ss:$12 sps:$4 sm:$0xff]   ;;  %v11817_v25 = vld [vmem:[#allocation10 + $0x588] ss:$12 sps:$4 sm:$0xff]  }
 0x53e   : > { %10705 = vmatprep.subr.bf16.mxu1 %v11775_v48  ;;  %v11821_v48 = vld [vmem:[#allocation10 + $0x950] ss:$12 sps:$4 sm:$0xff]  }
 0x53f   : > { %5486 = vmatmul.mubr.bf16.gmra.mrb[68].mxu0 %v13900_v37  ;;  %5982 = vmatmul.mubr.bf16.gmra.mrb[100].mxu1 %v13936_v63  ;;  %v11789_v37 = vld [vmem:[#allocation10 + $0x4fc] ss:$12 sps:$4 sm:$0xff]  }
 0x540   : > { %5499 = vmatpush1.bf16.msra.mxu0 %v11772_v1  ;;  %6021 = vmatprep.mubr.bf16.mxu1 %v13860_v59  ;;  %v11824_v1 = vld [vmem:[#allocation10 + $0x5a4] ss:$12 sps:$4 sm:$0xff]  }
 0x541   : > { %10706 = vmatpush3.bf16.msra.mxu1 %v11776_v28  ;;  %5500 = vmatprep.subr.bf16.mxu0 %v11779_v23  ;;  %v11822_v28 = vld [vmem:[#allocation10 + $0x5a0] ss:$12 sps:$4 sm:$0xff]   ;;  %v11826_v23 = vld [vmem:[#allocation10 + $0x968] ss:$12 sps:$4 sm:$0xff]  }
 0x542   : > { %10707 = vmatprep.subr.bf16.mxu1 %v11780_v30  ;;  %5526 = vmatprep.mubr.bf16.mxu0 %v13844_v13  ;;  %v11796_v13 = vld [vmem:[#allocation10 + $0x818] ss:$12 sps:$4 sm:$0xff]   ;;  %v11829_v30 = vld [vmem:[#allocation10 + $0x5bc] ss:$12 sps:$4 sm:$0xff]  }
 0x544   : > { %5501 = vmatpush1.bf16.msra.mxu0 %v11777_v33  ;;  %v11830_v33 = vld [vmem:[#allocation10 + $0xa40] ss:$12 sps:$4 sm:$0xff]  }
 0x545   : > { %10708 = vmatpush3.bf16.msra.mxu1 %v11781_v61  ;;  %5502 = vmatprep.subr.bf16.mxu0 %v11784_v34  ;;  %v11827_v61 = vld [vmem:[#allocation10 + $0x5b8] ss:$12 sps:$4 sm:$0xff]   ;;  %v11831_v34 = vld [vmem:[#allocation10 + $0x980] ss:$12 sps:$4 sm:$0xff]  }
 0x546   : > { %10709 = vmatprep.subr.bf16.mxu1 %v11785_v27  ;;  %v11834_v27 = vld [vmem:[#allocation10 + $0x5d4] ss:$12 sps:$4 sm:$0xff]  }
 0x548   : > { %5503 = vmatpush1.bf16.msra.mxu0 %v11782_v35  ;;  %v11835_v35 = vld [vmem:[#allocation10 + $0xa58] ss:$12 sps:$4 sm:$0xff]  }
 0x549   : > { %10710 = vmatpush3.bf16.msra.mxu1 %v11786_v8  ;;  %5504 = vmatprep.subr.bf16.mxu0 %v11789_v37  ;;  %v11832_v8 = vld [vmem:[#allocation10 + $0x5d0] ss:$12 sps:$4 sm:$0xff]   ;;  %v11836_v37 = vld [vmem:[#allocation10 + $0x998] ss:$12 sps:$4 sm:$0xff]  }
 0x54a   : > { %10711 = vmatprep.subr.bf16.mxu1 %v11790_v17  ;;  %v11839_v17 = vld [vmem:[#allocation10 + $0x5ec] ss:$12 sps:$4 sm:$0xff]  }
 0x54c   : > { %5505 = vmatpush1.bf16.msra.mxu0 %v11787_v29  ;;  %v11840_v29 = vld [vmem:[#allocation10 + $0xa70] ss:$12 sps:$4 sm:$0xff]  }
 0x54d   : > { %10712 = vmatpush3.bf16.msra.mxu1 %v11791_v36  ;;  %5506 = vmatprep.subr.bf16.mxu0 %v11794_v32  ;;  %v11837_v36 = vld [vmem:[#allocation10 + $0x5e8] ss:$12 sps:$4 sm:$0xff]   ;;  %v11841_v32 = vld [vmem:[#allocation10 + $0x9b0] ss:$12 sps:$4 sm:$0xff]  }
 0x54e   : > { %10713 = vmatprep.subr.bf16.mxu1 %v11795_v51  ;;  %v11844_v51 = vld [vmem:[#allocation10 + $0x604] ss:$12 sps:$4 sm:$0xff]  }
 0x550   : > { %5507 = vmatpush1.bf16.msra.mxu0 %v11792_v38  ;;  %v11845_v38 = vld [vmem:[#allocation10 + $0xb48] ss:$12 sps:$4 sm:$0xff]  }
 0x551   : > { %10714 = vmatpush3.bf16.msra.mxu1 %v11796_v13  ;;  %5508 = vmatprep.subr.bf16.mxu0 %v11799_v40  ;;  %v11842_v13 = vld [vmem:[#allocation10 + $0x600] ss:$12 sps:$4 sm:$0xff]   ;;  %v11846_v40 = vld [vmem:[#allocation10 + $0xa88] ss:$12 sps:$4 sm:$0xff]  }
 0x552   : > { %10715 = vmatprep.subr.bf16.mxu1 %v11800_v42  ;;  %v11849_v42 = vld [vmem:[#allocation10 + $0x61c] ss:$12 sps:$4 sm:$0xff]  }
 0x554   : > { %5509 = vmatpush1.bf16.msra.mxu0 %v11797_v6  ;;  %v11850_v6 = vld [vmem:[#allocation10 + $0xb60] ss:$12 sps:$4 sm:$0xff]  }
 0x555   : > { %10716 = vmatpush3.bf16.msra.mxu1 %v11801_v45  ;;  %5510 = vmatprep.subr.bf16.mxu0 %v11804_v47  ;;  %v13957_v45 = vpack.c.bf16 %v13896_v31, %v13896_v31  ;;  %v11847_v47 = vld [vmem:[#allocation10 + $0x618] ss:$12 sps:$4 sm:$0xff]   ;;  %v11852_v31 = vld [vmem:[#allocation10 + $0x630] ss:$12 sps:$4 sm:$0xff]  }
 0x556   : > { %10729 = vmatprep.subr.bf16.mxu1 %v11805_v50  ;;  %v11851_v50 = vld [vmem:[#allocation10 + $0xaa0] ss:$12 sps:$4 sm:$0xff]  }
 0x558   : > { %6022 = vmatmul.mubr.bf16.vlgmr.msra.gmra.mrb[104].mxu1 %v13858_v56  ;;  %5511 = vmatpush1.bf16.msra.mxu0 %v11802_v52  ;;  %v11854_v52 = vld [vmem:[#allocation10 + $0x634] ss:$12 sps:$4 sm:$0xff]  }
 0x559   : > { %10730 = vmatpush3.bf16.msra.mxu1 %v11806_v53  ;;  %5512 = vmatprep.subr.bf16.mxu0 %v11809_v54  ;;  %v11855_v53 = vld [vmem:[#allocation10 + $0xb78] ss:$12 sps:$4 sm:$0xff]  }
 0x55a   : > { %10731 = vmatprep.subr.bf16.mxu1 %v11810_v58  ;;  %6029 = vmatprep.mubr.bf16.mxu1 %v13944_v57  ;;  %v11856_v54 = vld [vmem:[#allocation10 + $0xab8] ss:$12 sps:$4 sm:$0xff]  }
 0x55b   : > { %v11859_v58 = vld [vmem:[#allocation10 + $0x64c] ss:$12 sps:$4 sm:$0xff]  }
 0x55c   : > { %5513 = vmatpush1.bf16.msra.mxu0 %v11807_v20  ;;  %v11860_v20 = vld [vmem:[#allocation10 + $0xb90] ss:$12 sps:$4 sm:$0xff]  }
 0x55d   : > { %10732 = vmatpush3.bf16.msra.mxu1 %v11811_v60  ;;  %5514 = vmatprep.subr.bf16.mxu0 %v11814_v22  ;;  %v11861_v60 = vld [vmem:[#allocation10 + $0xad0] ss:$12 sps:$4 sm:$0xff]   ;;  %v11865_v22 = vld [vmem:[#allocation10 + $0xba8] ss:$12 sps:$4 sm:$0xff]  }
 0x55e   : > { %10733 = vmatprep.subr.bf16.mxu1 %v11815_v62  ;;  %v11862_v62 = vld [vmem:[#allocation10 + $0x660] ss:$12 sps:$4 sm:$0xff]  }
 0x560   : > { %6030 = vmatmul.mubr.bf16.gmra.mrb[108].mxu1 %v13950_v0  ;;  %5515 = vmatpush1.bf16.msra.mxu0 %v11812_v9  ;;  %v11866_v9 = vld [vmem:[#allocation10 + $0xae8] ss:$12 sps:$4 sm:$0xff]  }
 0x561   : > { %10734 = vmatpush3.bf16.msra.mxu1 %v11816_v4  ;;  %6069 = vmatprep.mubr.bf16.mxu1 %v13884_v39  ;;  %v11870_v4 = vld [vmem:[#allocation10 + $0xbc0] ss:$12 sps:$4 sm:$0xff]  }
 0x562   : > { %5516 = vmatprep.subr.bf16.mxu0 %v11819_v5  ;;  %10735 = vmatprep.subr.bf16.mxu1 %v11820_v11  ;;  %v11867_v5 = vld [vmem:[#allocation10 + $0x678] ss:$12 sps:$4 sm:$0xff]   ;;  %v11874_v11 = vld [vmem:[#allocation10 + $0x694] ss:$12 sps:$4 sm:$0xff]  }
 0x564   : > { %5517 = vmatpush1.bf16.msra.mxu0 %v11817_v25 }
 0x565   : > { %10736 = vmatpush3.bf16.msra.mxu1 %v11821_v48  ;;  %5518 = vmatprep.subr.bf16.mxu0 %v11824_v1  ;;  %v11875_v48 = vld [vmem:[#allocation10 + $0xbd8] ss:$12 sps:$4 sm:$0xff]  }
 0x566   : > { %10737 = vmatprep.subr.bf16.mxu1 %v11825_v3 }
 0x568   : > { %5519 = vmatpush1.bf16.msra.mxu0 %v11822_v28 }
 0x569   : > { %10738 = vmatpush3.bf16.msra.mxu1 %v11826_v23  ;;  %5520 = vmatprep.subr.bf16.mxu0 %v11829_v30  ;;  %v11872_v23 = vld [vmem:[#allocation10 + $0x690] ss:$12 sps:$4 sm:$0xff]  }
 0x56a   : > { %10739 = vmatprep.subr.bf16.mxu1 %v11830_v33  ;;  %v11876_v33 = vld [vmem:[#allocation10 + $0xb18] ss:$12 sps:$4 sm:$0xff]  }
 0x56c   : > { %5521 = vmatpush1.bf16.msra.mxu0 %v11827_v61  ;;  %v11879_v61 = vld [vmem:[#allocation10 + $0x6ac] ss:$12 sps:$4 sm:$0xff]  }
 0x56d   : > { %10740 = vmatpush3.bf16.msra.mxu1 %v11831_v34  ;;  %5522 = vmatprep.subr.bf16.mxu0 %v11834_v27  ;;  %v11880_v27 = vld [vmem:[#allocation10 + $0xbf0] ss:$12 sps:$4 sm:$0xff]  }
 0x56e   : > { %10741 = vmatprep.subr.bf16.mxu1 %v11835_v35  ;;  %v11877_v35 = vld [vmem:[#allocation10 + $0x6a8] ss:$12 sps:$4 sm:$0xff]  }
 0x570   : > { %5523 = vmatpush1.bf16.msra.mxu0 %v11832_v8  ;;  %v11881_v8 = vld [vmem:[#allocation10 + $0xb30] ss:$12 sps:$4 sm:$0xff]  }
 0x571   : > { %10742 = vmatpush3.bf16.msra.mxu1 %v11836_v37  ;;  %5524 = vmatprep.subr.bf16.mxu0 %v11839_v17  ;;  %v11884_v37 = vld [vmem:[#allocation10 + $0x6c4] ss:$12 sps:$4 sm:$0xff]  }
 0x572   : > { %10743 = vmatprep.subr.bf16.mxu1 %v11840_v29 }
 0x574   : > { %5525 = vmatpush1.bf16.msra.mxu0 %v11837_v36  ;;  %v11882_v36 = vld [vmem:[#allocation10 + $0x6c0] ss:$12 sps:$4 sm:$0xff]  }
 0x575   : > { %10744 = vmatpush3.bf16.msra.mxu1 %v11841_v32  ;;  %5545 = vmatprep.subr.bf16.mxu0 %v11844_v51 }
 0x576   : > { %10757 = vmatprep.subr.bf16.mxu1 %v11845_v38  ;;  %v13972_v38 = vpack.c.bf16 %v13912_v46, %v13912_v46  ;;  %v11893_v46 = vld [vmem:[#allocation10 + $0x70c] ss:$12 sps:$4 sm:$0xff]  }
 0x577   : > { %5527 = vmatmul.mubr.bf16.vlgmr.msra.gmra.mrb[64].mxu0 %v13842_v7  ;;  %v13964_v7 = vpack.c.bf16 %v13892_v10, %v13892_v10  ;;  %v11864_v10 = vld [vmem:[#allocation10 + $0x664] ss:$12 sps:$4 sm:$0xff]  }
 0x578   : > { %6070 = vmatmul.mubr.bf16.vlgmr.msra.gmra.mrb[112].mxu1 %v13882_v26  ;;  %5546 = vmatpush1.bf16.msra.mxu0 %v11842_v13  ;;  %v11887_v13 = vld [vmem:[#allocation10 + $0x6dc] ss:$12 sps:$4 sm:$0xff]  }
 0x579   : > { %10758 = vmatpush3.bf16.msra.mxu1 %v11846_v40  ;;  %5547 = vmatprep.subr.bf16.mxu0 %v11849_v42  ;;  %v11885_v42 = vld [vmem:[#allocation10 + $0x6d8] ss:$12 sps:$4 sm:$0xff]  }
 0x57a   : > { %10759 = vmatprep.subr.bf16.mxu1 %v11850_v6  ;;  %5536 = vmatprep.mubr.bf16.mxu0 %v13916_v24  ;;  %v11857_v24 = vld [vmem:[#allocation10 + $0x648] ss:$12 sps:$4 sm:$0xff]  }
 0x57b   : > { %6077 = vmatprep.mubr.bf16.mxu1 %v13957_v45  ;;  %v11890_v6 = vld [vmem:[#allocation10 + $0x6f4] ss:$12 sps:$4 sm:$0xff]  }
 0x57c   : > { %5548 = vmatpush1.bf16.msra.mxu0 %v11847_v47  ;;  %v13978_v47 = vpack.c.bf16 %v13910_v44, %v13910_v44 }
 0x57d   : > { %10760 = vmatpush3.bf16.msra.mxu1 %v11851_v50  ;;  %5549 = vmatprep.subr.bf16.mxu0 %v11854_v52  ;;  %v11888_v50 = vld [vmem:[#allocation10 + $0x6f0] ss:$12 sps:$4 sm:$0xff]   ;;  %v11891_v52 = vld [vmem:[#allocation10 + $0x708] ss:$12 sps:$4 sm:$0xff]  }
 0x57e   : > { %10761 = vmatprep.subr.bf16.mxu1 %v11855_v53  ;;  %v11896_v53 = vld [vmem:[#allocation10 + $0x724] ss:$12 sps:$4 sm:$0xff]  }
 0x57f   : > { %5537 = vmatmul.mubr.bf16.gmra.mrb[68].mxu0 %v13922_v21  ;;  %v11869_v21 = vld [vmem:[#allocation10 + $0x67c] ss:$12 sps:$4 sm:$0xff]  }
 0x580   : > { %6078 = vmatmul.mubr.bf16.gmra.mrb[116].mxu1 %v13964_v7  ;;  %5550 = vmatpush1.bf16.msra.mxu0 %v11852_v31  ;;  %v11894_v31 = vld [vmem:[#allocation10 + $0x720] ss:$12 sps:$4 sm:$0xff]  }
 0x581   : > { %5577 = vmatprep.mubr.bf16.mxu0 %v13856_v55  ;;  %10762 = vmatpush3.bf16.msra.mxu1 %v11856_v54  ;;  %v11871_v55 = vld [vmem:[#allocation10 + $0xb00] ss:$12 sps:$4 sm:$0xff]  }
 0x582   : > { %5551 = vmatprep.subr.bf16.mxu0 %v11859_v58  ;;  %10763 = vmatprep.subr.bf16.mxu1 %v11860_v20  ;;  %v13982_v54 = vld [vmem:[#allocation11] sm:$0x7]  ;;  %v11899_v58 = vld [vmem:[#allocation10 + $0x73c] ss:$12 sps:$4 sm:$0xff]   ;;  %v11897_v20 = vld [vmem:[#allocation10 + $0x738] ss:$12 sps:$4 sm:$0xff]  }
 0x583   : > { %6117 = vmatprep.mubr.bf16.mxu1 %v13908_v43  ;;  %v3289_v44 = vrot.slane %v13982_v54, %v13645_v16 }
 0x584   : > { %5552 = vmatpush1.bf16.msra.mxu0 %v11857_v24  ;;  %v11902_v24 = vld [vmem:[#allocation10 + $0x754] ss:$12 sps:$4 sm:$0xff]  }
 0x585   : > { %10764 = vmatpush3.bf16.msra.mxu1 %v11861_v60  ;;  %5553 = vmatprep.subr.bf16.mxu0 %v11864_v10 }
 0x586   : > { %10765 = vmatprep.subr.bf16.mxu1 %v11865_v22 }
 0x588   : > { %5554 = vmatpush1.bf16.msra.mxu0 %v11862_v62 }
 0x589   : > { %10766 = vmatpush3.bf16.msra.mxu1 %v11866_v9  ;;  %5555 = vmatprep.subr.bf16.mxu0 %v11869_v21  ;;  %v11900_v21 = vld [vmem:[#allocation10 + $0x750] ss:$12 sps:$4 sm:$0xff]  }
 0x58a   : > { %v10577_v25 = vpop.f32.mrb[64].mxu1  ;;  %10767 = vmatprep.subr.bf16.mxu1 %v11870_v4 }
 0x58b   : > { %v10578_v1 = vpop.f32.mrb[65].mxu1 }
 0x58c   : > { %5556 = vmatpush1.bf16.msra.mxu0 %v11867_v5  ;;  %v10579_v3 = vadd.f32 %v10578_v1, %v10577_v25  ;;  %v10580_v28 = vpop.f32.mrb[66].mxu1  ;;  %v11905_v5 = vld [vmem:[#allocation10 + $0x76c] ss:$12 sps:$4 sm:$0xff]   ;;  %v11903_v1 = vld [vmem:[#allocation10 + $0x768] ss:$12 sps:$4 sm:$0xff]  }
 0x58d   : > { %10768 = vmatpush3.bf16.msra.mxu1 %v11871_v55  ;;  %v10581_v30 = vpop.f32.mrb[67].mxu1  ;;  %5557 = vmatprep.subr.bf16.mxu0 %v11874_v11 }
 0x58e   : > { %v10582_v34 = vadd.f32 %v10581_v30, %v10580_v28  ;;  %10769 = vmatprep.subr.bf16.mxu1 %v11875_v48  ;;  %v5784_v22 = vadd.f32 %v10579_v3, %v3289_v44  ;;  %v11908_v28 = vld [vmem:[#allocation10 + $0x784] ss:$12 sps:$4 sm:$0xff]   ;;  %v11906_v3 = vld [vmem:[#allocation10 + $0x780] ss:$12 sps:$4 sm:$0xff]  }
 0x590   : > { %5558 = vmatpush1.bf16.msra.mxu0 %v11872_v23  ;;  %v5787_v55 = vadd.f32 %v10582_v34, %v3289_v44  ;;  %v11909_v34 = vld [vmem:[#allocation10 + $0x798] ss:$12 sps:$4 sm:$0xff]  }
 0x591   : > { %10770 = vmatpush3.bf16.msra.mxu1 %v11876_v33  ;;  %5559 = vmatprep.subr.bf16.mxu0 %v11879_v61 }
 0x592   : > { %10771 = vmatprep.subr.bf16.mxu1 %v11880_v27  ;;  %v10583_v17 = vpop.f32.mrb[68].mxu1 }
 0x593   : > { %v10584_v29 = vpop.f32.mrb[69].mxu1 }
 0x594   : > { %5560 = vmatpush1.bf16.msra.mxu0 %v11877_v35  ;;  %v10585_v32 = vadd.f32 %v10584_v29, %v10583_v17  ;;  %v10586_v51 = vpop.f32.mrb[70].mxu1  ;;  %v11911_v35 = vld [vmem:[#allocation10 + $0x79c] ss:$12 sps:$4 sm:$0xff]   ;;  %v11914_v17 = vld [vmem:[#allocation10 + $0x7b4] ss:$12 sps:$4 sm:$0xff]  }
 0x595   : > { %10772 = vmatpush3.bf16.msra.mxu1 %v11881_v8  ;;  %5561 = vmatprep.subr.bf16.mxu0 %v11884_v37  ;;  %v10587_v40 = vpop.f32.mrb[71].mxu1  ;;  %v11912_v29 = vld [vmem:[#allocation10 + $0x7b0] ss:$12 sps:$4 sm:$0xff]  }
 0x596   : > { %v5792_v23 = vadd.f32 %v10585_v32, %v3289_v44  ;;  %v11915_v32 = vld [vmem:[#allocation10 + $0x7c8] ss:$12 sps:$4 sm:$0xff]   ;;  %v11920_v51 = vld [vmem:[#allocation10 + $0x7e4] ss:$12 sps:$4 sm:$0xff]  }
 0x597   : > { %v11926_v40 = vld [vmem:[#allocation10 + $0x814] ss:$12 sps:$4 sm:$0xff]  }
 0x598   : > { %6118 = vmatmul.mubr.bf16.vlgmr.msra.gmra.mrb[120].mxu1 %v13906_v41  ;;  %5562 = vmatpush1.bf16.msra.mxu0 %v11882_v36  ;;  %v11917_v36 = vld [vmem:[#allocation10 + $0x7cc] ss:$12 sps:$4 sm:$0xff]   ;;  %v11927_v44 = vld [vmem:[#allocation10 + $0x828] ss:$12 sps:$4 sm:$0xff]  }
 0x599   : > { %5563 = vmatprep.subr.bf16.mxu0 %v11887_v13  ;;  %6125 = vmatprep.mubr.bf16.mxu1 %v13972_v38  ;;  %v11921_v13 = vld [vmem:[#allocation10 + $0x7f8] ss:$12 sps:$4 sm:$0xff]  }
 0x59c   : > { %5564 = vmatpush1.bf16.msra.mxu0 %v11885_v42 }
 0x59d   : > { %5565 = vmatprep.subr.bf16.mxu0 %v11890_v6 }
 0x5a0   : > { %6126 = vmatmul.mubr.bf16.gmra.mrb[124].mxu1 %v13978_v47  ;;  %5566 = vmatpush1.bf16.msra.mxu0 %v11888_v50 }
 0x5a1   : > { %5567 = vmatprep.subr.bf16.mxu0 %v11893_v46  ;;  %6195 = vmatprep.mubr.bf16.mxu1 %v13160_v12 }
 0x5a4   : > { %5568 = vmatpush1.bf16.msra.mxu0 %v11891_v52 }
 0x5a5   : > { %5569 = vmatprep.subr.bf16.mxu0 %v11896_v53  ;;  %v11929_v53 = vld [vmem:[#allocation10 + $0x82c] ss:$12 sps:$4 sm:$0xff]  }
 0x5a8   : > { %5570 = vmatpush1.bf16.msra.mxu0 %v11894_v31 }
 0x5a9   : > { %5571 = vmatprep.subr.bf16.mxu0 %v11899_v58 }
 0x5aa   : > { %v10605_v60 = vpop.f32.mrb[72].mxu1 }
 0x5ab   : > { %v10606_v10 = vpop.f32.mrb[73].mxu1 }
 0x5ac   : > { %v10607_v62 = vadd.f32 %v10606_v10, %v10605_v60  ;;  %5572 = vmatpush1.bf16.msra.mxu0 %v11897_v20  ;;  %v10608_v9 = vpop.f32.mrb[74].mxu1  ;;  %v11932_v20 = vld [vmem:[#allocation10 + $0x844] ss:$12 sps:$4 sm:$0xff]  }
 0x5ad   : > { %v10609_v4 = vpop.f32.mrb[75].mxu1  ;;  %5573 = vmatprep.subr.bf16.mxu0 %v11902_v24 }
 0x5ae   : > { %v5832_v11 = vadd.f32 %v10607_v62, %v5784_v22  ;;  %v10610_v25 = vadd.f32 %v10609_v4, %v10608_v9  ;;  %v11930_v22 = vld [vmem:[#allocation10 + $0x840] ss:$12 sps:$4 sm:$0xff]   ;;  %v11935_v9 = vld [vmem:[#allocation10 + $0x85c] ss:$12 sps:$4 sm:$0xff]  }
 0x5b0   : > { %v5835_v48 = vadd.f32 %v10610_v25, %v5787_v55  ;;  %5574 = vmatpush1.bf16.msra.mxu0 %v11900_v21  ;;  %v11938_v55 = vld [vmem:[#allocation10 + $0x874] ss:$12 sps:$4 sm:$0xff]   ;;  %v11941_v25 = vld [vmem:[#allocation10 + $0x88c] ss:$12 sps:$4 sm:$0xff]  }
 0x5b1   : > { %5575 = vmatprep.subr.bf16.mxu0 %v11905_v5  ;;  %v11933_v5 = vld [vmem:[#allocation10 + $0x858] ss:$12 sps:$4 sm:$0xff]  }
 0x5b2   : > { %v10611_v30 = vpop.f32.mrb[76].mxu1 }
 0x5b3   : > { %v10612_v33 = vpop.f32.mrb[77].mxu1 }
 0x5b4   : > { %5576 = vmatpush1.bf16.msra.mxu0 %v11903_v1  ;;  %v10613_v61 = vadd.f32 %v10612_v33, %v10611_v30  ;;  %v10614_v27 = vpop.f32.mrb[78].mxu1  ;;  %v11944_v1 = vld [vmem:[#allocation10 + $0x8a4] ss:$12 sps:$4 sm:$0xff]   ;;  %v11950_v33 = vld [vmem:[#allocation10 + $0x8d4] ss:$12 sps:$4 sm:$0xff]  }
 0x5b5   : > { %5596 = vmatprep.subr.bf16.mxu0 %v11908_v28  ;;  %v10615_v8 = vpop.f32.mrb[79].mxu1  ;;  %v11942_v28 = vld [vmem:[#allocation10 + $0x8a0] ss:$12 sps:$4 sm:$0xff]   ;;  %v11945_v30 = vld [vmem:[#allocation10 + $0x8b8] ss:$12 sps:$4 sm:$0xff]  }
 0x5b6   : > { %v5840_v37 = vadd.f32 %v10613_v61, %v5792_v23  ;;  %v11947_v23 = vld [vmem:[#allocation10 + $0x8bc] ss:$12 sps:$4 sm:$0xff]  }
 0x5b7   : > { %5578 = vmatmul.mubr.bf16.vlgmr.msra.gmra.mrb[64].mxu0 %v13854_v49  ;;  %v11918_v49 = vld [vmem:[#allocation10 + $0x7e0] ss:$12 sps:$4 sm:$0xff]   ;;  %v11948_v8 = vld [vmem:[#allocation10 + $0x8d0] ss:$12 sps:$4 sm:$0xff]  }
 0x5b8   : > { %5587 = vmatprep.mubr.bf16.mxu0 %v13928_v2  ;;  %5597 = vmatpush1.bf16.msra.mxu0 %v11906_v3  ;;  %v11923_v2 = vld [vmem:[#allocation10 + $0x7fc] ss:$12 sps:$4 sm:$0xff]  }
 0x5b9   : > { %5598 = vmatprep.subr.bf16.mxu0 %v11911_v35 }
 0x5bc   : > { %5599 = vmatpush1.bf16.msra.mxu0 %v11909_v34  ;;  %v11953_v34 = vld [vmem:[#allocation10 + $0x8ec] ss:$12 sps:$4 sm:$0xff]  }
 0x5bd   : > { %5600 = vmatprep.subr.bf16.mxu0 %v11914_v17 }
 0x5bf   : > { %5588 = vmatmul.mubr.bf16.gmra.mrb[68].mxu0 %v13936_v63  ;;  %v11924_v63 = vld [vmem:[#allocation10 + $0x810] ss:$12 sps:$4 sm:$0xff]  }
 0x5c0   : > { %5601 = vmatpush1.bf16.msra.mxu0 %v11912_v29  ;;  %5628 = vmatprep.mubr.bf16.mxu0 %v13860_v59 }
 0x5c1   : > { %5602 = vmatprep.subr.bf16.mxu0 %v11917_v36 }
 0x5c4   : > { %5603 = vmatpush1.bf16.msra.mxu0 %v11915_v32  ;;  %v11951_v32 = vld [vmem:[#allocation10 + $0x8e8] ss:$12 sps:$4 sm:$0xff]  }
 0x5c5   : > { %5604 = vmatprep.subr.bf16.mxu0 %v11920_v51  ;;  %v11956_v51 = vld [vmem:[#allocation10 + $0x904] ss:$12 sps:$4 sm:$0xff]  }
 0x5c8   : > { %5605 = vmatpush1.bf16.msra.mxu0 %v11918_v49 }
 0x5c9   : > { %5606 = vmatprep.subr.bf16.mxu0 %v11923_v2 }
 0x5ca   : > { %v10633_v42 = vpop.f32.mrb[80].mxu1 }
 0x5cb   : > { %v10634_v6 = vpop.f32.mrb[81].mxu1 }
 0x5cc   : > { %v10635_v50 = vadd.f32 %v10634_v6, %v10633_v42  ;;  %5607 = vmatpush1.bf16.msra.mxu0 %v11921_v13  ;;  %v10636_v46 = vpop.f32.mrb[82].mxu1  ;;  %v11959_v6 = vld [vmem:[#allocation10 + $0x91c] ss:$12 sps:$4 sm:$0xff]  }
 0x5cd   : > { %v10637_v52 = vpop.f32.mrb[83].mxu1  ;;  %5608 = vmatprep.subr.bf16.mxu0 %v11926_v40  ;;  %v11954_v40 = vld [vmem:[#allocation10 + $0x900] ss:$12 sps:$4 sm:$0xff]  }
 0x5ce   : > { %v5880_v59 = vadd.f32 %v10635_v50, %v5832_v11  ;;  %v10638_v31 = vadd.f32 %v10637_v52, %v10636_v46  ;;  %v11936_v11 = vld [vmem:[#allocation10 + $0x870] ss:$12 sps:$4 sm:$0xff]   ;;  %v11962_v52 = vld [vmem:[#allocation10 + $0x934] ss:$12 sps:$4 sm:$0xff]  }
 0x5d0   : > { %v5883_v58 = vadd.f32 %v10638_v31, %v5835_v48  ;;  %5609 = vmatpush1.bf16.msra.mxu0 %v11924_v63  ;;  %v11939_v48 = vld [vmem:[#allocation10 + $0x888] ss:$12 sps:$4 sm:$0xff]   ;;  %v11957_v63 = vld [vmem:[#allocation10 + $0x918] ss:$12 sps:$4 sm:$0xff]  }
 0x5d1   : > { %5610 = vmatprep.subr.bf16.mxu0 %v11929_v53  ;;  %v11960_v53 = vld [vmem:[#allocation10 + $0x930] ss:$12 sps:$4 sm:$0xff]   ;;  %v11963_v31 = vld [vmem:[#allocation10 + $0x948] ss:$12 sps:$4 sm:$0xff]  }
 0x5d2   : > { %v10639_v24 = vpop.f32.mrb[84].mxu1 }
 0x5d3   : > { %v10640_v60 = vpop.f32.mrb[85].mxu1 }
 0x5d4   : > { %v10641_v10 = vadd.f32 %v10640_v60, %v10639_v24  ;;  %5611 = vmatpush1.bf16.msra.mxu0 %v11927_v44  ;;  %v10642_v62 = vpop.f32.mrb[86].mxu1  ;;  %v11971_v44 = vld [vmem:[#allocation10 + $0x97c] ss:$12 sps:$4 sm:$0xff]  }
 0x5d5   : > { %5612 = vmatprep.subr.bf16.mxu0 %v11932_v20  ;;  %v10643_v21 = vpop.f32.mrb[87].mxu1  ;;  %v11974_v20 = vld [vmem:[#allocation10 + $0x994] ss:$12 sps:$4 sm:$0xff]  }
 0x5d6   : > { %v5888_v4 = vadd.f32 %v10641_v10, %v5840_v37 }
 0x5d8   : > { %5613 = vmatpush1.bf16.msra.mxu0 %v11930_v22 }
 0x5d9   : > { %5614 = vmatprep.subr.bf16.mxu0 %v11935_v9 }
 0x5dc   : > { %5615 = vmatpush1.bf16.msra.mxu0 %v11933_v5  ;;  %v11975_v5 = vld [vmem:[#allocation10 + $0x9a8] ss:$12 sps:$4 sm:$0xff]  }
 0x5dd   : > { %5616 = vmatprep.subr.bf16.mxu0 %v11938_v55  ;;  %v11980_v55 = vld [vmem:[#allocation10 + $0x9c4] ss:$12 sps:$4 sm:$0xff]  }
 0x5e0   : > { %5617 = vmatpush1.bf16.msra.mxu0 %v11936_v11 }
 0x5e1   : > { %5618 = vmatprep.subr.bf16.mxu0 %v11941_v25 }
 0x5e4   : > { %5619 = vmatpush1.bf16.msra.mxu0 %v11939_v48 }
 0x5e5   : > { %5620 = vmatprep.subr.bf16.mxu0 %v11944_v1  ;;  %v11978_v1 = vld [vmem:[#allocation10 + $0x9c0] ss:$12 sps:$4 sm:$0xff]  }
 0x5e8   : > { %5621 = vmatpush1.bf16.msra.mxu0 %v11942_v28 }
 0x5e9   : > { %5622 = vmatprep.subr.bf16.mxu0 %v11947_v23 }
 0x5ea   : > { %v10661_v3 = vpop.f32.mrb[88].mxu1 }
 0x5eb   : > { %v10662_v61 = vpop.f32.mrb[89].mxu1 }
 0x5ec   : > { %v10663_v27 = vadd.f32 %v10662_v61, %v10661_v3  ;;  %5623 = vmatpush1.bf16.msra.mxu0 %v11945_v30  ;;  %v10664_v35 = vpop.f32.mrb[90].mxu1  ;;  %v11983_v30 = vld [vmem:[#allocation10 + $0x9dc] ss:$12 sps:$4 sm:$0xff]   ;;  %v11981_v3 = vld [vmem:[#allocation10 + $0x9d8] ss:$12 sps:$4 sm:$0xff]  }
 0x5ed   : > { %v10665_v37 = vpop.f32.mrb[91].mxu1  ;;  %5624 = vmatprep.subr.bf16.mxu0 %v11950_v33  ;;  %v11986_v61 = vld [vmem:[#allocation10 + $0x9f4] ss:$12 sps:$4 sm:$0xff]  }
 0x5ee   : > { %v5928_v17 = vadd.f32 %v10663_v27, %v5880_v59  ;;  %v10666_v29 = vadd.f32 %v10665_v37, %v10664_v35  ;;  %v11965_v59 = vld [vmem:[#allocation10 + $0x94c] ss:$12 sps:$4 sm:$0xff]   ;;  %v11984_v27 = vld [vmem:[#allocation10 + $0x9f0] ss:$12 sps:$4 sm:$0xff]  }
 0x5ef   : > { %v11989_v35 = vld [vmem:[#allocation10 + $0xa0c] ss:$12 sps:$4 sm:$0xff]   ;;  %v11992_v37 = vld [vmem:[#allocation10 + $0xa24] ss:$12 sps:$4 sm:$0xff]  }
 0x5f0   : > { %v5931_v36 = vadd.f32 %v10666_v29, %v5883_v58  ;;  %5625 = vmatpush1.bf16.msra.mxu0 %v11948_v8  ;;  %v11968_v58 = vld [vmem:[#allocation10 + $0x964] ss:$12 sps:$4 sm:$0xff]   ;;  %v11987_v8 = vld [vmem:[#allocation10 + $0xa08] ss:$12 sps:$4 sm:$0xff]  }
 0x5f1   : > { %5626 = vmatprep.subr.bf16.mxu0 %v11953_v34  ;;  %v11990_v34 = vld [vmem:[#allocation10 + $0xa20] ss:$12 sps:$4 sm:$0xff]   ;;  %v11993_v29 = vld [vmem:[#allocation10 + $0xa38] ss:$12 sps:$4 sm:$0xff]  }
 0x5f2   : > { %v10667_v49 = vpop.f32.mrb[92].mxu1 }
 0x5f3   : > { %v10668_v2 = vpop.f32.mrb[93].mxu1 }
 0x5f4   : > { %v10669_v13 = vadd.f32 %v10668_v2, %v10667_v49  ;;  %5627 = vmatpush1.bf16.msra.mxu0 %v11951_v32  ;;  %v10670_v42 = vpop.f32.mrb[94].mxu1  ;;  %v11996_v49 = vld [vmem:[#allocation10 + $0xa50] ss:$12 sps:$4 sm:$0xff]  }
 0x5f5   : > { %5647 = vmatprep.subr.bf16.mxu0 %v11956_v51  ;;  %v10671_v50 = vpop.f32.mrb[95].mxu1 }
 0x5f6   : > { %v5936_v46 = vadd.f32 %v10669_v13, %v5888_v4 }
 0x5f7   : > { %5629 = vmatmul.mubr.bf16.vlgmr.msra.gmra.mrb[64].mxu0 %v13858_v56  ;;  %v11966_v56 = vld [vmem:[#allocation10 + $0x960] ss:$12 sps:$4 sm:$0xff]  }
 0x5f8   : > { %5648 = vmatpush1.bf16.msra.mxu0 %v11954_v40  ;;  %5638 = vmatprep.mubr.bf16.mxu0 %v13944_v57  ;;  %v11969_v57 = vld [vmem:[#allocation10 + $0x978] ss:$12 sps:$4 sm:$0xff]  }
 0x5f9   : > { %5649 = vmatprep.subr.bf16.mxu0 %v11959_v6  ;;  %v12001_v40 = vld [vmem:[#allocation10 + $0xa6c] ss:$12 sps:$4 sm:$0xff]  }
 0x5fc   : > { %5650 = vmatpush1.bf16.msra.mxu0 %v11957_v63 }
 0x5fd   : > { %5651 = vmatprep.subr.bf16.mxu0 %v11962_v52  ;;  %v12004_v52 = vld [vmem:[#allocation10 + $0xa84] ss:$12 sps:$4 sm:$0xff]  }
 0x5ff   : > { %5639 = vmatmul.mubr.bf16.gmra.mrb[68].mxu0 %v13950_v0  ;;  %v11972_v0 = vld [vmem:[#allocation10 + $0x990] ss:$12 sps:$4 sm:$0xff]  }
 0x600   : > { %5652 = vmatpush1.bf16.msra.mxu0 %v11960_v53  ;;  %5679 = vmatprep.mubr.bf16.mxu0 %v13884_v39  ;;  %v11977_v39 = vld [vmem:[#allocation10 + $0x9ac] ss:$12 sps:$4 sm:$0xff]  }
 0x601   : > { %5653 = vmatprep.subr.bf16.mxu0 %v11965_v59 }
 0x604   : > { %5654 = vmatpush1.bf16.msra.mxu0 %v11963_v31  ;;  %v12002_v31 = vld [vmem:[#allocation10 + $0xa80] ss:$12 sps:$4 sm:$0xff]  }
 0x605   : > { %5655 = vmatprep.subr.bf16.mxu0 %v11968_v58 }
 0x608   : > { %5656 = vmatpush1.bf16.msra.mxu0 %v11966_v56  ;;  %v12007_v56 = vld [vmem:[#allocation10 + $0xa9c] ss:$12 sps:$4 sm:$0xff]  }
 0x609   : > { %5657 = vmatprep.subr.bf16.mxu0 %v11971_v44 }
 0x60a   : > { %v10689_v24 = vpop.f32.mrb[96].mxu1 }
 0x60b   : > { %v10690_v60 = vpop.f32.mrb[97].mxu1 }
 0x60c   : > { %v10691_v10 = vadd.f32 %v10690_v60, %v10689_v24  ;;  %5658 = vmatpush1.bf16.msra.mxu0 %v11969_v57  ;;  %v10692_v22 = vpop.f32.mrb[98].mxu1  ;;  %v12005_v24 = vld [vmem:[#allocation10 + $0xa98] ss:$12 sps:$4 sm:$0xff]   ;;  %v12010_v60 = vld [vmem:[#allocation10 + $0xab4] ss:$12 sps:$4 sm:$0xff]  }
 0x60d   : > { %v10693_v62 = vpop.f32.mrb[99].mxu1  ;;  %5659 = vmatprep.subr.bf16.mxu0 %v11974_v20 }
 0x60e   : > { %v5976_v9 = vadd.f32 %v10691_v10, %v5928_v17  ;;  %v10694_v21 = vadd.f32 %v10693_v62, %v10692_v22  ;;  %v11995_v17 = vld [vmem:[#allocation10 + $0xa3c] ss:$12 sps:$4 sm:$0xff]   ;;  %v12013_v22 = vld [vmem:[#allocation10 + $0xacc] ss:$12 sps:$4 sm:$0xff]   ;;  %v12016_v62 = vld [vmem:[#allocation10 + $0xae4] ss:$12 sps:$4 sm:$0xff]  }
 0x60f   : > { %v12008_v10 = vld [vmem:[#allocation10 + $0xab0] ss:$12 sps:$4 sm:$0xff]  }
 0x610   : > { %v5979_v4 = vadd.f32 %v10694_v21, %v5931_v36  ;;  %5660 = vmatpush1.bf16.msra.mxu0 %v11972_v0  ;;  %v11998_v36 = vld [vmem:[#allocation10 + $0xa54] ss:$12 sps:$4 sm:$0xff]  }
 0x611   : > { %5661 = vmatprep.subr.bf16.mxu0 %v11977_v39  ;;  %v12011_v0 = vld [vmem:[#allocation10 + $0xac8] ss:$12 sps:$4 sm:$0xff]   ;;  %v12017_v39 = vld [vmem:[#allocation10 + $0xaf8] ss:$12 sps:$4 sm:$0xff]  }
 0x612   : > { %v10695_v11 = vpop.f32.mrb[100].mxu1 }
 0x613   : > { %v10696_v25 = vpop.f32.mrb[101].mxu1 }
 0x614   : > { %v10697_v48 = vadd.f32 %v10696_v25, %v10695_v11  ;;  %5662 = vmatpush1.bf16.msra.mxu0 %v11975_v5  ;;  %v10698_v28 = vpop.f32.mrb[102].mxu1  ;;  %v12020_v5 = vld [vmem:[#allocation10 + $0xb10] ss:$12 sps:$4 sm:$0xff]   ;;  %v12025_v11 = vld [vmem:[#allocation10 + $0xb2c] ss:$12 sps:$4 sm:$0xff]  }
 0x615   : > { %5663 = vmatprep.subr.bf16.mxu0 %v11980_v55  ;;  %v10699_v23 = vpop.f32.mrb[103].mxu1 }
 0x616   : > { %v5984_v33 = vadd.f32 %v10697_v48, %v5936_v46  ;;  %v11999_v46 = vld [vmem:[#allocation10 + $0xa68] ss:$12 sps:$4 sm:$0xff]   ;;  %v12028_v23 = vld [vmem:[#allocation10 + $0xb44] ss:$12 sps:$4 sm:$0xff]  }
 0x618   : > { %5664 = vmatpush1.bf16.msra.mxu0 %v11978_v1  ;;  %v12023_v1 = vld [vmem:[#allocation10 + $0xb28] ss:$12 sps:$4 sm:$0xff]  }
 0x619   : > { %5665 = vmatprep.subr.bf16.mxu0 %v11983_v30 }
 0x61c   : > { %5666 = vmatpush1.bf16.msra.mxu0 %v11981_v3  ;;  %v12026_v3 = vld [vmem:[#allocation10 + $0xb40] ss:$12 sps:$4 sm:$0xff]  }
 0x61d   : > { %5667 = vmatprep.subr.bf16.mxu0 %v11986_v61 }
 0x620   : > { %5668 = vmatpush1.bf16.msra.mxu0 %v11984_v27 }
 0x621   : > { %5669 = vmatprep.subr.bf16.mxu0 %v11989_v35  ;;  %v12031_v35 = vld [vmem:[#allocation10 + $0xb5c] ss:$12 sps:$4 sm:$0xff]  }
 0x624   : > { %5670 = vmatpush1.bf16.msra.mxu0 %v11987_v8 }
 0x625   : > { %5671 = vmatprep.subr.bf16.mxu0 %v11992_v37 }
 0x628   : > { %5672 = vmatpush1.bf16.msra.mxu0 %v11990_v34  ;;  %v12029_v34 = vld [vmem:[#allocation10 + $0xb58] ss:$12 sps:$4 sm:$0xff]  }
 0x629   : > { %5673 = vmatprep.subr.bf16.mxu0 %v11995_v17  ;;  %v12034_v17 = vld [vmem:[#allocation10 + $0xb74] ss:$12 sps:$4 sm:$0xff]  }
 0x62b   : > { %v10717_v32 = vpop.f32.mrb[104].mxu1 }
 0x62c   : > { %v10718_v51 = vpop.f32.mrb[105].mxu1  ;;  %5674 = vmatpush1.bf16.msra.mxu0 %v11993_v29  ;;  %v12032_v29 = vld [vmem:[#allocation10 + $0xb70] ss:$12 sps:$4 sm:$0xff]  }
 0x62d   : > { %v10719_v2 = vadd.f32 %v10718_v51, %v10717_v32  ;;  %v10720_v13 = vpop.f32.mrb[106].mxu1  ;;  %5675 = vmatprep.subr.bf16.mxu0 %v11998_v36  ;;  %v12037_v36 = vld [vmem:[#allocation10 + $0xb8c] ss:$12 sps:$4 sm:$0xff]   ;;  %v12035_v32 = vld [vmem:[#allocation10 + $0xb88] ss:$12 sps:$4 sm:$0xff]  }
 0x62e   : > { %v10721_v42 = vpop.f32.mrb[107].mxu1  ;;  %v12040_v51 = vld [vmem:[#allocation10 + $0xba4] ss:$12 sps:$4 sm:$0xff]  }
 0x62f   : > { %v6024_v6 = vadd.f32 %v10719_v2, %v5976_v9  ;;  %v10722_v50 = vadd.f32 %v10721_v42, %v10720_v13  ;;  %v12022_v9 = vld [vmem:[#allocation10 + $0xb14] ss:$12 sps:$4 sm:$0xff]   ;;  %v12043_v2 = vld [vmem:[#allocation10 + $0xbbc] ss:$12 sps:$4 sm:$0xff]   ;;  %v12041_v13 = vld [vmem:[#allocation10 + $0xbb8] ss:$12 sps:$4 sm:$0xff]  }
 0x630   : > { %5676 = vmatpush1.bf16.msra.mxu0 %v11996_v49  ;;  %v12038_v49 = vld [vmem:[#allocation10 + $0xba0] ss:$12 sps:$4 sm:$0xff]  }
 0x631   : > { %v6027_v63 = vadd.f32 %v10722_v50, %v5979_v4  ;;  %5677 = vmatprep.subr.bf16.mxu0 %v12001_v40  ;;  %v12046_v40 = vld [vmem:[#allocation10 + $0xbd4] ss:$12 sps:$4 sm:$0xff]   ;;  %v12044_v50 = vld [vmem:[#allocation10 + $0xbd0] ss:$12 sps:$4 sm:$0xff]  }
 0x633   : > { %v10723_v53 = vpop.f32.mrb[108].mxu1 }
 0x634   : > { %v10724_v59 = vpop.f32.mrb[109].mxu1  ;;  %5678 = vmatpush1.bf16.msra.mxu0 %v11999_v46 }
 0x635   : > { %v10725_v58 = vadd.f32 %v10724_v59, %v10723_v53  ;;  %5698 = vmatprep.subr.bf16.mxu0 %v12004_v52  ;;  %v10726_v44 = vpop.f32.mrb[110].mxu1  ;;  %v12049_v52 = vld [vmem:[#allocation10 + $0xbec] ss:$12 sps:$4 sm:$0xff]  }
 0x636   : > { %v10727_v57 = vpop.f32.mrb[111].mxu1 }
 0x637   : > { %v6032_v20 = vadd.f32 %v10725_v58, %v5984_v33  ;;  %5680 = vmatmul.mubr.bf16.vlgmr.msra.gmra.mrb[64].mxu0 %v13882_v26  ;;  %v12014_v26 = vld [vmem:[#allocation10 + $0xae0] ss:$12 sps:$4 sm:$0xff]   ;;  %v12047_v58 = vld [vmem:[#allocation10 + $0xbe8] ss:$12 sps:$4 sm:$0xff]  }
 0x638   : > { %5689 = vmatprep.mubr.bf16.mxu0 %v13957_v45  ;;  %5699 = vmatpush1.bf16.msra.mxu0 %v12002_v31  ;;  %v12019_v45 = vld [vmem:[#allocation10 + $0xafc] ss:$12 sps:$4 sm:$0xff]  }
 0x639   : > { %5700 = vmatprep.subr.bf16.mxu0 %v12007_v56 }
 0x63c   : > { %5701 = vmatpush1.bf16.msra.mxu0 %v12005_v24 }
 0x63d   : > { %5702 = vmatprep.subr.bf16.mxu0 %v12010_v60 }
 0x63f   : > { %5690 = vmatmul.mubr.bf16.gmra.mrb[68].mxu0 %v13964_v7 }
 0x640   : > { %5703 = vmatpush1.bf16.msra.mxu0 %v12008_v10  ;;  %5730 = vmatprep.mubr.bf16.mxu0 %v13908_v43 }
 0x641   : > { %5704 = vmatprep.subr.bf16.mxu0 %v12013_v22 }
 0x644   : > { %5705 = vmatpush1.bf16.msra.mxu0 %v12011_v0 }
 0x645   : > { %5706 = vmatprep.subr.bf16.mxu0 %v12016_v62 }
 0x648   : > { %5707 = vmatpush1.bf16.msra.mxu0 %v12014_v26  ;;  %v3281_v26 = vrot.slane %v13982_v54, %v13642_v15 }
 0x649   : > { %5708 = vmatprep.subr.bf16.mxu0 %v12019_v45  ;;  %v3285_v45 = vrot.slane %v13982_v54, %v13648_v18 }
 0x64b   : > { %v10745_v21 = vpop.f32.mrb[112].mxu1 }
 0x64c   : > { %v10746_v4 = vpop.f32.mrb[113].mxu1  ;;  %5709 = vmatpush1.bf16.msra.mxu0 %v12017_v39 }
 0x64d   : > { %v10747_v55 = vadd.f32 %v10746_v4, %v10745_v21  ;;  %v10748_v7 = vpop.f32.mrb[114].mxu1  ;;  %5710 = vmatprep.subr.bf16.mxu0 %v12022_v9 }
 0x64e   : > { %v10749_v25 = vpop.f32.mrb[115].mxu1 }
 0x64f   : > { %v6072_v43 = vadd.f32 %v10747_v55, %v6024_v6  ;;  %v10750_v48 = vadd.f32 %v10749_v25, %v10748_v7 }
 0x650   : > { %5711 = vmatpush1.bf16.msra.mxu0 %v12020_v5 }
 0x651   : > { %v6075_v28 = vadd.f32 %v10750_v48, %v6027_v63  ;;  %5712 = vmatprep.subr.bf16.mxu0 %v12025_v11 }
 0x653   : > { %v10751_v30 = vpop.f32.mrb[116].mxu1 }
 0x654   : > { %v10752_v33 = vpop.f32.mrb[117].mxu1  ;;  %5713 = vmatpush1.bf16.msra.mxu0 %v12023_v1 }
 0x655   : > { %v10753_v61 = vadd.f32 %v10752_v33, %v10751_v30  ;;  %5714 = vmatprep.subr.bf16.mxu0 %v12028_v23  ;;  %v10754_v27 = vpop.f32.mrb[118].mxu1 }
 0x656   : > { %v10755_v8 = vpop.f32.mrb[119].mxu1 }
 0x657   : > { %v6080_v37 = vadd.f32 %v10753_v61, %v6032_v20 }
 0x658   : > { %5715 = vmatpush1.bf16.msra.mxu0 %v12026_v3 }
 0x659   : > { %5716 = vmatprep.subr.bf16.mxu0 %v12031_v35 }
 0x65c   : > { %5717 = vmatpush1.bf16.msra.mxu0 %v12029_v34  ;;  %v6148_v34 = vld [vmem:[#allocation13] sm:$0xf] }
 0x65d   : > { %5718 = vmatprep.subr.bf16.mxu0 %v12034_v17  ;;  %v13161_v17 = vmov 0.0  }
 0x660   : > { %5719 = vmatpush1.bf16.msra.mxu0 %v12032_v29 }
 0x661   : > { %5720 = vmatprep.subr.bf16.mxu0 %v12037_v36 }
 0x664   : > { %5721 = vmatpush1.bf16.msra.mxu0 %v12035_v32  ;;  %v6248_v32 = vld [vmem:[#allocation13 + $0x4] sm:$0xf] }
 0x665   : > { %5722 = vmatprep.subr.bf16.mxu0 %v12040_v51  ;;  %v6337_v51 = vld [vmem:[#allocation13 + $0x8] sm:$0xf] }
 0x668   : > { %5723 = vmatpush1.bf16.msra.mxu0 %v12038_v49  ;;  %v6426_v49 = vld [vmem:[#allocation13 + $0xc] sm:$0xf] }
 0x669   : > { %5724 = vmatprep.subr.bf16.mxu0 %v12043_v2  ;;  %v12052_v2 = vld [vmem:[#allocation14 + $0x4] ss:$8 sps:$4 sm:$0xff]  }
 0x66b   : > { %v10773_v42 = vpop.f32.mrb[120].mxu1 }
 0x66c   : > { %v10774_v6 = vpop.f32.mrb[121].mxu1  ;;  %5725 = vmatpush1.bf16.msra.mxu0 %v12041_v13  ;;  %v12050_v13 = vld [vmem:[#allocation14] ss:$8 sps:$4 sm:$0xff]  }
 0x66d   : > { %v10775_v46 = vadd.f32 %v10774_v6, %v10773_v42  ;;  %v10776_v63 = vpop.f32.mrb[122].mxu1  ;;  %5726 = vmatprep.subr.bf16.mxu0 %v12046_v40  ;;  %v12055_v40 = vld [vmem:[#allocation14 + $0x14] ss:$8 sps:$4 sm:$0xff]   ;;  %v12053_v42 = vld [vmem:[#allocation14 + $0x10] ss:$8 sps:$4 sm:$0xff]  }
 0x66e   : > { %v10777_v53 = vpop.f32.mrb[123].mxu1  ;;  %v12058_v6 = vld [vmem:[#allocation14 + $0x24] ss:$8 sps:$4 sm:$0xff]  }
 0x66f   : > { %v6120_v59 = vadd.f32 %v10775_v46, %v6072_v43  ;;  %v10778_v31 = vadd.f32 %v10777_v53, %v10776_v63  ;;  %v12061_v46 = vld [vmem:[#allocation14 + $0x34] ss:$8 sps:$4 sm:$0xff]   ;;  %v12059_v63 = vld [vmem:[#allocation14 + $0x30] ss:$8 sps:$4 sm:$0xff]   ;;  %v12062_v53 = vld [vmem:[#allocation14 + $0x40] ss:$8 sps:$4 sm:$0xff]  }
 0x670   : > { %5727 = vmatpush1.bf16.msra.mxu0 %v12044_v50  ;;  %v12056_v50 = vld [vmem:[#allocation14 + $0x20] ss:$8 sps:$4 sm:$0xff]  }
 0x671   : > { %v6123_v56 = vadd.f32 %v10778_v31, %v6075_v28  ;;  %5728 = vmatprep.subr.bf16.mxu0 %v12049_v52  ;;  %12626 = vtanh.f32 %v6120_v59  ;;  %v12064_v52 = vld [vmem:[#allocation14 + $0x44] ss:$8 sps:$4 sm:$0xff]   ;;  %v12067_v59 = vld [vmem:[#allocation14 + $0x54] ss:$8 sps:$4 sm:$0xff]   ;;  %v12065_v31 = vld [vmem:[#allocation14 + $0x50] ss:$8 sps:$4 sm:$0xff]  }
 0x673   : > { %12628 = vtanh.f32 %v6123_v56  ;;  %v10779_v44 = vpop.f32.mrb[124].mxu1  ;;  %v12068_v56 = vld [vmem:[#allocation14 + $0x60] ss:$8 sps:$4 sm:$0xff]  }
 0x674   : > { %v10780_v57 = vpop.f32.mrb[125].mxu1  ;;  %5729 = vmatpush1.bf16.msra.mxu0 %v12047_v58  ;;  %v12070_v58 = vld [vmem:[#allocation14 + $0x64] ss:$8 sps:$4 sm:$0xff]  }
 0x675   : > { %v10781_v20 = vadd.f32 %v10780_v57, %v10779_v44  ;;  %v10782_v24 = vpop.f32.mrb[126].mxu1  ;;  %v12073_v44 = vld [vmem:[#allocation14 + $0x74] ss:$8 sps:$4 sm:$0xff]   ;;  %v12071_v57 = vld [vmem:[#allocation14 + $0x70] ss:$8 sps:$4 sm:$0xff]  }
 0x676   : > { %v10783_v60 = vpop.f32.mrb[127].mxu1  ;;  %v12074_v24 = vld [vmem:[#allocation14 + $0x80] ss:$8 sps:$4 sm:$0xff]  }
 0x677   : > { %v6128_v10 = vadd.f32 %v10781_v20, %v6080_v37  ;;  %5731 = vmatmul.mubr.bf16.vlgmr.msra.gmra.mrb[64].mxu0 %v13906_v41  ;;  %v12076_v20 = vld [vmem:[#allocation14 + $0x84] ss:$8 sps:$4 sm:$0xff]   ;;  %v12079_v60 = vld [vmem:[#allocation14 + $0x94] ss:$8 sps:$4 sm:$0xff]  }
 0x678   : > { %5740 = vmatprep.mubr.bf16.mxu0 %v13972_v38 }
 0x67b   : > { %v12627_v22 = vpop.eup %12626 }
 0x67d   : > { %v12629_v0 = vpop.eup %12628 }
 0x67e   : > { %v14000_v62 = vpack.c.bf16 %v12629_v0, %v12627_v22  ;;  %v12082_v22 = vld [vmem:[#allocation14 + $0xa4] ss:$8 sps:$4 sm:$0xff]   ;;  %v12080_v0 = vld [vmem:[#allocation14 + $0xa0] ss:$8 sps:$4 sm:$0xff]  }
 0x67f   : > { %5741 = vmatmul.mubr.bf16.gmra.mrb[68].mxu0 %v13978_v47 }
 0x680   : > { %8019 = vmatprep.mubr.bf16.mxu0 %v13160_v12 }
 0x74a   : > { %v5732_v39 = vpop.f32.mrb[64].mxu0 }
 0x74b   : > { %v11001_v9 = vadd.f32 %v5732_v39, %v3281_v26  ;;  %v5734_v21 = vpop.f32.mrb[65].mxu0  ;;  %v12086_v39 = vld [vmem:[#allocation14 + $0xc0] ss:$8 sps:$4 sm:$0xff]  }
 0x74c   : > { %v11002_v41 = vadd.f32 %v5734_v21, %v3285_v45  ;;  %v5736_v4 = vpop.f32.mrb[66].mxu0  ;;  %v12089_v21 = vld [vmem:[#allocation14 + $0xd0] ss:$8 sps:$4 sm:$0xff]  }
 0x74d   : > { %12630 = vtanh.f32 %v11001_v9  ;;  %v11003_v38 = vadd.f32 %v5736_v4, %v3281_v26  ;;  %v5738_v5 = vpop.f32.mrb[67].mxu0  ;;  %v12091_v9 = vld [vmem:[#allocation14 + $0xd4] ss:$8 sps:$4 sm:$0xff]   ;;  %v12092_v4 = vld [vmem:[#allocation14 + $0xe0] ss:$8 sps:$4 sm:$0xff]  }
 0x74e   : > { %12632 = vtanh.f32 %v11002_v41  ;;  %v11004_v55 = vadd.f32 %v5738_v5, %v3285_v45  ;;  %v12094_v41 = vld [vmem:[#allocation14 + $0xe4] ss:$8 sps:$4 sm:$0xff]   ;;  %v12095_v5 = vld [vmem:[#allocation14 + $0xf0] ss:$8 sps:$4 sm:$0xff]  }
 0x74f   : > { %12634 = vtanh.f32 %v11003_v38  ;;  %v12097_v38 = vld [vmem:[#allocation14 + $0xf4] ss:$8 sps:$4 sm:$0xff]  }
 0x750   : > { %12636 = vtanh.f32 %v11004_v55  ;;  %v12100_v55 = vld [vmem:[#allocation14 + $0x104] ss:$8 sps:$4 sm:$0xff]  }
 0x752   : > { %v5742_v47 = vpop.f32.mrb[68].mxu0 }
 0x753   : > { %v11005_v7 = vadd.f32 %v5742_v47, %v3281_v26  ;;  %v5744_v11 = vpop.f32.mrb[69].mxu0  ;;  %v12083_v26 = vld [vmem:[#allocation14 + $0xb0] ss:$8 sps:$4 sm:$0xff]  }
 0x754   : > { %v11006_v25 = vadd.f32 %v5744_v11, %v3285_v45  ;;  %v5746_v43 = vpop.f32.mrb[70].mxu0  ;;  %v12088_v45 = vld [vmem:[#allocation14 + $0xc4] ss:$8 sps:$4 sm:$0xff]  }
 0x755   : > { %12638 = vtanh.f32 %v11005_v7  ;;  %v5747_v48 = vpop.f32.mrb[71].mxu0  ;;  %v12098_v43 = vld [vmem:[#allocation14 + $0x100] ss:$8 sps:$4 sm:$0xff]  }
 0x756   : > { %12640 = vtanh.f32 %v11006_v25 }
 0x757   : > { %v12631_v54 = vpop.eup %12630  ;;  %12642 = vtanh.f32 %v6128_v10  ;;  %v12077_v10 = vld [vmem:[#allocation14 + $0x90] ss:$8 sps:$4 sm:$0xff]  }
 0x758   : > { %v12633_v1 = vpop.eup %12632 }
 0x759   : > { %v12635_v28 = vpop.eup %12634 }
 0x75a   : > { %v12637_v23 = vpop.eup %12636  ;;  %v6142_v30 = vpack.c.bf16 %v12635_v28, %v12631_v54  ;;  %v12101_v28 = vld [vmem:[#allocation14 + $0x110] ss:$8 sps:$4 sm:$0xff]  }
 0x75b   : > { %v6143_v33 = vpack.c.bf16 %v12637_v23, %v12633_v1  ;;  %v12103_v1 = vld [vmem:[#allocation14 + $0x114] ss:$8 sps:$4 sm:$0xff]   ;;  %v12106_v23 = vld [vmem:[#allocation14 + $0x124] ss:$8 sps:$4 sm:$0xff]  }
 0x75d   : > { %6163 = vmatprep.subr.bf16.mxu1 %v6143_v33 }
 0x75e   : > { %6164 = vmatpush1.bf16.msra.mxu1 %v6142_v30 }
 0x75f   : > { %v12639_v3 = vpop.eup %12638 }
 0x760   : > { %v12641_v61 = vpop.eup %12640  ;;  %v6145_v27 = vpack.c.bf16 %v12639_v3, %v12639_v3  ;;  %v12104_v3 = vld [vmem:[#allocation14 + $0x120] ss:$8 sps:$4 sm:$0xff]  }
 0x761   : > { %v6146_v35 = vpack.c.bf16 %v12641_v61, %v12641_v61  ;;  %v12643_v37 = vpop.eup %12642 }
 0x762   : > { %v6155_v8 = vsel %vm6153_vm2, %v6145_v27, 0  ;;  %v6147_v29 = vpack.c.bf16 %v12643_v37, %v12643_v37  ;;  %v12109_v27 = vld [vmem:[#allocation14 + $0x134] ss:$8 sps:$4 sm:$0xff]   ;;  %v12112_v37 = vld [vmem:[#allocation14 + $0x144] ss:$8 sps:$4 sm:$0xff]  }
 0x763   : > { %10140 = vmatprep.subr.msk.bf16.mxu1 %vm6153_vm2, %v6146_v35 }
 0x764   : > { %6166 = vmatpush1.bf16.msra.mxu1 %v6155_v8  ;;  %v6161_v36 = vsel %vm6153_vm2, %v6147_v29, 0 }
 0x765   : > { %10937 = vmatprep.subr.bf16.mxu1 %v13161_v17 }
 0x767   : > { %10141 = vmatmul.mubr.msk.bf16.vlgmr.msra.gmra.mrb[128].mxu1 %vm6149_vm3, %v6148_v34 }
 0x768   : > { %10938 = vmatpush3.bf16.msra.mxu1 %v14000_v62  ;;  %10941 = vmatprep.mubr.msk.bf16.mxu1 %vm13162_vm4, %v13161_v17 }
 0x769   : > { %10939 = vmatprep.subr.bf16.mxu1 %v13161_v17 }
 0x76c   : > { %10940 = vmatpush3.bf16.msra.mxu1 %v6161_v36 }
 0x76d   : > { %6252 = vmatprep.subr.bf16.mxu1 %v6143_v33 }
 0x76f   : > { %10942 = vmatmul.mubr.msk.bf16.vlgmr.msra.gmra.mrb[132].mxu1 %vm6149_vm3, %v6148_v34 }
 0x770   : > { %6253 = vmatpush1.bf16.msra.mxu1 %v6142_v30  ;;  %6284 = vmatprep.mubr.bf16.mxu1 %v13160_v12 }
 0x771   : > { %10143 = vmatprep.subr.msk.bf16.mxu1 %vm6153_vm2, %v6146_v35 }
 0x774   : > { %6255 = vmatpush1.bf16.msra.mxu1 %v6155_v8 }
 0x775   : > { %10945 = vmatprep.subr.bf16.mxu1 %v13161_v17 }
 0x777   : > { %10144 = vmatmul.mubr.msk.bf16.vlgmr.msra.gmra.mrb[136].mxu1 %vm6149_vm3, %v6248_v32 }
 0x778   : > { %10946 = vmatpush3.bf16.msra.mxu1 %v14000_v62  ;;  %10949 = vmatprep.mubr.msk.bf16.mxu1 %vm13162_vm4, %v13161_v17 }
 0x779   : > { %10947 = vmatprep.subr.bf16.mxu1 %v13161_v17 }
 0x77c   : > { %10948 = vmatpush3.bf16.msra.mxu1 %v6161_v36 }
 0x77d   : > { %6341 = vmatprep.subr.bf16.mxu1 %v6143_v33 }
 0x77f   : > { %10950 = vmatmul.mubr.msk.bf16.vlgmr.msra.gmra.mrb[140].mxu1 %vm6149_vm3, %v6248_v32 }
 0x780   : > { %6342 = vmatpush1.bf16.msra.mxu1 %v6142_v30  ;;  %6373 = vmatprep.mubr.bf16.mxu1 %v13160_v12 }
 0x781   : > { %10146 = vmatprep.subr.msk.bf16.mxu1 %vm6153_vm2, %v6146_v35 }
 0x784   : > { %6344 = vmatpush1.bf16.msra.mxu1 %v6155_v8 }
 0x785   : > { %10953 = vmatprep.subr.bf16.mxu1 %v13161_v17 }
 0x787   : > { %10147 = vmatmul.mubr.msk.bf16.vlgmr.msra.gmra.mrb[144].mxu1 %vm6149_vm3, %v6337_v51 }
 0x788   : > { %10954 = vmatpush3.bf16.msra.mxu1 %v14000_v62  ;;  %10957 = vmatprep.mubr.msk.bf16.mxu1 %vm13162_vm4, %v13161_v17 }
 0x789   : > { %10955 = vmatprep.subr.bf16.mxu1 %v13161_v17 }
 0x78c   : > { %10956 = vmatpush3.bf16.msra.mxu1 %v6161_v36 }
 0x78d   : > { %6430 = vmatprep.subr.bf16.mxu1 %v6143_v33 }
 0x78f   : > { %10958 = vmatmul.mubr.msk.bf16.vlgmr.msra.gmra.mrb[148].mxu1 %vm6149_vm3, %v6337_v51  ;;  %v12115_v51 = vld [vmem:[#allocation14 + $0x154] ss:$8 sps:$4 sm:$0xff]  }
 0x790   : > { %6431 = vmatpush1.bf16.msra.mxu1 %v6142_v30  ;;  %6462 = vmatprep.mubr.bf16.mxu1 %v13160_v12 }
 0x791   : > { %10149 = vmatprep.subr.msk.bf16.mxu1 %vm6153_vm2, %v6146_v35 }
 0x794   : > { %6433 = vmatpush1.bf16.msra.mxu1 %v6155_v8  ;;  %v12107_v8 = vld [vmem:[#allocation14 + $0x130] ss:$8 sps:$4 sm:$0xff]  }
 0x795   : > { %10961 = vmatprep.subr.bf16.mxu1 %v13161_v17 }
 0x797   : > { %10150 = vmatmul.mubr.msk.bf16.vlgmr.msra.gmra.mrb[152].mxu1 %vm6149_vm3, %v6426_v49 }
 0x798   : > { %10962 = vmatpush3.bf16.msra.mxu1 %v14000_v62  ;;  %10965 = vmatprep.mubr.msk.bf16.mxu1 %vm13162_vm4, %v13161_v17  ;;  %v12085_v62 = vld [vmem:[#allocation14 + $0xb4] ss:$8 sps:$4 sm:$0xff]  }
 0x799   : > { %10963 = vmatprep.subr.bf16.mxu1 %v13161_v17 }
 0x79c   : > { %10964 = vmatpush3.bf16.msra.mxu1 %v6161_v36  ;;  %v12110_v36 = vld [vmem:[#allocation14 + $0x140] ss:$8 sps:$4 sm:$0xff]  }
 0x79d   : > { %7678 = vmatprep.subr.bf16.mxu1 %v12052_v2  ;;  %v12113_v2 = vld [vmem:[#allocation14 + $0x150] ss:$8 sps:$4 sm:$0xff]  }
 0x79f   : > { %10966 = vmatmul.mubr.msk.bf16.vlgmr.msra.gmra.mrb[156].mxu1 %vm6149_vm3, %v6426_v49 }
 0x7a0   : > { %7679 = vmatpush1.bf16.msra.mxu1 %v12050_v13  ;;  %v12118_v13 = vld [vmem:[#allocation14 + $0x164] ss:$8 sps:$4 sm:$0xff]  }
 0x7a1   : > { %7680 = vmatprep.subr.bf16.mxu1 %v12055_v40 }
 0x7a4   : > { %7681 = vmatpush1.bf16.msra.mxu1 %v12053_v42 }
 0x7a5   : > { %7682 = vmatprep.subr.bf16.mxu1 %v12058_v6  ;;  %v12116_v6 = vld [vmem:[#allocation14 + $0x160] ss:$8 sps:$4 sm:$0xff]  }
 0x7a8   : > { %7683 = vmatpush1.bf16.msra.mxu1 %v12056_v50 }
 0x7a9   : > { %7684 = vmatprep.subr.bf16.mxu1 %v12061_v46  ;;  %v12121_v46 = vld [vmem:[#allocation14 + $0x174] ss:$8 sps:$4 sm:$0xff]  }
 0x7ac   : > { %7685 = vmatpush1.bf16.msra.mxu1 %v12059_v63 }
 0x7ad   : > { %7686 = vmatprep.subr.bf16.mxu1 %v12064_v52  ;;  %v12119_v52 = vld [vmem:[#allocation14 + $0x170] ss:$8 sps:$4 sm:$0xff]  }
 0x7b0   : > { %7687 = vmatpush1.bf16.msra.mxu1 %v12062_v53  ;;  %v12124_v53 = vld [vmem:[#allocation14 + $0x184] ss:$8 sps:$4 sm:$0xff]  }
 0x7b1   : > { %7688 = vmatprep.subr.bf16.mxu1 %v12067_v59 }
 0x7b4   : > { %7689 = vmatpush1.bf16.msra.mxu1 %v12065_v31 }
 0x7b5   : > { %7690 = vmatprep.subr.bf16.mxu1 %v12070_v58  ;;  %v12122_v58 = vld [vmem:[#allocation14 + $0x180] ss:$8 sps:$4 sm:$0xff]  }
 0x7b8   : > { %7691 = vmatpush1.bf16.msra.mxu1 %v12068_v56 }
 0x7b9   : > { %7692 = vmatprep.subr.bf16.mxu1 %v12073_v44  ;;  %v12127_v44 = vld [vmem:[#allocation14 + $0x194] ss:$8 sps:$4 sm:$0xff]  }
 0x7bc   : > { %7693 = vmatpush1.bf16.msra.mxu1 %v12071_v57 }
 0x7bd   : > { %7694 = vmatprep.subr.bf16.mxu1 %v12076_v20  ;;  %v12125_v20 = vld [vmem:[#allocation14 + $0x190] ss:$8 sps:$4 sm:$0xff]  }
 0x7c0   : > { %7695 = vmatpush1.bf16.msra.mxu1 %v12074_v24  ;;  %v12130_v24 = vld [vmem:[#allocation14 + $0x1a4] ss:$8 sps:$4 sm:$0xff]  }
 0x7c1   : > { %7696 = vmatprep.subr.bf16.mxu1 %v12079_v60 }
 0x7c4   : > { %7697 = vmatpush1.bf16.msra.mxu1 %v12077_v10 }
 0x7c5   : > { %7698 = vmatprep.subr.bf16.mxu1 %v12082_v22  ;;  %v12128_v22 = vld [vmem:[#allocation14 + $0x1a0] ss:$8 sps:$4 sm:$0xff]  }
 0x7c8   : > { %7699 = vmatpush1.bf16.msra.mxu1 %v12080_v0 }
 0x7c9   : > { %7700 = vmatprep.subr.bf16.mxu1 %v12085_v62  ;;  %v12133_v62 = vld [vmem:[#allocation14 + $0x1b4] ss:$8 sps:$4 sm:$0xff]  }
 0x7cc   : > { %7701 = vmatpush1.bf16.msra.mxu1 %v12083_v26 }
 0x7cd   : > { %7702 = vmatprep.subr.bf16.mxu1 %v12088_v45  ;;  %v12131_v45 = vld [vmem:[#allocation14 + $0x1b0] ss:$8 sps:$4 sm:$0xff]  }
 0x7d0   : > { %7703 = vmatpush1.bf16.msra.mxu1 %v12086_v39  ;;  %v12136_v39 = vld [vmem:[#allocation14 + $0x1c4] ss:$8 sps:$4 sm:$0xff]  }
 0x7d1   : > { %7704 = vmatprep.subr.bf16.mxu1 %v12091_v9 }
 0x7d4   : > { %7705 = vmatpush1.bf16.msra.mxu1 %v12089_v21 }
 0x7d5   : > { %7706 = vmatprep.subr.bf16.mxu1 %v12094_v41  ;;  %v12134_v41 = vld [vmem:[#allocation14 + $0x1c0] ss:$8 sps:$4 sm:$0xff]  }
 0x7d8   : > { %7707 = vmatpush1.bf16.msra.mxu1 %v12092_v4 }
 0x7d9   : > { %7708 = vmatprep.subr.bf16.mxu1 %v12097_v38  ;;  %v12139_v38 = vld [vmem:[#allocation14 + $0x1d4] ss:$8 sps:$4 sm:$0xff]  }
 0x7dc   : > { %7709 = vmatpush1.bf16.msra.mxu1 %v12095_v5 }
 0x7dd   : > { %7719 = vmatprep.subr.bf16.mxu1 %v12100_v55  ;;  %v12137_v55 = vld [vmem:[#allocation14 + $0x1d0] ss:$8 sps:$4 sm:$0xff]  }
 0x83a   : > { %v6197_v47 = vpop.f32.mrb[128].mxu1 }
 0x83b   : > { %v6199_v7 = vpop.f32.mrb[129].mxu1  ;;  %v6244_v48 = vpack.c.bf16 %v6197_v47, %v6197_v47  ;;  %v12142_v47 = vld [vmem:[#allocation14 + $0x1e4] ss:$8 sps:$4 sm:$0xff]  }
 0x83c   : > { %v6245_v11 = vpack.c.bf16 %v6199_v7, %v6199_v7  ;;  %v6201_v25 = vpop.f32.mrb[130].mxu1 }
 0x83d   : > { %v6202_v54 = vpop.f32.mrb[131].mxu1  ;;  %v12140_v25 = vld [vmem:[#allocation14 + $0x1e0] ss:$8 sps:$4 sm:$0xff]  }
 0x83e   : > { %7710 = vmatprep.mubr.bf16.mxu1 %v6245_v11 }
 0x83f   : > { %7711 = vmatmul.mubr.bf16.vlgmr.msra.gmra.mrb[160].mxu1 %v6244_v48  ;;  %v12145_v48 = vld [vmem:[#allocation14 + $0x1f4] ss:$8 sps:$4 sm:$0xff]  }
 0x840   : > { %7720 = vmatpush1.bf16.msra.mxu1 %v12098_v43 }
 0x841   : > { %7721 = vmatprep.subr.bf16.mxu1 %v12103_v1  ;;  %v12143_v1 = vld [vmem:[#allocation14 + $0x1f0] ss:$8 sps:$4 sm:$0xff]  }
 0x842   : > { %v14033_v30 = vpop.f32.mrb[132].mxu1 }
 0x843   : > { %v10943_v33 = vpop.f32.mrb[133].mxu1 }
 0x844   : > { %7722 = vmatpush1.bf16.msra.mxu1 %v12101_v28  ;;  %v6241_v61 = vpop.f32.mrb[134].mxu1  ;;  %v12148_v28 = vld [vmem:[#allocation14 + $0x204] ss:$8 sps:$4 sm:$0xff]  }
 0x845   : > { %7723 = vmatprep.subr.bf16.mxu1 %v12106_v23  ;;  %v10944_v35 = vpop.f32.mrb[135].mxu1  ;;  %v12146_v23 = vld [vmem:[#allocation14 + $0x200] ss:$8 sps:$4 sm:$0xff]   ;;  %v12151_v61 = vld [vmem:[#allocation14 + $0x214] ss:$8 sps:$4 sm:$0xff]  }
 0x846   : > { %v12154_v35 = vld [vmem:[#allocation14 + $0x224] ss:$8 sps:$4 sm:$0xff]  }
 0x848   : > { %7724 = vmatpush1.bf16.msra.mxu1 %v12104_v3  ;;  %v6246_v3 = vpack.c.bf16 %v14033_v30, %v14033_v30  ;;  %v12163_v30 = vld [vmem:[#allocation14 + $0x254] ss:$8 sps:$4 sm:$0xff]  }
 0x849   : > { %7725 = vmatprep.subr.bf16.mxu1 %v12109_v27  ;;  %v12149_v27 = vld [vmem:[#allocation14 + $0x210] ss:$8 sps:$4 sm:$0xff]  }
 0x84a   : > { %v6286_v34 = vpop.f32.mrb[136].mxu1 }
 0x84b   : > { %v6333_v17 = vpack.c.bf16 %v6286_v34, %v6286_v34  ;;  %v14035_v29 = vpop.f32.mrb[137].mxu1  ;;  %v12155_v34 = vld [vmem:[#allocation14 + $0x230] ss:$8 sps:$4 sm:$0xff]  }
 0x84c   : > { %7726 = vmatpush1.bf16.msra.mxu1 %v12107_v8  ;;  %v6290_v32 = vpop.f32.mrb[138].mxu1  ;;  %v12152_v8 = vld [vmem:[#allocation14 + $0x220] ss:$8 sps:$4 sm:$0xff]  }
 0x84d   : > { %7727 = vmatprep.subr.bf16.mxu1 %v12112_v37  ;;  %v6291_v49 = vpop.f32.mrb[139].mxu1  ;;  %7751 = vmatprep.mubr.bf16.mxu1 %v6333_v17  ;;  %v12157_v37 = vld [vmem:[#allocation14 + $0x234] ss:$8 sps:$4 sm:$0xff]   ;;  %v12160_v17 = vld [vmem:[#allocation14 + $0x244] ss:$8 sps:$4 sm:$0xff]  }
 0x84e   : > { %v12161_v32 = vld [vmem:[#allocation14 + $0x250] ss:$8 sps:$4 sm:$0xff]   ;;  %v12164_v49 = vld [vmem:[#allocation14 + $0x260] ss:$8 sps:$4 sm:$0xff]  }
 0x850   : > { %7728 = vmatpush1.bf16.msra.mxu1 %v12110_v36  ;;  %v12158_v36 = vld [vmem:[#allocation14 + $0x240] ss:$8 sps:$4 sm:$0xff]  }
 0x851   : > { %7729 = vmatprep.subr.bf16.mxu1 %v12115_v51  ;;  %v12166_v51 = vld [vmem:[#allocation14 + $0x264] ss:$8 sps:$4 sm:$0xff]  }
 0x852   : > { %v14037_v40 = vpop.f32.mrb[140].mxu1 }
 0x853   : > { %v10951_v42 = vpop.f32.mrb[141].mxu1  ;;  %v6335_v33 = vpack.c.bf16 %v14037_v40, %v14037_v40  ;;  %v12172_v40 = vld [vmem:[#allocation14 + $0x284] ss:$8 sps:$4 sm:$0xff]  }
 0x854   : > { %7730 = vmatpush1.bf16.msra.mxu1 %v12113_v2  ;;  %v6330_v50 = vpop.f32.mrb[142].mxu1  ;;  %v12169_v2 = vld [vmem:[#allocation14 + $0x274] ss:$8 sps:$4 sm:$0xff]   ;;  %v12170_v42 = vld [vmem:[#allocation14 + $0x280] ss:$8 sps:$4 sm:$0xff]  }
 0x855   : > { %7731 = vmatprep.subr.bf16.mxu1 %v12118_v13  ;;  %v10952_v63 = vpop.f32.mrb[143].mxu1  ;;  %v12167_v13 = vld [vmem:[#allocation14 + $0x270] ss:$8 sps:$4 sm:$0xff]  }
 0x856   : > { %v12173_v50 = vld [vmem:[#allocation14 + $0x290] ss:$8 sps:$4 sm:$0xff]   ;;  %v12176_v63 = vld [vmem:[#allocation14 + $0x2a0] ss:$8 sps:$4 sm:$0xff]  }
 0x858   : > { %7732 = vmatpush1.bf16.msra.mxu1 %v12116_v6  ;;  %v12175_v6 = vld [vmem:[#allocation14 + $0x294] ss:$8 sps:$4 sm:$0xff]  }
 0x859   : > { %7733 = vmatprep.subr.bf16.mxu1 %v12121_v46  ;;  %v12178_v46 = vld [vmem:[#allocation14 + $0x2a4] ss:$8 sps:$4 sm:$0xff]  }
 0x85a   : > { %v14039_v59 = vpop.f32.mrb[144].mxu1 }
 0x85b   : > { %v14041_v31 = vpop.f32.mrb[145].mxu1 }
 0x85c   : > { %7734 = vmatpush1.bf16.msra.mxu1 %v12119_v52  ;;  %v6379_v56 = vpop.f32.mrb[146].mxu1  ;;  %v12181_v52 = vld [vmem:[#allocation14 + $0x2b4] ss:$8 sps:$4 sm:$0xff]  }
 0x85d   : > { %7735 = vmatprep.subr.bf16.mxu1 %v12124_v53  ;;  %v6380_v57 = vpop.f32.mrb[147].mxu1  ;;  %v12179_v53 = vld [vmem:[#allocation14 + $0x2b0] ss:$8 sps:$4 sm:$0xff]   ;;  %v12182_v56 = vld [vmem:[#allocation14 + $0x2c0] ss:$8 sps:$4 sm:$0xff]  }
 0x85e   : > { %v12185_v57 = vld [vmem:[#allocation14 + $0x2d0] ss:$8 sps:$4 sm:$0xff]  }
 0x860   : > { %7736 = vmatpush1.bf16.msra.mxu1 %v12122_v58  ;;  %v12184_v58 = vld [vmem:[#allocation14 + $0x2c4] ss:$8 sps:$4 sm:$0xff]  }
 0x861   : > { %7737 = vmatprep.subr.bf16.mxu1 %v12127_v44  ;;  %v12187_v44 = vld [vmem:[#allocation14 + $0x2d4] ss:$8 sps:$4 sm:$0xff]  }
 0x862   : > { %v14043_v60 = vpop.f32.mrb[148].mxu1 }
 0x863   : > { %v10959_v10 = vpop.f32.mrb[149].mxu1 }
 0x864   : > { %7738 = vmatpush1.bf16.msra.mxu1 %v12125_v20  ;;  %v6419_v0 = vpop.f32.mrb[150].mxu1  ;;  %v12190_v20 = vld [vmem:[#allocation14 + $0x2e4] ss:$8 sps:$4 sm:$0xff]   ;;  %v12193_v10 = vld [vmem:[#allocation14 + $0x2f4] ss:$8 sps:$4 sm:$0xff]  }
 0x865   : > { %7739 = vmatprep.subr.bf16.mxu1 %v12130_v24  ;;  %v10960_v26 = vpop.f32.mrb[151].mxu1  ;;  %v12188_v24 = vld [vmem:[#allocation14 + $0x2e0] ss:$8 sps:$4 sm:$0xff]   ;;  %v12196_v0 = vld [vmem:[#allocation14 + $0x304] ss:$8 sps:$4 sm:$0xff]  }
 0x866   : > { %v6334_v26 = vpack.c.bf16 %v14035_v29, %v14035_v29  ;;  %v12206_v29 = vld [vmem:[#allocation14 + $0x340] ss:$8 sps:$4 sm:$0xff]  }
 0x868   : > { %7740 = vmatpush1.bf16.msra.mxu1 %v12128_v22  ;;  %v12191_v22 = vld [vmem:[#allocation14 + $0x2f0] ss:$8 sps:$4 sm:$0xff]  }
 0x869   : > { %7741 = vmatprep.subr.bf16.mxu1 %v12133_v62  ;;  %v12194_v62 = vld [vmem:[#allocation14 + $0x300] ss:$8 sps:$4 sm:$0xff]  }
 0x86a   : > { %v14045_v9 = vpop.f32.mrb[152].mxu1 }
 0x86b   : > { %v14047_v21 = vpop.f32.mrb[153].mxu1 }
 0x86c   : > { %7742 = vmatpush1.bf16.msra.mxu1 %v12131_v45  ;;  %v6468_v4 = vpop.f32.mrb[154].mxu1  ;;  %v12199_v45 = vld [vmem:[#allocation14 + $0x314] ss:$8 sps:$4 sm:$0xff]  }
 0x86d   : > { %7743 = vmatprep.subr.bf16.mxu1 %v12136_v39  ;;  %v6469_v5 = vpop.f32.mrb[155].mxu1  ;;  %v6423_v39 = vpack.c.bf16 %v14041_v31, %v14041_v31  ;;  %v12202_v4 = vld [vmem:[#allocation14 + $0x324] ss:$8 sps:$4 sm:$0xff]   ;;  %v12209_v31 = vld [vmem:[#allocation14 + $0x350] ss:$8 sps:$4 sm:$0xff]  }
 0x86e   : > { %v12205_v5 = vld [vmem:[#allocation14 + $0x334] ss:$8 sps:$4 sm:$0xff]  }
 0x870   : > { %7744 = vmatpush1.bf16.msra.mxu1 %v12134_v41  ;;  %v12197_v41 = vld [vmem:[#allocation14 + $0x310] ss:$8 sps:$4 sm:$0xff]  }
 0x871   : > { %7745 = vmatprep.subr.bf16.mxu1 %v12139_v38  ;;  %v12200_v38 = vld [vmem:[#allocation14 + $0x320] ss:$8 sps:$4 sm:$0xff]  }
 0x872   : > { %v14049_v7 = vpop.f32.mrb[156].mxu1 }
 0x873   : > { %v10967_v11 = vpop.f32.mrb[157].mxu1 }
 0x874   : > { %7746 = vmatpush1.bf16.msra.mxu1 %v12137_v55  ;;  %v6508_v43 = vpop.f32.mrb[158].mxu1  ;;  %v12203_v55 = vld [vmem:[#allocation14 + $0x330] ss:$8 sps:$4 sm:$0xff]   ;;  %v12211_v11 = vld [vmem:[#allocation14 + $0x354] ss:$8 sps:$4 sm:$0xff]  }
 0x875   : > { %7747 = vmatprep.subr.bf16.mxu1 %v12142_v47  ;;  %v10968_v54 = vpop.f32.mrb[159].mxu1  ;;  %v12208_v47 = vld [vmem:[#allocation14 + $0x344] ss:$8 sps:$4 sm:$0xff]   ;;  %v12212_v43 = vld [vmem:[#allocation14 + $0x360] ss:$8 sps:$4 sm:$0xff]  }
 0x876   : > { %v12215_v54 = vld [vmem:[#allocation14 + $0x370] ss:$8 sps:$4 sm:$0xff]  }
 0x878   : > { %7748 = vmatpush1.bf16.msra.mxu1 %v12140_v25  ;;  %v12214_v25 = vld [vmem:[#allocation14 + $0x364] ss:$8 sps:$4 sm:$0xff]  }
 0x879   : > { %7749 = vmatprep.subr.bf16.mxu1 %v12145_v48  ;;  %v12217_v48 = vld [vmem:[#allocation14 + $0x374] ss:$8 sps:$4 sm:$0xff]  }
 0x87c   : > { %7750 = vmatpush1.bf16.msra.mxu1 %v12143_v1  ;;  %v12220_v1 = vld [vmem:[#allocation14 + $0x384] ss:$8 sps:$4 sm:$0xff]  }
 0x87d   : > { %7760 = vmatprep.subr.bf16.mxu1 %v12148_v28  ;;  %v12218_v28 = vld [vmem:[#allocation14 + $0x380] ss:$8 sps:$4 sm:$0xff]  }
 0x87f   : > { %7752 = vmatmul.mubr.bf16.vlgmr.msra.gmra.mrb[160].mxu1 %v6246_v3  ;;  %v12226_v3 = vld [vmem:[#allocation14 + $0x3a4] ss:$8 sps:$4 sm:$0xff]  }
 0x880   : > { %7761 = vmatpush1.bf16.msra.mxu1 %v12146_v23  ;;  %7792 = vmatprep.mubr.bf16.mxu1 %v6335_v33  ;;  %v12223_v23 = vld [vmem:[#allocation14 + $0x394] ss:$8 sps:$4 sm:$0xff]   ;;  %v12221_v33 = vld [vmem:[#allocation14 + $0x390] ss:$8 sps:$4 sm:$0xff]  }
 0x881   : > { %7762 = vmatprep.subr.bf16.mxu1 %v12151_v61  ;;  %v12224_v61 = vld [vmem:[#allocation14 + $0x3a0] ss:$8 sps:$4 sm:$0xff]  }
 0x884   : > { %7763 = vmatpush1.bf16.msra.mxu1 %v12149_v27  ;;  %v12229_v27 = vld [vmem:[#allocation14 + $0x3b4] ss:$8 sps:$4 sm:$0xff]  }
 0x885   : > { %7764 = vmatprep.subr.bf16.mxu1 %v12154_v35  ;;  %v12227_v35 = vld [vmem:[#allocation14 + $0x3b0] ss:$8 sps:$4 sm:$0xff]  }
 0x888   : > { %7765 = vmatpush1.bf16.msra.mxu1 %v12152_v8  ;;  %v12232_v8 = vld [vmem:[#allocation14 + $0x3c4] ss:$8 sps:$4 sm:$0xff]  }
 0x889   : > { %7766 = vmatprep.subr.bf16.mxu1 %v12157_v37  ;;  %v12230_v37 = vld [vmem:[#allocation14 + $0x3c0] ss:$8 sps:$4 sm:$0xff]  }
 0x88c   : > { %7767 = vmatpush1.bf16.msra.mxu1 %v12155_v34  ;;  %v12235_v34 = vld [vmem:[#allocation14 + $0x3d4] ss:$8 sps:$4 sm:$0xff]  }
 0x88d   : > { %7768 = vmatprep.subr.bf16.mxu1 %v12160_v17  ;;  %v12233_v17 = vld [vmem:[#allocation14 + $0x3d0] ss:$8 sps:$4 sm:$0xff]  }
 0x890   : > { %7769 = vmatpush1.bf16.msra.mxu1 %v12158_v36  ;;  %v12238_v36 = vld [vmem:[#allocation14 + $0x3e4] ss:$8 sps:$4 sm:$0xff]  }
 0x891   : > { %7770 = vmatprep.subr.bf16.mxu1 %v12163_v30  ;;  %v12236_v30 = vld [vmem:[#allocation14 + $0x3e0] ss:$8 sps:$4 sm:$0xff]  }
 0x894   : > { %7771 = vmatpush1.bf16.msra.mxu1 %v12161_v32  ;;  %v12241_v32 = vld [vmem:[#allocation14 + $0x3f4] ss:$8 sps:$4 sm:$0xff]  }
 0x895   : > { %7772 = vmatprep.subr.bf16.mxu1 %v12166_v51  ;;  %v12239_v51 = vld [vmem:[#allocation14 + $0x3f0] ss:$8 sps:$4 sm:$0xff]  }
 0x898   : > { %7773 = vmatpush1.bf16.msra.mxu1 %v12164_v49  ;;  %v12244_v49 = vld [vmem:[#allocation14 + $0x404] ss:$8 sps:$4 sm:$0xff]  }
 0x899   : > { %7774 = vmatprep.subr.bf16.mxu1 %v12169_v2  ;;  %v12242_v2 = vld [vmem:[#allocation14 + $0x400] ss:$8 sps:$4 sm:$0xff]  }
 0x89c   : > { %7775 = vmatpush1.bf16.msra.mxu1 %v12167_v13  ;;  %v6422_v13 = vpack.c.bf16 %v14039_v59, %v14039_v59  ;;  %v12254_v59 = vld [vmem:[#allocation14 + $0x440] ss:$8 sps:$4 sm:$0xff]  }
 0x89d   : > { %7776 = vmatprep.subr.bf16.mxu1 %v12172_v40  ;;  %v12247_v40 = vld [vmem:[#allocation14 + $0x414] ss:$8 sps:$4 sm:$0xff]  }
 0x8a0   : > { %7777 = vmatpush1.bf16.msra.mxu1 %v12170_v42  ;;  %v6511_v42 = vpack.c.bf16 %v14045_v9, %v14045_v9  ;;  %v12257_v9 = vld [vmem:[#allocation14 + $0x450] ss:$8 sps:$4 sm:$0xff]  }
 0x8a1   : > { %7778 = vmatprep.subr.bf16.mxu1 %v12175_v6  ;;  %v12245_v6 = vld [vmem:[#allocation14 + $0x410] ss:$8 sps:$4 sm:$0xff]  }
 0x8a4   : > { %7779 = vmatpush1.bf16.msra.mxu1 %v12173_v50  ;;  %v12250_v50 = vld [vmem:[#allocation14 + $0x424] ss:$8 sps:$4 sm:$0xff]  }
 0x8a5   : > { %7780 = vmatprep.subr.bf16.mxu1 %v12178_v46  ;;  %v12248_v46 = vld [vmem:[#allocation14 + $0x420] ss:$8 sps:$4 sm:$0xff]  }
 0x8a8   : > { %7781 = vmatpush1.bf16.msra.mxu1 %v12176_v63  ;;  %v12253_v63 = vld [vmem:[#allocation14 + $0x434] ss:$8 sps:$4 sm:$0xff]  }
 0x8a9   : > { %7782 = vmatprep.subr.bf16.mxu1 %v12181_v52  ;;  %v12251_v52 = vld [vmem:[#allocation14 + $0x430] ss:$8 sps:$4 sm:$0xff]  }
 0x8ac   : > { %7783 = vmatpush1.bf16.msra.mxu1 %v12179_v53  ;;  %v12256_v53 = vld [vmem:[#allocation14 + $0x444] ss:$8 sps:$4 sm:$0xff]  }
 0x8ad   : > { %7784 = vmatprep.subr.bf16.mxu1 %v12184_v58  ;;  %v12259_v58 = vld [vmem:[#allocation14 + $0x454] ss:$8 sps:$4 sm:$0xff]  }
 0x8b0   : > { %7785 = vmatpush1.bf16.msra.mxu1 %v12182_v56  ;;  %v12262_v56 = vld [vmem:[#allocation14 + $0x464] ss:$8 sps:$4 sm:$0xff]  }
 0x8b1   : > { %7786 = vmatprep.subr.bf16.mxu1 %v12187_v44  ;;  %v12260_v44 = vld [vmem:[#allocation14 + $0x460] ss:$8 sps:$4 sm:$0xff]  }
 0x8b4   : > { %7787 = vmatpush1.bf16.msra.mxu1 %v12185_v57  ;;  %v12265_v57 = vld [vmem:[#allocation14 + $0x474] ss:$8 sps:$4 sm:$0xff]  }
 0x8b5   : > { %7788 = vmatprep.subr.bf16.mxu1 %v12190_v20  ;;  %v12263_v20 = vld [vmem:[#allocation14 + $0x470] ss:$8 sps:$4 sm:$0xff]  }
 0x8b8   : > { %7789 = vmatpush1.bf16.msra.mxu1 %v12188_v24  ;;  %v12268_v24 = vld [vmem:[#allocation14 + $0x484] ss:$8 sps:$4 sm:$0xff]  }
 0x8b9   : > { %7790 = vmatprep.subr.bf16.mxu1 %v12193_v10  ;;  %v12266_v10 = vld [vmem:[#allocation14 + $0x480] ss:$8 sps:$4 sm:$0xff]  }
 0x8bc   : > { %7791 = vmatpush1.bf16.msra.mxu1 %v12191_v22  ;;  %v12271_v22 = vld [vmem:[#allocation14 + $0x494] ss:$8 sps:$4 sm:$0xff]  }
 0x8bd   : > { %7801 = vmatprep.subr.bf16.mxu1 %v12196_v0  ;;  %v12269_v0 = vld [vmem:[#allocation14 + $0x490] ss:$8 sps:$4 sm:$0xff]  }
 0x8bf   : > { %7793 = vmatmul.mubr.bf16.vlgmr.msra.gmra.mrb[160].mxu1 %v6334_v26  ;;  %v12272_v26 = vld [vmem:[#allocation14 + $0x4a0] ss:$8 sps:$4 sm:$0xff]  }
 0x8c0   : > { %7802 = vmatpush1.bf16.msra.mxu1 %v12194_v62  ;;  %7833 = vmatprep.mubr.bf16.mxu1 %v6423_v39  ;;  %v12274_v62 = vld [vmem:[#allocation14 + $0x4a4] ss:$8 sps:$4 sm:$0xff]   ;;  %v12275_v39 = vld [vmem:[#allocation14 + $0x4b0] ss:$8 sps:$4 sm:$0xff]  }
 0x8c1   : > { %7803 = vmatprep.subr.bf16.mxu1 %v12199_v45  ;;  %v12277_v45 = vld [vmem:[#allocation14 + $0x4b4] ss:$8 sps:$4 sm:$0xff]  }
 0x8c4   : > { %7804 = vmatpush1.bf16.msra.mxu1 %v12197_v41  ;;  %v12280_v41 = vld [vmem:[#allocation14 + $0x4c4] ss:$8 sps:$4 sm:$0xff]  }
 0x8c5   : > { %7805 = vmatprep.subr.bf16.mxu1 %v12202_v4  ;;  %v12278_v4 = vld [vmem:[#allocation14 + $0x4c0] ss:$8 sps:$4 sm:$0xff]  }
 0x8c8   : > { %7806 = vmatpush1.bf16.msra.mxu1 %v12200_v38  ;;  %v12283_v38 = vld [vmem:[#allocation14 + $0x4d4] ss:$8 sps:$4 sm:$0xff]  }
 0x8c9   : > { %7807 = vmatprep.subr.bf16.mxu1 %v12205_v5  ;;  %v12281_v5 = vld [vmem:[#allocation14 + $0x4d0] ss:$8 sps:$4 sm:$0xff]  }
 0x8cc   : > { %7808 = vmatpush1.bf16.msra.mxu1 %v12203_v55  ;;  %v12286_v55 = vld [vmem:[#allocation14 + $0x4e4] ss:$8 sps:$4 sm:$0xff]  }
 0x8cd   : > { %7809 = vmatprep.subr.bf16.mxu1 %v12208_v47  ;;  %v12284_v47 = vld [vmem:[#allocation14 + $0x4e0] ss:$8 sps:$4 sm:$0xff]  }
 0x8d0   : > { %7810 = vmatpush1.bf16.msra.mxu1 %v12206_v29  ;;  %v12289_v29 = vld [vmem:[#allocation14 + $0x4f4] ss:$8 sps:$4 sm:$0xff]  }
 0x8d1   : > { %7811 = vmatprep.subr.bf16.mxu1 %v12211_v11  ;;  %v12287_v11 = vld [vmem:[#allocation14 + $0x4f0] ss:$8 sps:$4 sm:$0xff]  }
 0x8d4   : > { %7812 = vmatpush1.bf16.msra.mxu1 %v12209_v31  ;;  %v12292_v31 = vld [vmem:[#allocation14 + $0x504] ss:$8 sps:$4 sm:$0xff]  }
 0x8d5   : > { %7813 = vmatprep.subr.bf16.mxu1 %v12214_v25  ;;  %v12290_v25 = vld [vmem:[#allocation14 + $0x500] ss:$8 sps:$4 sm:$0xff]  }
 0x8d8   : > { %7814 = vmatpush1.bf16.msra.mxu1 %v12212_v43  ;;  %v6424_v43 = vpack.c.bf16 %v14043_v60, %v14043_v60  ;;  %v12302_v60 = vld [vmem:[#allocation14 + $0x540] ss:$8 sps:$4 sm:$0xff]  }
 0x8d9   : > { %7815 = vmatprep.subr.bf16.mxu1 %v12217_v48  ;;  %v12295_v48 = vld [vmem:[#allocation14 + $0x514] ss:$8 sps:$4 sm:$0xff]  }
 0x8dc   : > { %7816 = vmatpush1.bf16.msra.mxu1 %v12215_v54  ;;  %v6513_v54 = vpack.c.bf16 %v14049_v7, %v14049_v7  ;;  %v12305_v7 = vld [vmem:[#allocation14 + $0x550] ss:$8 sps:$4 sm:$0xff]  }
 0x8dd   : > { %7817 = vmatprep.subr.bf16.mxu1 %v12220_v1  ;;  %v12293_v1 = vld [vmem:[#allocation14 + $0x510] ss:$8 sps:$4 sm:$0xff]  }
 0x8e0   : > { %7818 = vmatpush1.bf16.msra.mxu1 %v12218_v28  ;;  %v12298_v28 = vld [vmem:[#allocation14 + $0x524] ss:$8 sps:$4 sm:$0xff]  }
 0x8e1   : > { %7819 = vmatprep.subr.bf16.mxu1 %v12223_v23  ;;  %v12296_v23 = vld [vmem:[#allocation14 + $0x520] ss:$8 sps:$4 sm:$0xff]  }
 0x8e4   : > { %7820 = vmatpush1.bf16.msra.mxu1 %v12221_v33  ;;  %v12301_v33 = vld [vmem:[#allocation14 + $0x534] ss:$8 sps:$4 sm:$0xff]  }
 0x8e5   : > { %7821 = vmatprep.subr.bf16.mxu1 %v12226_v3  ;;  %v12299_v3 = vld [vmem:[#allocation14 + $0x530] ss:$8 sps:$4 sm:$0xff]  }
 0x8e8   : > { %7822 = vmatpush1.bf16.msra.mxu1 %v12224_v61  ;;  %v12304_v61 = vld [vmem:[#allocation14 + $0x544] ss:$8 sps:$4 sm:$0xff]  }
 0x8e9   : > { %7823 = vmatprep.subr.bf16.mxu1 %v12229_v27  ;;  %v12307_v27 = vld [vmem:[#allocation14 + $0x554] ss:$8 sps:$4 sm:$0xff]  }
 0x8ec   : > { %7824 = vmatpush1.bf16.msra.mxu1 %v12227_v35  ;;  %v12310_v35 = vld [vmem:[#allocation14 + $0x564] ss:$8 sps:$4 sm:$0xff]  }
 0x8ed   : > { %7825 = vmatprep.subr.bf16.mxu1 %v12232_v8  ;;  %v12308_v8 = vld [vmem:[#allocation14 + $0x560] ss:$8 sps:$4 sm:$0xff]  }
 0x8f0   : > { %7826 = vmatpush1.bf16.msra.mxu1 %v12230_v37  ;;  %v12313_v37 = vld [vmem:[#allocation14 + $0x574] ss:$8 sps:$4 sm:$0xff]  }
 0x8f1   : > { %7827 = vmatprep.subr.bf16.mxu1 %v12235_v34  ;;  %v12311_v34 = vld [vmem:[#allocation14 + $0x570] ss:$8 sps:$4 sm:$0xff]  }
 0x8f4   : > { %7828 = vmatpush1.bf16.msra.mxu1 %v12233_v17  ;;  %v12316_v17 = vld [vmem:[#allocation14 + $0x584] ss:$8 sps:$4 sm:$0xff]  }
 0x8f5   : > { %7829 = vmatprep.subr.bf16.mxu1 %v12238_v36  ;;  %v12314_v36 = vld [vmem:[#allocation14 + $0x580] ss:$8 sps:$4 sm:$0xff]  }
 0x8f8   : > { %7830 = vmatpush1.bf16.msra.mxu1 %v12236_v30  ;;  %v12319_v30 = vld [vmem:[#allocation14 + $0x594] ss:$8 sps:$4 sm:$0xff]  }
 0x8f9   : > { %7831 = vmatprep.subr.bf16.mxu1 %v12241_v32  ;;  %v12317_v32 = vld [vmem:[#allocation14 + $0x590] ss:$8 sps:$4 sm:$0xff]  }
 0x8fc   : > { %7832 = vmatpush1.bf16.msra.mxu1 %v12239_v51  ;;  %v12322_v51 = vld [vmem:[#allocation14 + $0x5a4] ss:$8 sps:$4 sm:$0xff]  }
 0x8fd   : > { %7842 = vmatprep.subr.bf16.mxu1 %v12244_v49  ;;  %v12320_v49 = vld [vmem:[#allocation14 + $0x5a0] ss:$8 sps:$4 sm:$0xff]  }
 0x8ff   : > { %7834 = vmatmul.mubr.bf16.vlgmr.msra.gmra.mrb[160].mxu1 %v6422_v13  ;;  %v12323_v13 = vld [vmem:[#allocation14 + $0x5b0] ss:$8 sps:$4 sm:$0xff]  }
 0x900   : > { %7843 = vmatpush1.bf16.msra.mxu1 %v12242_v2  ;;  %7874 = vmatprep.mubr.bf16.mxu1 %v6511_v42  ;;  %v12325_v2 = vld [vmem:[#allocation14 + $0x5b4] ss:$8 sps:$4 sm:$0xff]   ;;  %v12326_v42 = vld [vmem:[#allocation14 + $0x5c0] ss:$8 sps:$4 sm:$0xff]  }
 0x901   : > { %7844 = vmatprep.subr.bf16.mxu1 %v12247_v40  ;;  %v12328_v40 = vld [vmem:[#allocation14 + $0x5c4] ss:$8 sps:$4 sm:$0xff]  }
 0x904   : > { %7845 = vmatpush1.bf16.msra.mxu1 %v12245_v6  ;;  %v12331_v6 = vld [vmem:[#allocation14 + $0x5d4] ss:$8 sps:$4 sm:$0xff]  }
 0x905   : > { %7846 = vmatprep.subr.bf16.mxu1 %v12250_v50  ;;  %v12329_v50 = vld [vmem:[#allocation14 + $0x5d0] ss:$8 sps:$4 sm:$0xff]  }
 0x908   : > { %7847 = vmatpush1.bf16.msra.mxu1 %v12248_v46  ;;  %v12334_v46 = vld [vmem:[#allocation14 + $0x5e4] ss:$8 sps:$4 sm:$0xff]  }
 0x909   : > { %7848 = vmatprep.subr.bf16.mxu1 %v12253_v63  ;;  %v12332_v63 = vld [vmem:[#allocation14 + $0x5e0] ss:$8 sps:$4 sm:$0xff]  }
 0x90c   : > { %7849 = vmatpush1.bf16.msra.mxu1 %v12251_v52  ;;  %v12337_v52 = vld [vmem:[#allocation14 + $0x5f4] ss:$8 sps:$4 sm:$0xff]  }
 0x90d   : > { %7850 = vmatprep.subr.bf16.mxu1 %v12256_v53  ;;  %v12335_v53 = vld [vmem:[#allocation14 + $0x5f0] ss:$8 sps:$4 sm:$0xff]  }
 0x910   : > { %7851 = vmatpush1.bf16.msra.mxu1 %v12254_v59  ;;  %v6512_v59 = vpack.c.bf16 %v14047_v21, %v14047_v21 }
 0x911   : > { %7852 = vmatprep.subr.bf16.mxu1 %v12259_v58  ;;  %v6706_v58 = vld [vmem:[#allocation16] sm:$0x3] }
 0x914   : > { %7853 = vmatpush1.bf16.msra.mxu1 %v12257_v9  ;;  %v6711_v9 = vrot.slane %v6706_v58, %v13642_v15 }
 0x915   : > { %7854 = vmatprep.subr.bf16.mxu1 %v12262_v56  ;;  %v6715_v56 = vrot.slane %v6706_v58, %v13648_v18 }
 0x918   : > { %7855 = vmatpush1.bf16.msra.mxu1 %v12260_v44 }
 0x919   : > { %7856 = vmatprep.subr.bf16.mxu1 %v12265_v57 }
 0x91c   : > { %7857 = vmatpush1.bf16.msra.mxu1 %v12263_v20 }
 0x91d   : > { %7858 = vmatprep.subr.bf16.mxu1 %v12268_v24 }
 0x920   : > { %7859 = vmatpush1.bf16.msra.mxu1 %v12266_v10 }
 0x921   : > { %7860 = vmatprep.subr.bf16.mxu1 %v12271_v22 }
 0x924   : > { %7861 = vmatpush1.bf16.msra.mxu1 %v12269_v0 }
 0x925   : > { %7862 = vmatprep.subr.bf16.mxu1 %v12274_v62 }
 0x928   : > { %7863 = vmatpush1.bf16.msra.mxu1 %v12272_v26 }
 0x929   : > { %7864 = vmatprep.subr.bf16.mxu1 %v12277_v45  ;;  %v12340_v45 = vld [vmem:[#allocation19 + $0x4] ss:$16 sps:$4 sm:$0xff]  }
 0x92c   : > { %7865 = vmatpush1.bf16.msra.mxu1 %v12275_v39  ;;  %v7928_v39 = vld [vmem:[#allocation17] sm:$0x3] }
 0x92d   : > { %7866 = vmatprep.subr.bf16.mxu1 %v12280_v41  ;;  %v7983_v41 = vld [vmem:[#allocation17 + $0x2] sm:$0x3] }
 0x930   : > { %7867 = vmatpush1.bf16.msra.mxu1 %v12278_v4  ;;  %v12338_v4 = vld [vmem:[#allocation19] ss:$16 sps:$4 sm:$0xff]  }
 0x931   : > { %7868 = vmatprep.subr.bf16.mxu1 %v12283_v38  ;;  %v12343_v38 = vld [vmem:[#allocation19 + $0x24] ss:$16 sps:$4 sm:$0xff]  }
 0x934   : > { %7869 = vmatpush1.bf16.msra.mxu1 %v12281_v5  ;;  %v12341_v5 = vld [vmem:[#allocation19 + $0x20] ss:$16 sps:$4 sm:$0xff]  }
 0x935   : > { %7870 = vmatprep.subr.bf16.mxu1 %v12286_v55  ;;  %v12346_v55 = vld [vmem:[#allocation19 + $0x44] ss:$16 sps:$4 sm:$0xff]  }
 0x938   : > { %7871 = vmatpush1.bf16.msra.mxu1 %v12284_v47  ;;  %v12344_v47 = vld [vmem:[#allocation19 + $0x40] ss:$16 sps:$4 sm:$0xff]  }
 0x939   : > { %7872 = vmatprep.subr.bf16.mxu1 %v12289_v29  ;;  %v12349_v29 = vld [vmem:[#allocation19 + $0x64] ss:$16 sps:$4 sm:$0xff]  }
 0x93c   : > { %7873 = vmatpush1.bf16.msra.mxu1 %v12287_v11  ;;  %v12347_v11 = vld [vmem:[#allocation19 + $0x60] ss:$16 sps:$4 sm:$0xff]  }
 0x93d   : > { %7883 = vmatprep.subr.bf16.mxu1 %v12292_v31  ;;  %v12352_v31 = vld [vmem:[#allocation19 + $0x84] ss:$16 sps:$4 sm:$0xff]  }
 0x93f   : > { %7875 = vmatmul.mubr.bf16.vlgmr.msra.gmra.mrb[160].mxu1 %v6424_v43  ;;  %v12355_v43 = vld [vmem:[#allocation19 + $0xa4] ss:$16 sps:$4 sm:$0xff]  }
 0x940   : > { %7884 = vmatpush1.bf16.msra.mxu1 %v12290_v25  ;;  %7915 = vmatprep.mubr.bf16.mxu1 %v6513_v54  ;;  %v12350_v25 = vld [vmem:[#allocation19 + $0x80] ss:$16 sps:$4 sm:$0xff]   ;;  %v12358_v54 = vld [vmem:[#allocation19 + $0xc4] ss:$16 sps:$4 sm:$0xff]  }
 0x941   : > { %7885 = vmatprep.subr.bf16.mxu1 %v12295_v48  ;;  %v12353_v48 = vld [vmem:[#allocation19 + $0xa0] ss:$16 sps:$4 sm:$0xff]  }
 0x944   : > { %7886 = vmatpush1.bf16.msra.mxu1 %v12293_v1  ;;  %v12356_v1 = vld [vmem:[#allocation19 + $0xc0] ss:$16 sps:$4 sm:$0xff]  }
 0x945   : > { %7887 = vmatprep.subr.bf16.mxu1 %v12298_v28  ;;  %v12361_v28 = vld [vmem:[#allocation19 + $0xe4] ss:$16 sps:$4 sm:$0xff]  }
 0x948   : > { %7888 = vmatpush1.bf16.msra.mxu1 %v12296_v23  ;;  %v12359_v23 = vld [vmem:[#allocation19 + $0xe0] ss:$16 sps:$4 sm:$0xff]  }
 0x949   : > { %7889 = vmatprep.subr.bf16.mxu1 %v12301_v33  ;;  %v12364_v33 = vld [vmem:[#allocation19 + $0x104] ss:$16 sps:$4 sm:$0xff]  }
 0x94c   : > { %7890 = vmatpush1.bf16.msra.mxu1 %v12299_v3  ;;  %v12362_v3 = vld [vmem:[#allocation19 + $0x100] ss:$16 sps:$4 sm:$0xff]  }
 0x94d   : > { %7891 = vmatprep.subr.bf16.mxu1 %v12304_v61  ;;  %v12367_v61 = vld [vmem:[#allocation19 + $0x124] ss:$16 sps:$4 sm:$0xff]  }
 0x950   : > { %7892 = vmatpush1.bf16.msra.mxu1 %v12302_v60  ;;  %v12365_v60 = vld [vmem:[#allocation19 + $0x120] ss:$16 sps:$4 sm:$0xff]  }
 0x951   : > { %7893 = vmatprep.subr.bf16.mxu1 %v12307_v27  ;;  %v12370_v27 = vld [vmem:[#allocation19 + $0x144] ss:$16 sps:$4 sm:$0xff]  }
 0x954   : > { %7894 = vmatpush1.bf16.msra.mxu1 %v12305_v7  ;;  %v12368_v7 = vld [vmem:[#allocation19 + $0x140] ss:$16 sps:$4 sm:$0xff]  }
 0x955   : > { %7895 = vmatprep.subr.bf16.mxu1 %v12310_v35  ;;  %v12373_v35 = vld [vmem:[#allocation19 + $0x164] ss:$16 sps:$4 sm:$0xff]  }
 0x958   : > { %7896 = vmatpush1.bf16.msra.mxu1 %v12308_v8  ;;  %v12371_v8 = vld [vmem:[#allocation19 + $0x160] ss:$16 sps:$4 sm:$0xff]  }
 0x959   : > { %7897 = vmatprep.subr.bf16.mxu1 %v12313_v37  ;;  %v12376_v37 = vld [vmem:[#allocation19 + $0x184] ss:$16 sps:$4 sm:$0xff]  }
 0x95c   : > { %7898 = vmatpush1.bf16.msra.mxu1 %v12311_v34  ;;  %v12374_v34 = vld [vmem:[#allocation19 + $0x180] ss:$16 sps:$4 sm:$0xff]  }
 0x95d   : > { %7899 = vmatprep.subr.bf16.mxu1 %v12316_v17  ;;  %v12379_v17 = vld [vmem:[#allocation19 + $0x1a4] ss:$16 sps:$4 sm:$0xff]  }
 0x960   : > { %7900 = vmatpush1.bf16.msra.mxu1 %v12314_v36  ;;  %v12377_v36 = vld [vmem:[#allocation19 + $0x1a0] ss:$16 sps:$4 sm:$0xff]  }
 0x961   : > { %7901 = vmatprep.subr.bf16.mxu1 %v12319_v30  ;;  %v12382_v30 = vld [vmem:[#allocation19 + $0x1c4] ss:$16 sps:$4 sm:$0xff]  }
 0x964   : > { %7902 = vmatpush1.bf16.msra.mxu1 %v12317_v32  ;;  %v12380_v32 = vld [vmem:[#allocation19 + $0x1c0] ss:$16 sps:$4 sm:$0xff]  }
 0x965   : > { %7903 = vmatprep.subr.bf16.mxu1 %v12322_v51  ;;  %v12385_v51 = vld [vmem:[#allocation19 + $0x1e4] ss:$16 sps:$4 sm:$0xff]  }
 0x968   : > { %7904 = vmatpush1.bf16.msra.mxu1 %v12320_v49  ;;  %v12383_v49 = vld [vmem:[#allocation19 + $0x1e0] ss:$16 sps:$4 sm:$0xff]  }
 0x969   : > { %7905 = vmatprep.subr.bf16.mxu1 %v12325_v2  ;;  %v12388_v2 = vld [vmem:[#allocation19 + $0x204] ss:$16 sps:$4 sm:$0xff]  }
 0x96c   : > { %7906 = vmatpush1.bf16.msra.mxu1 %v12323_v13 }
 0x96d   : > { %7907 = vmatprep.subr.bf16.mxu1 %v12328_v40 }
 0x970   : > { %7908 = vmatpush1.bf16.msra.mxu1 %v12326_v42 }
 0x971   : > { %7909 = vmatprep.subr.bf16.mxu1 %v12331_v6 }
 0x974   : > { %7910 = vmatpush1.bf16.msra.mxu1 %v12329_v50 }
 0x975   : > { %7911 = vmatprep.subr.bf16.mxu1 %v12334_v46  ;;  %v12386_v46 = vld [vmem:[#allocation19 + $0x200] ss:$16 sps:$4 sm:$0xff]  }
 0x978   : > { %7912 = vmatpush1.bf16.msra.mxu1 %v12332_v63 }
 0x979   : > { %7913 = vmatprep.subr.bf16.mxu1 %v12337_v52 }
 0x97c   : > { %7914 = vmatpush1.bf16.msra.mxu1 %v12335_v53 }
 0x97f   : > { %7916 = vmatmul.mubr.bf16.vlgmr.msra.gmra.mrb[160].mxu1 %v6512_v59 }
 0x980   : > { %7971 = vmatprep.mubr.bf16.mxu1 %v13160_v12 }
 0xa52   : > { %v7917_v44 = vpop.f32.mrb[160].mxu1 }
 0xa53   : > { %v11007_v57 = vadd.f32 %v7917_v44, %v6711_v9  ;;  %v7919_v20 = vpop.f32.mrb[161].mxu1  ;;  %v12391_v9 = vld [vmem:[#allocation19 + $0x224] ss:$16 sps:$4 sm:$0xff]   ;;  %v12389_v44 = vld [vmem:[#allocation19 + $0x220] ss:$16 sps:$4 sm:$0xff]  }
 0xa54   : > { %v11008_v24 = vadd.f32 %v7919_v20, %v6715_v56  ;;  %v7921_v10 = vpop.f32.mrb[162].mxu1  ;;  %v12392_v20 = vld [vmem:[#allocation19 + $0x240] ss:$16 sps:$4 sm:$0xff]  }
 0xa55   : > { %12644 = vtanh.f32 %v11007_v57  ;;  %v7922_v22 = vpop.f32.mrb[163].mxu1  ;;  %v12394_v57 = vld [vmem:[#allocation19 + $0x244] ss:$16 sps:$4 sm:$0xff]   ;;  %v12395_v10 = vld [vmem:[#allocation19 + $0x260] ss:$16 sps:$4 sm:$0xff]  }
 0xa56   : > { %12646 = vtanh.f32 %v11008_v24  ;;  %v12397_v24 = vld [vmem:[#allocation19 + $0x264] ss:$16 sps:$4 sm:$0xff]  }
 0xa57   : > { %v12400_v22 = vld [vmem:[#allocation19 + $0x284] ss:$16 sps:$4 sm:$0xff]  }
 0xa5f   : > { %v12645_v0 = vpop.eup %12644 }
 0xa60   : > { %v12647_v62 = vpop.eup %12646  ;;  %v7926_v26 = vpack.c.bf16 %v12645_v0, %v12645_v0  ;;  %v12398_v0 = vld [vmem:[#allocation19 + $0x280] ss:$16 sps:$4 sm:$0xff]  }
 0xa61   : > { %v7927_v21 = vpack.c.bf16 %v12647_v62, %v12647_v62  ;;  %v12403_v62 = vld [vmem:[#allocation19 + $0x2a4] ss:$16 sps:$4 sm:$0xff]  }
 0xa62   : > { %v7934_v12 = vsel %vm6153_vm2, %v7926_v26, 0  ;;  %v12401_v26 = vld [vmem:[#allocation19 + $0x2a0] ss:$16 sps:$4 sm:$0xff]  }
 0xa63   : > { %10344 = vmatprep.subr.msk.bf16.mxu1 %vm6153_vm2, %v7927_v21  ;;  %10346 = vmatprep.subr.msk.bf16.mxu0 %vm6153_vm2, %v7927_v21  ;;  %v12406_v21 = vld [vmem:[#allocation19 + $0x2c4] ss:$16 sps:$4 sm:$0xff]  }
 0xa64   : > { %7940 = vmatpush1.bf16.msra.mxu1 %v7934_v12  ;;  %7988 = vmatpush1.bf16.msra.mxu0 %v7934_v12  ;;  %v12409_v12 = vld [vmem:[#allocation19 + $0x2e4] ss:$16 sps:$4 sm:$0xff]  }
 0xa65   : > { %8820 = vmatprep.subr.bf16.mxu0 %v12340_v45  ;;  %v12404_v45 = vld [vmem:[#allocation19 + $0x2c0] ss:$16 sps:$4 sm:$0xff]  }
 0xa67   : > { %10345 = vmatmul.mubr.msk.bf16.vlgmr.msra.gmra.mrb[164].mxu1 %vm7929_vm5, %v7928_v39  ;;  %10347 = vmatmul.mubr.msk.bf16.vlgmr.msra.gmra.mrb[72].mxu0 %vm7929_vm5, %v7983_v41  ;;  %v12407_v39 = vld [vmem:[#allocation19 + $0x2e0] ss:$16 sps:$4 sm:$0xff]   ;;  %v12412_v41 = vld [vmem:[#allocation19 + $0x304] ss:$16 sps:$4 sm:$0xff]  }
 0xa68   : > { %8821 = vmatpush1.bf16.msra.mxu0 %v12338_v4  ;;  %v12410_v4 = vld [vmem:[#allocation19 + $0x300] ss:$16 sps:$4 sm:$0xff]  }
 0xa69   : > { %8822 = vmatprep.subr.bf16.mxu0 %v12343_v38  ;;  %v12415_v38 = vld [vmem:[#allocation19 + $0x324] ss:$16 sps:$4 sm:$0xff]  }
 0xa6c   : > { %8823 = vmatpush1.bf16.msra.mxu0 %v12341_v5  ;;  %v12413_v5 = vld [vmem:[#allocation19 + $0x320] ss:$16 sps:$4 sm:$0xff]  }
 0xa6d   : > { %8824 = vmatprep.subr.bf16.mxu0 %v12346_v55  ;;  %v12418_v55 = vld [vmem:[#allocation19 + $0x344] ss:$16 sps:$4 sm:$0xff]  }
 0xa70   : > { %8825 = vmatpush1.bf16.msra.mxu0 %v12344_v47  ;;  %v12416_v47 = vld [vmem:[#allocation19 + $0x340] ss:$16 sps:$4 sm:$0xff]  }
 0xa71   : > { %8826 = vmatprep.subr.bf16.mxu0 %v12349_v29  ;;  %v12421_v29 = vld [vmem:[#allocation19 + $0x364] ss:$16 sps:$4 sm:$0xff]  }
 0xa74   : > { %8827 = vmatpush1.bf16.msra.mxu0 %v12347_v11  ;;  %v12419_v11 = vld [vmem:[#allocation19 + $0x360] ss:$16 sps:$4 sm:$0xff]  }
 0xa75   : > { %8828 = vmatprep.subr.bf16.mxu0 %v12352_v31  ;;  %v12424_v31 = vld [vmem:[#allocation19 + $0x384] ss:$16 sps:$4 sm:$0xff]  }
 0xa78   : > { %8829 = vmatpush1.bf16.msra.mxu0 %v12350_v25  ;;  %v12422_v25 = vld [vmem:[#allocation19 + $0x380] ss:$16 sps:$4 sm:$0xff]  }
 0xa79   : > { %8830 = vmatprep.subr.bf16.mxu0 %v12355_v43  ;;  %v12427_v43 = vld [vmem:[#allocation19 + $0x3a4] ss:$16 sps:$4 sm:$0xff]  }
 0xa7c   : > { %8831 = vmatpush1.bf16.msra.mxu0 %v12353_v48  ;;  %v12425_v48 = vld [vmem:[#allocation19 + $0x3a0] ss:$16 sps:$4 sm:$0xff]  }
 0xa7d   : > { %8832 = vmatprep.subr.bf16.mxu0 %v12358_v54  ;;  %v12430_v54 = vld [vmem:[#allocation19 + $0x3c4] ss:$16 sps:$4 sm:$0xff]  }
 0xa80   : > { %8833 = vmatpush1.bf16.msra.mxu0 %v12356_v1  ;;  %v12428_v1 = vld [vmem:[#allocation19 + $0x3c0] ss:$16 sps:$4 sm:$0xff]  }
 0xa81   : > { %8834 = vmatprep.subr.bf16.mxu0 %v12361_v28  ;;  %v12433_v28 = vld [vmem:[#allocation19 + $0x3e4] ss:$16 sps:$4 sm:$0xff]  }
 0xa84   : > { %8835 = vmatpush1.bf16.msra.mxu0 %v12359_v23  ;;  %v12431_v23 = vld [vmem:[#allocation19 + $0x3e0] ss:$16 sps:$4 sm:$0xff]  }
 0xa85   : > { %8836 = vmatprep.subr.bf16.mxu0 %v12364_v33  ;;  %v12436_v33 = vld [vmem:[#allocation19 + $0xc] ss:$16 sps:$4 sm:$0xff]  }
 0xa88   : > { %8837 = vmatpush1.bf16.msra.mxu0 %v12362_v3 }
 0xa89   : > { %8838 = vmatprep.subr.bf16.mxu0 %v12367_v61  ;;  %v12434_v61 = vld [vmem:[#allocation19 + $0x8] ss:$16 sps:$4 sm:$0xff]  }
 0xa8c   : > { %8839 = vmatpush1.bf16.msra.mxu0 %v12365_v60  ;;  %v12439_v60 = vld [vmem:[#allocation19 + $0x2c] ss:$16 sps:$4 sm:$0xff]  }
 0xa8d   : > { %8840 = vmatprep.subr.bf16.mxu0 %v12370_v27  ;;  %v12530_v27 = vld [vmem:[#allocation22 + $0x40] sm:$0xff]  }
 0xa8e   : > { %10797 = vmatprep.subr.bf16.mxu1 %v12530_v27  ;;  %v12544_v27 = vld [vmem:[#allocation22 + $0x78] sm:$0xff]  }
 0xa90   : > { %8841 = vmatpush1.bf16.msra.mxu0 %v12368_v7  ;;  %v12531_v7 = vld [vmem:[#allocation22] sm:$0xff]  }
 0xa91   : > { %8842 = vmatprep.subr.bf16.mxu0 %v12373_v35  ;;  %v12532_v35 = vld [vmem:[#allocation22 + $0x48] sm:$0xff]   ;;  %10798 = vmatpush3.bf16.msra.mxu1 %v12531_v7  ;;  %v12545_v7 = vld [vmem:[#allocation22 + $0x38] sm:$0xff]  }
 0xa92   : > { %10799 = vmatprep.subr.bf16.mxu1 %v12532_v35  ;;  %v12503_v35 = vld [vmem:[#allocation19 + $0x2e8] ss:$16 sps:$4 sm:$0xff]  }
 0xa94   : > { %8843 = vmatpush1.bf16.msra.mxu0 %v12371_v8  ;;  %v12437_v8 = vld [vmem:[#allocation19 + $0x28] ss:$16 sps:$4 sm:$0xff]  }
 0xa95   : > { %8844 = vmatprep.subr.bf16.mxu0 %v12376_v37  ;;  %v12442_v37 = vld [vmem:[#allocation19 + $0x4c] ss:$16 sps:$4 sm:$0xff]  }
 0xa98   : > { %8845 = vmatpush1.bf16.msra.mxu0 %v12374_v34  ;;  %v12533_v34 = vld [vmem:[#allocation22 + $0x8] sm:$0xff]  }
 0xa99   : > { %8846 = vmatprep.subr.bf16.mxu0 %v12379_v17  ;;  %v12534_v17 = vld [vmem:[#allocation22 + $0x50] sm:$0xff]   ;;  %10800 = vmatpush3.bf16.msra.mxu1 %v12533_v34 }
 0xa9a   : > { %10801 = vmatprep.subr.bf16.mxu1 %v12534_v17  ;;  %v12506_v34 = vld [vmem:[#allocation19 + $0x308] ss:$16 sps:$4 sm:$0xff]   ;;  %v12511_v17 = vld [vmem:[#allocation19 + $0x32c] ss:$16 sps:$4 sm:$0xff]  }
 0xa9c   : > { %8847 = vmatpush1.bf16.msra.mxu0 %v12377_v36  ;;  %v12440_v36 = vld [vmem:[#allocation19 + $0x48] ss:$16 sps:$4 sm:$0xff]  }
 0xa9d   : > { %8848 = vmatprep.subr.bf16.mxu0 %v12382_v30  ;;  %v12445_v30 = vld [vmem:[#allocation19 + $0x6c] ss:$16 sps:$4 sm:$0xff]  }
 0xaa0   : > { %8849 = vmatpush1.bf16.msra.mxu0 %v12380_v32  ;;  %v12535_v32 = vld [vmem:[#allocation22 + $0x10] sm:$0xff]  }
 0xaa1   : > { %8850 = vmatprep.subr.bf16.mxu0 %v12385_v51  ;;  %v12536_v51 = vld [vmem:[#allocation22 + $0x58] sm:$0xff]   ;;  %10802 = vmatpush3.bf16.msra.mxu1 %v12535_v32  ;;  %v12512_v32 = vld [vmem:[#allocation19 + $0x348] ss:$16 sps:$4 sm:$0xff]  }
 0xaa2   : > { %10803 = vmatprep.subr.bf16.mxu1 %v12536_v51  ;;  %v12517_v51 = vld [vmem:[#allocation19 + $0x36c] ss:$16 sps:$4 sm:$0xff]  }
 0xaa4   : > { %8851 = vmatpush1.bf16.msra.mxu0 %v12383_v49  ;;  %v12443_v49 = vld [vmem:[#allocation19 + $0x68] ss:$16 sps:$4 sm:$0xff]  }
 0xaa5   : > { %8861 = vmatprep.subr.bf16.mxu0 %v12388_v2  ;;  %v12448_v2 = vld [vmem:[#allocation19 + $0x8c] ss:$16 sps:$4 sm:$0xff]  }
 0xb3a   : > { %v7973_v13 = vpop.f32.mrb[164].mxu1  ;;  %v14075_v40 = vpop.f32.mrb[72].mxu0 }
 0xb3b   : > { %v7975_v42 = vpop.f32.mrb[165].mxu1  ;;  %v8023_v6 = vpop.f32.mrb[73].mxu0  ;;  %v14081_v59 = vpack.c.bf16 %v7973_v13, %v7973_v13  ;;  %v14088_v3 = vpack.c.bf16 %v14075_v40, %v14075_v40  ;;  %v12537_v13 = vld [vmem:[#allocation22 + $0x18] sm:$0xff]   ;;  %v12538_v40 = vld [vmem:[#allocation22 + $0x60] sm:$0xff]  }
 0xb3c   : > { %v14077_v50 = vpack.c.bf16 %v7975_v42, %v7975_v42  ;;  %v7977_v63 = vpop.f32.mrb[166].mxu1  ;;  %v14079_v52 = vpack.c.bf16 %v8023_v6, %v8023_v6  ;;  %v8025_v53 = vpop.f32.mrb[74].mxu0  ;;  %v12446_v42 = vld [vmem:[#allocation19 + $0x88] ss:$16 sps:$4 sm:$0xff]   ;;  %v12451_v6 = vld [vmem:[#allocation19 + $0xac] ss:$16 sps:$4 sm:$0xff]   ;;  %10804 = vmatpush3.bf16.msra.mxu1 %v12537_v13 }
 0xb3d   : > { %v7978_v58 = vpop.f32.mrb[167].mxu1  ;;  %v8026_v56 = vpop.f32.mrb[75].mxu0  ;;  %10805 = vmatprep.subr.bf16.mxu1 %v12538_v40  ;;  %v12449_v63 = vld [vmem:[#allocation19 + $0xa8] ss:$16 sps:$4 sm:$0xff]   ;;  %v12454_v53 = vld [vmem:[#allocation19 + $0xcc] ss:$16 sps:$4 sm:$0xff]  }
 0xb3e   : > { %8852 = vmatprep.mubr.bf16.mxu0 %v14077_v50  ;;  %v12541_v58 = vld [vmem:[#allocation22 + $0x28] sm:$0xff]   ;;  %v12518_v13 = vld [vmem:[#allocation19 + $0x388] ss:$16 sps:$4 sm:$0xff]  }
 0xb3f   : > { %8853 = vmatmul.mubr.bf16.vlgmr.msra.gmra.mrb[76].mxu0 %v14081_v59  ;;  %v12457_v56 = vld [vmem:[#allocation19 + $0xec] ss:$16 sps:$4 sm:$0xff]  }
 0xb40   : > { %8862 = vmatpush1.bf16.msra.mxu0 %v12386_v46  ;;  %8893 = vmatprep.mubr.bf16.mxu0 %v14079_v52  ;;  %v12540_v46 = vld [vmem:[#allocation22 + $0x68] sm:$0xff]  }
 0xb41   : > { %8863 = vmatprep.subr.bf16.mxu0 %v12391_v9  ;;  %v12452_v9 = vld [vmem:[#allocation19 + $0xc8] ss:$16 sps:$4 sm:$0xff]   ;;  %v12523_v40 = vld [vmem:[#allocation19 + $0x3ac] ss:$16 sps:$4 sm:$0xff]  }
 0xb44   : > { %8864 = vmatpush1.bf16.msra.mxu0 %v12389_v44  ;;  %v12455_v44 = vld [vmem:[#allocation19 + $0xe8] ss:$16 sps:$4 sm:$0xff]  }
 0xb45   : > { %8865 = vmatprep.subr.bf16.mxu0 %v12394_v57  ;;  %v12460_v57 = vld [vmem:[#allocation19 + $0x10c] ss:$16 sps:$4 sm:$0xff]  }
 0xb48   : > { %8866 = vmatpush1.bf16.msra.mxu0 %v12392_v20  ;;  %v12458_v20 = vld [vmem:[#allocation19 + $0x108] ss:$16 sps:$4 sm:$0xff]  }
 0xb49   : > { %8867 = vmatprep.subr.bf16.mxu0 %v12397_v24  ;;  %v12463_v24 = vld [vmem:[#allocation19 + $0x12c] ss:$16 sps:$4 sm:$0xff]  }
 0xb4c   : > { %8868 = vmatpush1.bf16.msra.mxu0 %v12395_v10  ;;  %v12461_v10 = vld [vmem:[#allocation19 + $0x128] ss:$16 sps:$4 sm:$0xff]  }
 0xb4d   : > { %8869 = vmatprep.subr.bf16.mxu0 %v12400_v22  ;;  %v12466_v22 = vld [vmem:[#allocation19 + $0x14c] ss:$16 sps:$4 sm:$0xff]  }
 0xb50   : > { %8870 = vmatpush1.bf16.msra.mxu0 %v12398_v0  ;;  %v12464_v0 = vld [vmem:[#allocation19 + $0x148] ss:$16 sps:$4 sm:$0xff]  }
 0xb51   : > { %8871 = vmatprep.subr.bf16.mxu0 %v12403_v62  ;;  %v12469_v62 = vld [vmem:[#allocation19 + $0x16c] ss:$16 sps:$4 sm:$0xff]  }
 0xb54   : > { %8872 = vmatpush1.bf16.msra.mxu0 %v12401_v26  ;;  %v12467_v26 = vld [vmem:[#allocation19 + $0x168] ss:$16 sps:$4 sm:$0xff]  }
 0xb55   : > { %8873 = vmatprep.subr.bf16.mxu0 %v12406_v21  ;;  %v12472_v21 = vld [vmem:[#allocation19 + $0x18c] ss:$16 sps:$4 sm:$0xff]  }
 0xb58   : > { %8874 = vmatpush1.bf16.msra.mxu0 %v12404_v45  ;;  %v12470_v45 = vld [vmem:[#allocation19 + $0x188] ss:$16 sps:$4 sm:$0xff]  }
 0xb59   : > { %8875 = vmatprep.subr.bf16.mxu0 %v12409_v12  ;;  %v12475_v12 = vld [vmem:[#allocation19 + $0x1ac] ss:$16 sps:$4 sm:$0xff]  }
 0xb5c   : > { %8876 = vmatpush1.bf16.msra.mxu0 %v12407_v39  ;;  %v12473_v39 = vld [vmem:[#allocation19 + $0x1a8] ss:$16 sps:$4 sm:$0xff]  }
 0xb5d   : > { %8877 = vmatprep.subr.bf16.mxu0 %v12412_v41  ;;  %v12478_v41 = vld [vmem:[#allocation19 + $0x1cc] ss:$16 sps:$4 sm:$0xff]  }
 0xb60   : > { %8878 = vmatpush1.bf16.msra.mxu0 %v12410_v4  ;;  %v12476_v4 = vld [vmem:[#allocation19 + $0x1c8] ss:$16 sps:$4 sm:$0xff]  }
 0xb61   : > { %8879 = vmatprep.subr.bf16.mxu0 %v12415_v38  ;;  %v12481_v38 = vld [vmem:[#allocation19 + $0x1ec] ss:$16 sps:$4 sm:$0xff]  }
 0xb64   : > { %8880 = vmatpush1.bf16.msra.mxu0 %v12413_v5  ;;  %v12479_v5 = vld [vmem:[#allocation19 + $0x1e8] ss:$16 sps:$4 sm:$0xff]  }
 0xb65   : > { %8881 = vmatprep.subr.bf16.mxu0 %v12418_v55  ;;  %v12484_v55 = vld [vmem:[#allocation19 + $0x20c] ss:$16 sps:$4 sm:$0xff]  }
 0xb68   : > { %8882 = vmatpush1.bf16.msra.mxu0 %v12416_v47  ;;  %v12482_v47 = vld [vmem:[#allocation19 + $0x208] ss:$16 sps:$4 sm:$0xff]  }
 0xb69   : > { %8883 = vmatprep.subr.bf16.mxu0 %v12421_v29  ;;  %v12487_v29 = vld [vmem:[#allocation19 + $0x22c] ss:$16 sps:$4 sm:$0xff]  }
 0xb6c   : > { %8884 = vmatpush1.bf16.msra.mxu0 %v12419_v11  ;;  %v12485_v11 = vld [vmem:[#allocation19 + $0x228] ss:$16 sps:$4 sm:$0xff]  }
 0xb6d   : > { %8885 = vmatprep.subr.bf16.mxu0 %v12424_v31  ;;  %v12490_v31 = vld [vmem:[#allocation19 + $0x24c] ss:$16 sps:$4 sm:$0xff]  }
 0xb70   : > { %8886 = vmatpush1.bf16.msra.mxu0 %v12422_v25  ;;  %v12488_v25 = vld [vmem:[#allocation19 + $0x248] ss:$16 sps:$4 sm:$0xff]  }
 0xb71   : > { %8887 = vmatprep.subr.bf16.mxu0 %v12427_v43  ;;  %v12493_v43 = vld [vmem:[#allocation19 + $0x26c] ss:$16 sps:$4 sm:$0xff]  }
 0xb74   : > { %8888 = vmatpush1.bf16.msra.mxu0 %v12425_v48  ;;  %v12491_v48 = vld [vmem:[#allocation19 + $0x268] ss:$16 sps:$4 sm:$0xff]  }
 0xb75   : > { %8889 = vmatprep.subr.bf16.mxu0 %v12430_v54  ;;  %v12496_v54 = vld [vmem:[#allocation19 + $0x28c] ss:$16 sps:$4 sm:$0xff]  }
 0xb78   : > { %8890 = vmatpush1.bf16.msra.mxu0 %v12428_v1  ;;  %v12494_v1 = vld [vmem:[#allocation19 + $0x288] ss:$16 sps:$4 sm:$0xff]  }
 0xb79   : > { %8891 = vmatprep.subr.bf16.mxu0 %v12433_v28  ;;  %v12499_v28 = vld [vmem:[#allocation19 + $0x2ac] ss:$16 sps:$4 sm:$0xff]  }
 0xb7c   : > { %8892 = vmatpush1.bf16.msra.mxu0 %v12431_v23  ;;  %v12502_v23 = vld [vmem:[#allocation19 + $0x2cc] ss:$16 sps:$4 sm:$0xff]  }
 0xb7d   : > { %8902 = vmatprep.subr.bf16.mxu0 %v12436_v33  ;;  %v12543_v33 = vld [vmem:[#allocation22 + $0x30] sm:$0xff]  }
 0xb7f   : > { %8894 = vmatmul.mubr.bf16.vlgmr.msra.gmra.mrb[76].mxu0 %v14088_v3 }
 0xb80   : > { %8903 = vmatpush1.bf16.msra.mxu0 %v12434_v61  ;;  %8934 = vmatprep.mubr.bf16.mxu0 %v14077_v50  ;;  %v12539_v50 = vld [vmem:[#allocation22 + $0x20] sm:$0xff]  }
 0xb81   : > { %8904 = vmatprep.subr.bf16.mxu0 %v12439_v60  ;;  %10806 = vmatpush3.bf16.msra.mxu1 %v12539_v50  ;;  %v12500_v61 = vld [vmem:[#allocation19 + $0x2c8] ss:$16 sps:$4 sm:$0xff]   ;;  %v12505_v60 = vld [vmem:[#allocation19 + $0x2ec] ss:$16 sps:$4 sm:$0xff]  }
 0xb82   : > { %10807 = vmatprep.subr.bf16.mxu1 %v12540_v46  ;;  %v12524_v50 = vld [vmem:[#allocation19 + $0x3c8] ss:$16 sps:$4 sm:$0xff]   ;;  %v12529_v46 = vld [vmem:[#allocation19 + $0x3ec] ss:$16 sps:$4 sm:$0xff]  }
 0xb84   : > { %8905 = vmatpush1.bf16.msra.mxu0 %v12437_v8  ;;  %v12508_v8 = vld [vmem:[#allocation19 + $0x30c] ss:$16 sps:$4 sm:$0xff]  }
 0xb85   : > { %8906 = vmatprep.subr.bf16.mxu0 %v12442_v37  ;;  %10808 = vmatpush3.bf16.msra.mxu1 %v12541_v58  ;;  %v12546_v37 = vld [vmem:[#allocation22 + $0xc0] sm:$0xff]  }
 0xb88   : > { %8907 = vmatpush1.bf16.msra.mxu0 %v12440_v36  ;;  %v12509_v36 = vld [vmem:[#allocation19 + $0x328] ss:$16 sps:$4 sm:$0xff]  }
 0xb89   : > { %8908 = vmatprep.subr.bf16.mxu0 %v12445_v30  ;;  %v12514_v30 = vld [vmem:[#allocation19 + $0x34c] ss:$16 sps:$4 sm:$0xff]  }
 0xb8c   : > { %8909 = vmatpush1.bf16.msra.mxu0 %v12443_v49  ;;  %v12515_v49 = vld [vmem:[#allocation19 + $0x368] ss:$16 sps:$4 sm:$0xff]  }
 0xb8d   : > { %8910 = vmatprep.subr.bf16.mxu0 %v12448_v2  ;;  %v12520_v2 = vld [vmem:[#allocation19 + $0x38c] ss:$16 sps:$4 sm:$0xff]  }
 0xb90   : > { %8911 = vmatpush1.bf16.msra.mxu0 %v12446_v42  ;;  %v12521_v42 = vld [vmem:[#allocation19 + $0x3a8] ss:$16 sps:$4 sm:$0xff]  }
 0xb91   : > { %8912 = vmatprep.subr.bf16.mxu0 %v12451_v6  ;;  %v12526_v6 = vld [vmem:[#allocation19 + $0x3cc] ss:$16 sps:$4 sm:$0xff]  }
 0xb94   : > { %8913 = vmatpush1.bf16.msra.mxu0 %v12449_v63  ;;  %v12527_v63 = vld [vmem:[#allocation19 + $0x3e8] ss:$16 sps:$4 sm:$0xff]  }
 0xb95   : > { %8914 = vmatprep.subr.bf16.mxu0 %v12454_v53  ;;  %v8158_v53 = vld [vmem:[#allocation20] sm:$0xf] }
 0xb96   : > { %v8163_v58 = vrot.slane %v8158_v53, %v13642_v15  ;;  %v12550_v15 = vld [vmem:[#allocation22 + $0xd0] sm:$0xff]  }
 0xb98   : > { %8915 = vmatpush1.bf16.msra.mxu0 %v12452_v9  ;;  %v8167_v9 = vrot.slane %v8158_v53, %v13648_v18  ;;  %v12551_v18 = vld [vmem:[#allocation22 + $0x90] sm:$0xff]  }
 0xb99   : > { %8916 = vmatprep.subr.bf16.mxu0 %v12457_v56 }
 0xb9c   : > { %8917 = vmatpush1.bf16.msra.mxu0 %v12455_v44 }
 0xb9d   : > { %8918 = vmatprep.subr.bf16.mxu0 %v12460_v57 }
 0xba0   : > { %8919 = vmatpush1.bf16.msra.mxu0 %v12458_v20 }
 0xba1   : > { %8920 = vmatprep.subr.bf16.mxu0 %v12463_v24 }
 0xba4   : > { %8921 = vmatpush1.bf16.msra.mxu0 %v12461_v10 }
 0xba5   : > { %8922 = vmatprep.subr.bf16.mxu0 %v12466_v22 }
 0xba8   : > { %8923 = vmatpush1.bf16.msra.mxu0 %v12464_v0 }
 0xba9   : > { %8924 = vmatprep.subr.bf16.mxu0 %v12469_v62 }
 0xbac   : > { %8925 = vmatpush1.bf16.msra.mxu0 %v12467_v26  ;;  %v12547_v26 = vld [vmem:[#allocation22 + $0x80] sm:$0xff]  }
 0xbad   : > { %8926 = vmatprep.subr.bf16.mxu0 %v12472_v21 }
 0xbb0   : > { %8927 = vmatpush1.bf16.msra.mxu0 %v12470_v45  ;;  %v12548_v45 = vld [vmem:[#allocation22 + $0xc8] sm:$0xff]  }
 0xbb1   : > { %8928 = vmatprep.subr.bf16.mxu0 %v12475_v12  ;;  %v12552_v12 = vld [vmem:[#allocation22 + $0xd8] sm:$0xff]  }
 0xbb4   : > { %8929 = vmatpush1.bf16.msra.mxu0 %v12473_v39  ;;  %v12553_v39 = vld [vmem:[#allocation22 + $0x98] sm:$0xff]  }
 0xbb5   : > { %8930 = vmatprep.subr.bf16.mxu0 %v12478_v41  ;;  %v12554_v41 = vld [vmem:[#allocation22 + $0xe0] sm:$0xff]  }
 0xbb8   : > { %8931 = vmatpush1.bf16.msra.mxu0 %v12476_v4  ;;  %v12555_v4 = vld [vmem:[#allocation22 + $0xa0] sm:$0xff]  }
 0xbb9   : > { %8932 = vmatprep.subr.bf16.mxu0 %v12481_v38  ;;  %v12556_v38 = vld [vmem:[#allocation22 + $0xe8] sm:$0xff]  }
 0xbbc   : > { %8933 = vmatpush1.bf16.msra.mxu0 %v12479_v5  ;;  %v12557_v5 = vld [vmem:[#allocation22 + $0xa8] sm:$0xff]  }
 0xbbd   : > { %8943 = vmatprep.subr.bf16.mxu0 %v12484_v55  ;;  %v12558_v55 = vld [vmem:[#allocation22 + $0xf0] sm:$0xff]  }
 0xbbf   : > { %8935 = vmatmul.mubr.bf16.vlgmr.msra.gmra.mrb[80].mxu0 %v14081_v59  ;;  %v12497_v59 = vld [vmem:[#allocation19 + $0x2a8] ss:$16 sps:$4 sm:$0xff]  }
 0xbc0   : > { %8944 = vmatpush1.bf16.msra.mxu0 %v12482_v47  ;;  %8975 = vmatprep.mubr.bf16.mxu0 %v14079_v52  ;;  %v12542_v52 = vld [vmem:[#allocation22 + $0x70] sm:$0xff]  }
 0xbc1   : > { %8945 = vmatprep.subr.bf16.mxu0 %v12487_v29  ;;  %10809 = vmatprep.subr.bf16.mxu1 %v12542_v52  ;;  %v12559_v47 = vld [vmem:[#allocation22 + $0xb0] sm:$0xff]   ;;  %v12560_v29 = vld [vmem:[#allocation22 + $0xf8] sm:$0xff]  }
 0xbc2   : > { %10810 = vmatpush3.bf16.msra.mxu1 %v12543_v33 }
 0xbc3   : > { %10811 = vmatprep.subr.bf16.mxu1 %v12544_v27 }
 0xbc4   : > { %8946 = vmatpush1.bf16.msra.mxu0 %v12485_v11  ;;  %v12561_v11 = vld [vmem:[#allocation22 + $0xb8] sm:$0xff]  }
 0xbc5   : > { %8947 = vmatprep.subr.bf16.mxu0 %v12490_v31  ;;  %v8171_v31 = vrot.slane %v8158_v53, %v13645_v16 }
 0xbc6   : > { %10812 = vmatpush3.bf16.msra.mxu1 %v12545_v7 }
 0xbc7   : > { %10819 = vmatprep.subr.bf16.mxu1 %v12546_v37 }
 0xbc8   : > { %8948 = vmatpush1.bf16.msra.mxu0 %v12488_v25  ;;  %v8175_v25 = vrot.slane %v8158_v53, %v1253_v19  ;;  %v10476_v19 = vld [vmem:[#allocation23] ss:$0 sm:$0xff] }
 0xbc9   : > { %8949 = vmatprep.subr.bf16.mxu0 %v12493_v43 }
 0xbcc   : > { %8950 = vmatpush1.bf16.msra.mxu0 %v12491_v48 }
 0xbcd   : > { %8951 = vmatprep.subr.bf16.mxu0 %v12496_v54 }
 0xbd0   : > { %8952 = vmatpush1.bf16.msra.mxu0 %v12494_v1 }
 0xbd1   : > { %8953 = vmatprep.subr.bf16.mxu0 %v12499_v28 }
 0xbd4   : > { %8954 = vmatpush1.bf16.msra.mxu0 %v12497_v59 }
 0xbd5   : > { %8955 = vmatprep.subr.bf16.mxu0 %v12502_v23 }
 0xbd8   : > { %8956 = vmatpush1.bf16.msra.mxu0 %v12500_v61 }
 0xbd9   : > { %8957 = vmatprep.subr.bf16.mxu0 %v12505_v60 }
 0xbdc   : > { %8958 = vmatpush1.bf16.msra.mxu0 %v12503_v35 }
 0xbdd   : > { %8959 = vmatprep.subr.bf16.mxu0 %v12508_v8 }
 0xbe0   : > { %8960 = vmatpush1.bf16.msra.mxu0 %v12506_v34 }
 0xbe1   : > { %8961 = vmatprep.subr.bf16.mxu0 %v12511_v17 }
 0xbe4   : > { %8962 = vmatpush1.bf16.msra.mxu0 %v12509_v36 }
 0xbe5   : > { %8963 = vmatprep.subr.bf16.mxu0 %v12514_v30 }
 0xbe8   : > { %8964 = vmatpush1.bf16.msra.mxu0 %v12512_v32 }
 0xbe9   : > { %8965 = vmatprep.subr.bf16.mxu0 %v12517_v51 }
 0xbec   : > { %8966 = vmatpush1.bf16.msra.mxu0 %v12515_v49 }
 0xbed   : > { %8967 = vmatprep.subr.bf16.mxu0 %v12520_v2 }
 0xbf0   : > { %8968 = vmatpush1.bf16.msra.mxu0 %v12518_v13 }
 0xbf1   : > { %8969 = vmatprep.subr.bf16.mxu0 %v12523_v40 }
 0xbf4   : > { %8970 = vmatpush1.bf16.msra.mxu0 %v12521_v42 }
 0xbf5   : > { %8971 = vmatprep.subr.bf16.mxu0 %v12526_v6 }
 0xbf8   : > { %8972 = vmatpush1.bf16.msra.mxu0 %v12524_v50 }
 0xbf9   : > { %8973 = vmatprep.subr.bf16.mxu0 %v12529_v46 }
 0xbfc   : > { %8974 = vmatpush1.bf16.msra.mxu0 %v12527_v63 }
 0xbff   : > { %8976 = vmatmul.mubr.bf16.vlgmr.msra.gmra.mrb[80].mxu0 %v14088_v3  ;;  %v12549_v3 = vld [vmem:[#allocation22 + $0x88] sm:$0xff]  }
 0xc52   : > { %v8895_v56 = vpop.f32.mrb[76].mxu0 }
 0xc53   : > { %v11009_v44 = vadd.f32 %v8895_v56, %v8163_v58  ;;  %v8897_v57 = vpop.f32.mrb[77].mxu0 }
 0xc54   : > { %v11010_v20 = vadd.f32 %v8897_v57, %v8167_v9  ;;  %v8899_v24 = vpop.f32.mrb[78].mxu0 }
 0xc55   : > { %v8984_v10 = vmax.f32 %v11009_v44, 0.0  ;;  %v8900_v22 = vpop.f32.mrb[79].mxu0 }
 0xc56   : > { %v8985_v0 = vmax.f32 %v11010_v20, 0.0 }
 0xc57   : > { %v8988_v21 = vpack.c.bf16 %v8984_v10, %v8984_v10 }
 0xc58   : > { %v8989_v62 = vpack.c.bf16 %v8985_v0, %v8985_v0 }
 0xc5a   : > { %9287 = vmatprep.mubr.bf16.mxu1 %v8989_v62 }
 0xc5b   : > { %9288 = vmatmul.mubr.bf16.vlgmr.msra.gmra.mrb[168].mxu1 %v8988_v21 }
 0xc5c   : > { %10820 = vmatpush3.bf16.msra.mxu1 %v12547_v26 }
 0xc5d   : > { %10821 = vmatprep.subr.bf16.mxu1 %v12548_v45 }
 0xc60   : > { %10822 = vmatpush3.bf16.msra.mxu1 %v12549_v3 }
 0xc61   : > { %10823 = vmatprep.subr.bf16.mxu1 %v12550_v15 }
 0xc64   : > { %10824 = vmatpush3.bf16.msra.mxu1 %v12551_v18 }
 0xc65   : > { %10825 = vmatprep.subr.bf16.mxu1 %v12552_v12 }
 0xc68   : > { %10826 = vmatpush3.bf16.msra.mxu1 %v12553_v39 }
 0xc69   : > { %10827 = vmatprep.subr.bf16.mxu1 %v12554_v41 }
 0xc6c   : > { %10828 = vmatpush3.bf16.msra.mxu1 %v12555_v4 }
 0xc6d   : > { %10829 = vmatprep.subr.bf16.mxu1 %v12556_v38 }
 0xc70   : > { %10830 = vmatpush3.bf16.msra.mxu1 %v12557_v5 }
 0xc71   : > { %10831 = vmatprep.subr.bf16.mxu1 %v12558_v55 }
 0xc74   : > { %10832 = vmatpush3.bf16.msra.mxu1 %v12559_v47 }
 0xc75   : > { %10833 = vmatprep.subr.bf16.mxu1 %v12560_v29 }
 0xc78   : > { %10834 = vmatpush3.bf16.msra.mxu1 %v12561_v11 }
 0xcd2   : > { %v8977_v43 = vpop.f32.mrb[80].mxu0 }
 0xcd3   : > { %v11011_v48 = vadd.f32 %v8977_v43, %v8171_v31  ;;  %v8979_v54 = vpop.f32.mrb[81].mxu0 }
 0xcd4   : > { %v11012_v1 = vadd.f32 %v8979_v54, %v8175_v25  ;;  %v8981_v28 = vpop.f32.mrb[82].mxu0 }
 0xcd5   : > { %v8986_v59 = vmax.f32 %v11011_v48, 0.0  ;;  %v8982_v23 = vpop.f32.mrb[83].mxu0 }
 0xcd6   : > { %v8987_v52 = vmax.f32 %v11012_v1, 0.0 }
 0xcd7   : > { %v8990_v61 = vpack.c.bf16 %v8986_v59, %v8986_v59 }
 0xcd8   : > { %v8991_v33 = vpack.c.bf16 %v8987_v52, %v8987_v52 }
 0xcda   : > { %9327 = vmatprep.mubr.bf16.mxu1 %v8991_v33 }
 0xcdb   : > { %9328 = vmatmul.mubr.bf16.vlgmr.msra.gmra.mrb[172].mxu1 %v8990_v61 }
 0xd2e   : > { %v10813_v60 = vpop.f32.mrb[168].mxu1 }
 0xd2f   : > { %v10814_v27 = vpop.f32.mrb[169].mxu1 }
 0xd30   : > { %v10815_v16 = vadd.f32 %v10814_v27, %v10813_v60  ;;  %v10816_v7 = vpop.f32.mrb[170].mxu1 }
 0xd31   : > { %v10817_v14 = vpop.f32.mrb[171].mxu1 }
 0xd32   : > { %v9290_v37 = vadd.f32 %v10815_v16, %v10476_v19 }
 0xdae   : > { %v10835_v35 = vpop.f32.mrb[172].mxu1 }
 0xdaf   : > { %v10836_v8 = vpop.f32.mrb[173].mxu1 }
 0xdb0   : > { %v10837_v34 = vadd.f32 %v10836_v8, %v10835_v35  ;;  %v10838_v17 = vpop.f32.mrb[174].mxu1 }
 0xdb1   : > { %v10839_v36 = vpop.f32.mrb[175].mxu1 }
 0xdb2   : > { %v9330_v30 = vadd.f32 %v10837_v34, %v9290_v37 }
 0xdb4   : > { %9335 = vst [vmem:[%s682_s2] sm:$0xf] %v9330_v30 }
 0xdb5   : > { %13053 = shalt.err (!%p13050_p7)
}
 0xdb6   : > { %s13054_s21 = scalar_lea.hbm %s14105_s1, 64  ;;  %s13058_s19 = scalar_lea.hbm %s14233_s26, 128 }
 0xdb7   : > { %p13055_p8 = scmp.ne.s32.totalorder %s14105_s1, %s13054_s21  ;;  %p13059_p6 = scmp.lt.u32.totalorder %s14105_s1, %s14233_s26 }
 0xdb8   : > { %p13060_p0 = scmp.lt.u32.totalorder %s13058_s19, %s13054_s21  ;;  %p13062_p10 = scmp.lt.u32.totalorder %s13054_s21, %s14105_s1 }
 0xdb9   : > { %p13056_p11 = pnand %p13055_p8, %p14234_p13 }
 0xdba   : > { %p13061_p9 = por %p13060_p0, %p13059_p6 }
 0xdbb   : > { %p13057_p5 = pneg %p13056_p11 }
 0xdbc   : > { %p13063_p12 = por %p13062_p10, %p13061_p9 }
 0xdbe   : > { %p13064_p1 = pnand %p13063_p12, %p13057_p5 }
 0xdc0   : > { %13067 = shalt.err (!%p13064_p1)
}
 0xdc1   : > { %11185 = dma.vmem_to_hbm [thread:$0]  (%p14234_p13), %s14107_s3, 64, %s14105_s1, %s9337_s22  }
 0xdc2 PF: > { %s14235_s25 = sld [smem:[#allocation38_spill]]  ;;  %s14236_s24 = sld [smem:[#allocation35_spill]] }
 0xdc3   : > { %s14237_s2 = sld [smem:[#allocation43_spill]] }
 0xdc8   : > { %p11262_p2 = scmp.ge.s32.totalorder %s14235_s25, 2  ;;  %s9362_s18 = sand.u32 1, %s14236_s24  }
 0xdc9   : > { %p14238_p3 = scmp.ne.s32.totalorder %s14237_s2, 0  ;;  %s9363_s15 = scalar_lea.sflag [#allocation4], %s9362_s18 }
 0xdcb   : > { %p11231_p4 = pnand %p11262_p2, %p14238_p3 }
 0xdcd   : > { %13117 = dma.done.wait (!%p11231_p4), %s9363_s15, 64  }
 0xdce   : > { %13119 = vsyncadd (!%p11231_p4), %s9363_s15, 4294967232  ;;  %s14239_s21 = sld [smem:[#allocation40_spill]]  ;;  %s14240_s18 = sld [smem:[#allocation36_spill]] }
 0xdcf   : > { %s14241_s19 = sld [smem:[#allocation37_spill]]  ;;  %s14242_s20 = sld [smem:[#allocation41_spill]] }
 0xdd4   : > { %p33_p7 = scmp.ge.s32.totalorder %s14239_s21, 4  }
 0xdd6   :  { %35 = sbr.rel (!%p33_p7) target bundleno = 17 (0x11), region = 182 }
 0xddd   :  { %9368 = vsyncpa [#allocation3], 1 }
 0xdde   :  { %9370 = vsyncpa [#allocation3 + $0x1], 1 }
 0xddf   :  { %9371 = vsyncpa [#allocation6], 1 }
 0xde0   :  { %9372 = vsyncpa [#allocation9], 1 }
 0xde1   :  { %9373 = vsyncpa [#allocation12], 1 }
 0xde2   :  { %9374 = vsyncpa [#allocation15], 1 }
 0xde3   :  { %9375 = vsyncpa [#allocation18], 1 }
 0xde4   :  { %9376 = vsyncpa [#allocation21], 1 }
 0xde5   :  { %9377 = vsyncpa [#allocation24], 1 }
 0xde6   :  { %9378 = vsyncpa [#allocation4], 1 }
 0xde7   :  { %9380 = vsyncpa [#allocation4 + $0x1], 1 }

</bundles_post_ra>
